<compile_context>
chip_gen: v5e
topology: v5e:2x2
jax: 0.10.0
libtpu: 0.0.40
codegen_flags: <defaults>
</compile_context>

<pallas_src>
import functools

import jax
import jax.numpy as jnp
from jax.experimental import pallas as pl
from jax.experimental.pallas import tpu as pltpu

NEG_SLOPE = 0.01  # nn.LeakyReLU default

D_IN, D_H1, D_H2, D_H3, D_OUT = 223, 512, 512, 1024, 20
D_OUT_PAD = 128    # head output padded to a lane-dense 128-wide store


def _round_up(n, m):
    return ((n + m - 1) // m) * m


def _leaky_relu(x):
    # Mathematically identical to LeakyReLU for slope in (0, 1); 2 VPU ops (mul + max).
    return jnp.maximum(x, NEG_SLOPE * x)


def mlp_kernel(x_ref,
               w1_ref, b1_ref,
               w2_ref, b2_ref,
               w3_ref, b3_ref,
               w4_ref, b4_ref,
               o_ref):
    # All matmuls: bf16 operands, f32 accumulation on the MXU.
    x = x_ref[...].astype(jnp.bfloat16)

    # Layer 1: [tm, 223] @ [223, 512]; bias-add + LeakyReLU in bf16.
    h = jnp.dot(x, w1_ref[...], preferred_element_type=jnp.float32)
    h = _leaky_relu(h.astype(jnp.bfloat16) + b1_ref[...])
    # Dropout(0.2) -> identity in eval mode.

    # Layer 2: [tm, 512] @ [512, 512]
    h = jnp.dot(h, w2_ref[...], preferred_element_type=jnp.float32)
    h = _leaky_relu(h.astype(jnp.bfloat16) + b2_ref[...])

    # Layer 3: [tm, 512] @ [512, 1024]
    h = jnp.dot(h, w3_ref[...], preferred_element_type=jnp.float32)
    h = _leaky_relu(h.astype(jnp.bfloat16) + b3_ref[...])

    # Layer 4 (head): [tm, 1024] @ [1024, 128]; f32 bias + f32 output.
    out = jnp.dot(h, w4_ref[...], preferred_element_type=jnp.float32) + b4_ref[...]
    o_ref[...] = out


@functools.lru_cache(maxsize=None)
def _build_call(tm, steps):
    """pallas_call cached by (batch-tile, grid-steps) so we never rebuild per forward."""
    b_pad = tm * steps

    x_spec = pl.BlockSpec((tm, D_IN), lambda i: (i, 0))
    o_spec = pl.BlockSpec((tm, D_OUT_PAD), lambda i: (i, 0))

    def wspec(shape):
        # Grid-invariant block -> Pallas keeps it resident and skips re-DMA across steps.
        return pl.BlockSpec(shape, lambda i: (0, 0))

    return pl.pallas_call(
        mlp_kernel,
        out_shape=jax.ShapeDtypeStruct((b_pad, D_OUT_PAD), jnp.float32),
        grid_spec=pltpu.PrefetchScalarGridSpec(
            num_scalar_prefetch=0,
            grid=(steps,),
            in_specs=[
                x_spec,
                wspec((D_IN, D_H1)), wspec((1, D_H1)),
                wspec((D_H1, D_H2)), wspec((1, D_H2)),
                wspec((D_H2, D_H3)), wspec((1, D_H3)),
                wspec((D_H3, D_OUT_PAD)), wspec((1, D_OUT_PAD)),
            ],
            out_specs=o_spec,
        ),
        compiler_params=pltpu.CompilerParams(
            # Batch tiles are independent -> shard across the 2 TensorCores on v7x.
            dimension_semantics=("parallel",),
            # tm=1024 needs > v5e's 16 MiB scoped default; 32 MiB fits every generation.
            vmem_limit_bytes=32 * 1024 * 1024,
        ),
    )


def _choose_tiling(B):
    """Pick (tm, steps): single tile for small B, otherwise ~512-1024 rows/step with an
    even step count so v7x's two TensorCores get balanced work."""
    if B <= 256:
        tm = max(8, _round_up(B, 8))
        return tm, 1
    steps = max(2, _round_up(pl.cdiv(B, 1024), 2))
    tm = _round_up(pl.cdiv(B, steps), 128)
    return tm, steps


def prepare_params(params):
    """One-time prep: cast weights/biases to bf16 and pad the head to 128 lanes.
    Do this once at model-load time, NOT per forward call."""
    w1, b1 = params["l1"]
    w2, b2 = params["l2"]
    w3, b3 = params["l3"]
    w4, b4 = params["l4"]

    w4_p = jnp.zeros((D_H3, D_OUT_PAD), jnp.bfloat16).at[:, :D_OUT].set(w4.astype(jnp.bfloat16))
    b4_p = jnp.zeros((1, D_OUT_PAD), jnp.float32).at[:, :D_OUT].set(b4)

    return (
        w1.astype(jnp.bfloat16), b1.astype(jnp.bfloat16),
        w2.astype(jnp.bfloat16), b2.astype(jnp.bfloat16),
        w3.astype(jnp.bfloat16), b3.astype(jnp.bfloat16),
        w4_p, b4_p,
    )


def mlp_forward(x, prepped):
    """x: [B, 223] float32. prepped: output of prepare_params. Returns [B, 20] f32."""
    B = x.shape[0]
    assert x.shape[1] == D_IN

    tm, steps = _choose_tiling(B)
    b_pad = tm * steps

    if b_pad != B:
        # Row-pad only (zeros); padded rows are sliced off below.
        x = jnp.zeros((b_pad, D_IN), x.dtype).at[:B, :].set(x)

    out = _build_call(tm, steps)(x, *prepped)
    return out[:B, :D_OUT]


def init_params(key):
    """Deterministic init mimicking PyTorch Linear: U(-1/sqrt(fan_in), 1/sqrt(fan_in))."""
    dims = [(D_IN, D_H1), (D_H1, D_H2), (D_H2, D_H3), (D_H3, D_OUT)]
    params = {}
    for idx, (fan_in, fan_out) in enumerate(dims, start=1):
        key, kw, kb = jax.random.split(key, 3)
        bound = 1.0 / jnp.sqrt(jnp.float32(fan_in))
        w = jax.random.uniform(kw, (fan_in, fan_out), jnp.float32, -bound, bound)
        b = jax.random.uniform(kb, (1, fan_out), jnp.float32, -bound, bound)
        params[f"l{idx}"] = (w, b)
    return params


def reference_forward(x, params):
    h = x
    for name in ["l1", "l2", "l3"]:
        w, b = params[name]
        h = jnp.dot(h, w) + b
        h = jnp.where(h > 0, h, NEG_SLOPE * h)
    w, b = params["l4"]
    return jnp.dot(h, w) + b


if __name__ == "__main__":
    key = jax.random.PRNGKey(0)
    key, kx = jax.random.split(key)
    batch = 16
    x = jax.random.normal(kx, (batch, D_IN), jnp.float32)
    params = init_params(key)
    prepped = prepare_params(params)

    out = mlp_forward(x, prepped)
    out = jax.block_until_ready(out)

    ref = reference_forward(x, params)
    assert out.shape == (batch, D_OUT)
    # bf16 matmul operands + bf16 bias/activation path with f32 MXU accumulation:
    # loosened tolerance vs. the pure-f32 reference.
    assert jnp.allclose(out, ref, atol=5e-2, rtol=5e-2), "mismatch vs JAX reference"

    print("KERNEL_OK")
</pallas_src>

<mosaic_0001>
module attributes {stable_mosaic.version = 11 : i64} {
  func.func @mlp_kernel(%arg0: i32, %arg1: memref<16x223xf32, #tpu.memory_space<vmem>>, %arg2: memref<223x512xbf16, #tpu.memory_space<vmem>>, %arg3: memref<1x512xbf16, #tpu.memory_space<vmem>>, %arg4: memref<512x512xbf16, #tpu.memory_space<vmem>>, %arg5: memref<1x512xbf16, #tpu.memory_space<vmem>>, %arg6: memref<512x1024xbf16, #tpu.memory_space<vmem>>, %arg7: memref<1x1024xbf16, #tpu.memory_space<vmem>>, %arg8: memref<1024x128xbf16, #tpu.memory_space<vmem>>, %arg9: memref<1x128xf32, #tpu.memory_space<vmem>>, %arg10: memref<16x128xf32, #tpu.memory_space<vmem>>) attributes {dimension_semantics = [#tpu.dimension_semantics<parallel>], iteration_bounds = array<i64: 1>, scalar_prefetch = 0 : i64, scratch_operands = 0 : i64, tpu.core_type = #tpu.core_type<tc>, window_params = [{transform_indices = @transform_0, window_bounds = array<i64: 16, 223>}, {pipeline_mode = #tpu.pipeline_mode<synchronous>, transform_indices = @transform_1, window_bounds = array<i64: 223, 512>}, {pipeline_mode = #tpu.pipeline_mode<synchronous>, transform_indices = @transform_2, window_bounds = array<i64: 1, 512>}, {pipeline_mode = #tpu.pipeline_mode<synchronous>, transform_indices = @transform_3, window_bounds = array<i64: 512, 512>}, {pipeline_mode = #tpu.pipeline_mode<synchronous>, transform_indices = @transform_4, window_bounds = array<i64: 1, 512>}, {pipeline_mode = #tpu.pipeline_mode<synchronous>, transform_indices = @transform_5, window_bounds = array<i64: 512, 1024>}, {pipeline_mode = #tpu.pipeline_mode<synchronous>, transform_indices = @transform_6, window_bounds = array<i64: 1, 1024>}, {pipeline_mode = #tpu.pipeline_mode<synchronous>, transform_indices = @transform_7, window_bounds = array<i64: 1024, 128>}, {pipeline_mode = #tpu.pipeline_mode<synchronous>, transform_indices = @transform_8, window_bounds = array<i64: 1, 128>}, {transform_indices = @transform_9, window_bounds = array<i64: 16, 128>}]} {
    %c0 = arith.constant 0 : index
    %c0_0 = arith.constant 0 : index
    %0 = vector.load %arg1[%c0, %c0_0] : memref<16x223xf32, #tpu.memory_space<vmem>>, vector<16x223xf32>
    %1 = arith.truncf %0 : vector<16x223xf32> to vector<16x223xbf16>
    %c0_1 = arith.constant 0 : index
    %c0_2 = arith.constant 0 : index
    %2 = vector.load %arg2[%c0_1, %c0_2] : memref<223x512xbf16, #tpu.memory_space<vmem>>, vector<223x512xbf16>
    %cst = arith.constant dense<0.000000e+00> : vector<16x512xf32>
    %3 = tpu.matmul %1, %2, %cst {dimension_numbers = #tpu.dot_dimension_numbers<[1], [0], [0], [1], [0, 0, 1, 1], [], []>} : vector<16x223xbf16>, vector<223x512xbf16>, vector<16x512xf32> -> vector<16x512xf32>
    %4 = arith.truncf %3 : vector<16x512xf32> to vector<16x512xbf16>
    %c0_3 = arith.constant 0 : index
    %c0_4 = arith.constant 0 : index
    %5 = vector.load %arg3[%c0_3, %c0_4] : memref<1x512xbf16, #tpu.memory_space<vmem>>, vector<1x512xbf16>
    %6 = vector.broadcast %5 : vector<1x512xbf16> to vector<16x512xbf16>
    %7 = arith.addf %4, %6 : vector<16x512xbf16>
    %cst_5 = arith.constant 1.000980e-02 : bf16
    %8 = vector.broadcast %cst_5 : bf16 to vector<16x512xbf16>
    %9 = arith.mulf %8, %7 : vector<16x512xbf16>
    %10 = arith.maximumf %7, %9 : vector<16x512xbf16>
    %c0_6 = arith.constant 0 : index
    %c0_7 = arith.constant 0 : index
    %11 = vector.load %arg4[%c0_6, %c0_7] : memref<512x512xbf16, #tpu.memory_space<vmem>>, vector<512x512xbf16>
    %cst_8 = arith.constant dense<0.000000e+00> : vector<16x512xf32>
    %12 = tpu.matmul %10, %11, %cst_8 {dimension_numbers = #tpu.dot_dimension_numbers<[1], [0], [0], [1], [0, 0, 1, 1], [], []>} : vector<16x512xbf16>, vector<512x512xbf16>, vector<16x512xf32> -> vector<16x512xf32>
    %13 = arith.truncf %12 : vector<16x512xf32> to vector<16x512xbf16>
    %c0_9 = arith.constant 0 : index
    %c0_10 = arith.constant 0 : index
    %14 = vector.load %arg5[%c0_9, %c0_10] : memref<1x512xbf16, #tpu.memory_space<vmem>>, vector<1x512xbf16>
    %15 = vector.broadcast %14 : vector<1x512xbf16> to vector<16x512xbf16>
    %16 = arith.addf %13, %15 : vector<16x512xbf16>
    %cst_11 = arith.constant 1.000980e-02 : bf16
    %17 = vector.broadcast %cst_11 : bf16 to vector<16x512xbf16>
    %18 = arith.mulf %17, %16 : vector<16x512xbf16>
    %19 = arith.maximumf %16, %18 : vector<16x512xbf16>
    %c0_12 = arith.constant 0 : index
    %c0_13 = arith.constant 0 : index
    %20 = vector.load %arg6[%c0_12, %c0_13] : memref<512x1024xbf16, #tpu.memory_space<vmem>>, vector<512x1024xbf16>
    %cst_14 = arith.constant dense<0.000000e+00> : vector<16x1024xf32>
    %21 = tpu.matmul %19, %20, %cst_14 {dimension_numbers = #tpu.dot_dimension_numbers<[1], [0], [0], [1], [0, 0, 1, 1], [], []>} : vector<16x512xbf16>, vector<512x1024xbf16>, vector<16x1024xf32> -> vector<16x1024xf32>
    %22 = arith.truncf %21 : vector<16x1024xf32> to vector<16x1024xbf16>
    %c0_15 = arith.constant 0 : index
    %c0_16 = arith.constant 0 : index
    %23 = vector.load %arg7[%c0_15, %c0_16] : memref<1x1024xbf16, #tpu.memory_space<vmem>>, vector<1x1024xbf16>
    %24 = vector.broadcast %23 : vector<1x1024xbf16> to vector<16x1024xbf16>
    %25 = arith.addf %22, %24 : vector<16x1024xbf16>
    %cst_17 = arith.constant 1.000980e-02 : bf16
    %26 = vector.broadcast %cst_17 : bf16 to vector<16x1024xbf16>
    %27 = arith.mulf %26, %25 : vector<16x1024xbf16>
    %28 = arith.maximumf %25, %27 : vector<16x1024xbf16>
    %c0_18 = arith.constant 0 : index
    %c0_19 = arith.constant 0 : index
    %29 = vector.load %arg8[%c0_18, %c0_19] : memref<1024x128xbf16, #tpu.memory_space<vmem>>, vector<1024x128xbf16>
    %cst_20 = arith.constant dense<0.000000e+00> : vector<16x128xf32>
    %30 = tpu.matmul %28, %29, %cst_20 {dimension_numbers = #tpu.dot_dimension_numbers<[1], [0], [0], [1], [0, 0, 1, 1], [], []>} : vector<16x1024xbf16>, vector<1024x128xbf16>, vector<16x128xf32> -> vector<16x128xf32>
    %c0_21 = arith.constant 0 : index
    %c0_22 = arith.constant 0 : index
    %31 = vector.load %arg9[%c0_21, %c0_22] : memref<1x128xf32, #tpu.memory_space<vmem>>, vector<1x128xf32>
    %32 = vector.broadcast %31 : vector<1x128xf32> to vector<16x128xf32>
    %33 = arith.addf %30, %32 : vector<16x128xf32>
    %c0_23 = arith.constant 0 : index
    %c0_24 = arith.constant 0 : index
    %34 = vector.load %arg10[%c0_23, %c0_24] : memref<16x128xf32, #tpu.memory_space<vmem>>, vector<16x128xf32>
    tpu.vector_store %arg10[%c0_23, %c0_24], %33 {strides = array<i32>} : memref<16x128xf32, #tpu.memory_space<vmem>>, vector<16x128xf32>,
    return
  }
  func.func @transform_0(%arg0: i32) -> (i32, i32) {
    %c0_i32 = arith.constant 0 : i32
    %c0_i32_0 = arith.constant 0 : i32
    return %arg0, %c0_i32 : i32, i32
  }
  func.func @transform_1(%arg0: i32) -> (i32, i32) {
    %c0_i32 = arith.constant 0 : i32
    %c0_i32_0 = arith.constant 0 : i32
    %c0_i32_1 = arith.constant 0 : i32
    return %c0_i32, %c0_i32_0 : i32, i32
  }
  func.func @transform_2(%arg0: i32) -> (i32, i32) {
    %c0_i32 = arith.constant 0 : i32
    %c0_i32_0 = arith.constant 0 : i32
    %c0_i32_1 = arith.constant 0 : i32
    return %c0_i32, %c0_i32_0 : i32, i32
  }
  func.func @transform_3(%arg0: i32) -> (i32, i32) {
    %c0_i32 = arith.constant 0 : i32
    %c0_i32_0 = arith.constant 0 : i32
    %c0_i32_1 = arith.constant 0 : i32
    return %c0_i32, %c0_i32_0 : i32, i32
  }
  func.func @transform_4(%arg0: i32) -> (i32, i32) {
    %c0_i32 = arith.constant 0 : i32
    %c0_i32_0 = arith.constant 0 : i32
    %c0_i32_1 = arith.constant 0 : i32
    return %c0_i32, %c0_i32_0 : i32, i32
  }
  func.func @transform_5(%arg0: i32) -> (i32, i32) {
    %c0_i32 = arith.constant 0 : i32
    %c0_i32_0 = arith.constant 0 : i32
    %c0_i32_1 = arith.constant 0 : i32
    return %c0_i32, %c0_i32_0 : i32, i32
  }
  func.func @transform_6(%arg0: i32) -> (i32, i32) {
    %c0_i32 = arith.constant 0 : i32
    %c0_i32_0 = arith.constant 0 : i32
    %c0_i32_1 = arith.constant 0 : i32
    return %c0_i32, %c0_i32_0 : i32, i32
  }
  func.func @transform_7(%arg0: i32) -> (i32, i32) {
    %c0_i32 = arith.constant 0 : i32
    %c0_i32_0 = arith.constant 0 : i32
    %c0_i32_1 = arith.constant 0 : i32
    return %c0_i32, %c0_i32_0 : i32, i32
  }
  func.func @transform_8(%arg0: i32) -> (i32, i32) {
    %c0_i32 = arith.constant 0 : i32
    %c0_i32_0 = arith.constant 0 : i32
    %c0_i32_1 = arith.constant 0 : i32
    return %c0_i32, %c0_i32_0 : i32, i32
  }
  func.func @transform_9(%arg0: i32) -> (i32, i32) {
    %c0_i32 = arith.constant 0 : i32
    %c0_i32_0 = arith.constant 0 : i32
    return %arg0, %c0_i32 : i32, i32
  }
}

</mosaic_0001>

<bundles_post_ra>
// kernel: tpu_custom_call.1
= control target key start
LH: loop header
LB: loop body
LE: loop exit
PB: predicated region body
PF: predicated region fallthrough
CT: control target
= control target key end

     0   :  { %14 = vsyncpa [#allocation3], 0  ;;  %s7661_s0 = inlined_call_operand.hbm [shape: f32[16,223], index: 0, kind: input, shape index: {}]   ;;  %s7662_s1 = inlined_call_operand.hbm [shape: bf16[223,512], index: 1, kind: input, shape index: {}]   ;;  %s7663_s2 = inlined_call_operand.hbm [shape: bf16[1,512], index: 2, kind: input, shape index: {}]   ;;  %s7664_s3 = inlined_call_operand.hbm [shape: bf16[512,512], index: 3, kind: input, shape index: {}]   ;;  %s7665_s4 = inlined_call_operand.hbm [shape: bf16[1,512], index: 4, kind: input, shape index: {}]   ;;  %s7666_s5 = inlined_call_operand.hbm [shape: bf16[512,1024], index: 5, kind: input, shape index: {}]   ;;  %s7667_s6 = inlined_call_operand.hbm [shape: bf16[1,1024], index: 6, kind: input, shape index: {}]   ;;  %s7668_s7 = inlined_call_operand.hbm [shape: bf16[1024,128], index: 7, kind: input, shape index: {}]   ;;  %s7669_s8 = inlined_call_operand.vmem [shape: f32[1,128], index: 8, kind: input, shape index: {}]   ;;  %s7670_s9 = inlined_call_operand.hbm [shape: f32[16,128], index: 9, kind: output, shape index: {}]  }
   0x1   :  { %15 = vsyncpa [#allocation6], 0 }
   0x2   :  { %16 = vsyncpa [#allocation9], 0 }
   0x3   :  { %17 = vsyncpa [#allocation12], 0 }
   0x4   :  { %18 = vsyncpa [#allocation15], 0 }
   0x5   :  { %19 = vsyncpa [#allocation4], 0  ;;  %s37_s11 = sshll.u32 %s7662_s1, 4  ;;  %s7368_s12 = smov [#allocation5]   ;;  %s38_s11 = int_to_ptr.hbm [resolvable:$true] %s37_s11 }
   0x6   :  { %s39_s13 = sshll.u32 %s7368_s12, 4  ;;  %s61_s16 = sshll.u32 %s7664_s3, 4  ;;  %s40_s13 = int_to_ptr.vmem [resolvable:$true] %s39_s13  ;;  %s62_s16 = int_to_ptr.hbm [resolvable:$true] %s61_s16 }
   0x7   :  { %s7369_s17 = smov 256   ;;  %s7370_s18 = smov 16  }
   0x8   :  { %45 = dma.hbm_to_vmem [thread:$0]  %s38_s11, 7168, %s40_s13, [#allocation6], %s7369_s17, %s7369_s17, %s7370_s18  }
   0x9   :  { %s7371_s19 = smov [#allocation8]   ;;  %s85_s23 = sshll.u32 %s7666_s5, 4  ;;  %s86_s23 = int_to_ptr.hbm [resolvable:$true] %s85_s23 }
   0xa   :  { %s63_s20 = sshll.u32 %s7371_s19, 4  ;;  %s7372_s1 = smov [#allocation11]   ;;  %s64_s20 = int_to_ptr.vmem [resolvable:$true] %s63_s20 }
   0xb   :  { %69 = dma.hbm_to_vmem [thread:$0]  %s62_s16, 16384, %s64_s20, [#allocation9], %s7369_s17, %s7369_s17, %s7370_s18  }
   0xc   :  { %s87_s24 = sshll.u32 %s7372_s1, 4  ;;  %s24_s3 = sshll.u32 %s7661_s0, 4  ;;  %s88_s24 = int_to_ptr.vmem [resolvable:$true] %s87_s24  ;;  %s25_s3 = int_to_ptr.hbm [resolvable:$true] %s24_s3 }
   0xd   :  { %s7373_s27 = smov 512   ;;  %s7374_s28 = smov 32  }
   0xe   :  { %93 = dma.hbm_to_vmem [thread:$0]  %s86_s23, 32768, %s88_s24, [#allocation12], %s7373_s27, %s7373_s27, %s7374_s28  }
   0xf   :  { %s7375_s29 = smov [#allocation2]   ;;  %s51_s5 = sshll.u32 %s7663_s2, 4  ;;  %s52_s5 = int_to_ptr.hbm [resolvable:$true] %s51_s5 }
  0x10   :  { %s26_s30 = sshll.u32 %s7375_s29, 4  ;;  %s75_s14 = sshll.u32 %s7665_s4, 4  ;;  %s27_s30 = int_to_ptr.vmem [resolvable:$true] %s26_s30  ;;  %s76_s14 = int_to_ptr.hbm [resolvable:$true] %s75_s14 }
  0x11   :  { %32 = dma.hbm_to_vmem [thread:$0]  %s25_s3, 512, %s27_s30, [#allocation3], %s7369_s17, %s7369_s17, %s7370_s18  }
  0x12   :  { %s7376_s15 = smov [#allocation7]   ;;  %s7377_s0 = smov [#allocation10]  }
  0x13   :  { %s53_s16 = sshll.u32 %s7376_s15, 4  ;;  %s77_s19 = sshll.u32 %s7377_s0, 4  ;;  %s54_s16 = int_to_ptr.vmem [resolvable:$true] %s53_s16  ;;  %s78_s19 = int_to_ptr.vmem [resolvable:$true] %s77_s19 }
  0x14   :  { %56 = dma.hbm_to_vmem [thread:$0]  %s52_s5, 64, %s54_s16, [#allocation6]  }
  0x15   :  { %s99_s22 = sshll.u32 %s7667_s6, 4  ;;  %s109_s18 = sshll.u32 %s7668_s7, 4  ;;  %s100_s22 = int_to_ptr.hbm [resolvable:$true] %s99_s22  ;;  %s110_s18 = int_to_ptr.hbm [resolvable:$true] %s109_s18 }
  0x16   :  { %80 = dma.hbm_to_vmem [thread:$0]  %s76_s14, 64, %s78_s19, [#allocation9]  }
  0x17   :  { %s7378_s23 = smov [#allocation13]   ;;  %s7379_s1 = smov [#allocation14]  }
  0x18   :  { %s101_s4 = sshll.u32 %s7378_s23, 4  ;;  %s111_s24 = sshll.u32 %s7379_s1, 4  ;;  %s102_s4 = int_to_ptr.vmem [resolvable:$true] %s101_s4  ;;  %s112_s24 = int_to_ptr.vmem [resolvable:$true] %s111_s24 }
  0x19   :  { %104 = dma.hbm_to_vmem [thread:$0]  %s100_s22, 128, %s102_s4, [#allocation12]  }
  0x1a   :  { %s7380_s25 = smov 64   ;;  %s7381_s26 = smov 4  }
  0x1b   :  { %117 = dma.hbm_to_vmem [thread:$0]  %s110_s18, 8192, %s112_s24, [#allocation15], %s7380_s25, %s7380_s25, %s7381_s26  }
  0x1c   :  { %7356 = dma.done.wait [#allocation3], 512  }
  0x1d   :  { %7357 = vsyncadd [#allocation3], 4294966784 }
  0x1e   :  { %7358 = dma.done.wait [#allocation6], 7232  }
  0x1f   :  { %7359 = vsyncadd [#allocation6], 4294960064 }
  0x20   :  { %7360 = dma.done.wait [#allocation9], 16448  }
  0x21   :  { %7361 = vsyncadd [#allocation9], 4294950848 }
  0x22   :  { %7362 = dma.done.wait [#allocation12], 32896  }
  0x23   :  { %7363 = vsyncadd [#allocation12], 4294934400 }
  0x24   :  { %7364 = dma.done.wait [#allocation15], 8192  }
  0x25   :  { %7365 = vsyncadd [#allocation15], 4294959104  ;;  %vm495_vm0 = vcmask 1046528   ;;  %vm496_vm1 = vcmask 1047552   ;;  %v7382_v0 = vmov 65535   ;;  %vm491_vm2 = vcmask 777216  }
  0x26   :  { %v497_v1 = vsel %vm495_vm0, 4294967295, %v7382_v0  ;;  %v4711_v3 = vld [vmem:[#allocation5 + $0xe0] sm:$0xf]  ;;  %v6647_v4 = vld [vmem:[#allocation5 + $0xec] sm:$0xf0]  ;;  %s4580_s29 = sshll.u32 %s7670_s9, 4  ;;  %s4581_s29 = int_to_ptr.hbm [resolvable:$true] %s4580_s29 }
  0x27   :  { %v7460_v2 = vsel %vm496_vm1, %v497_v1, 0  ;;  %v6645_v5 = vld [vmem:[#allocation5 + $0xe4] sm:$0xf]  ;;  %v4712_v6 = vor.u32 %v6647_v4, %v4711_v3  ;;  %v4713_v7 = vld [vmem:[#allocation5 + $0xf0] sm:$0xf0]  ;;  %s7384_s30 = smov 128  }
  0x28   :  { %v4807_v8 = vld [vmem:[#allocation5 + $0x1a0] sm:$0xf]  ;;  %v6671_v9 = vld [vmem:[#allocation5 + $0x1ac] sm:$0xf0]  ;;  %v4716_v10 = vor.u32 %v6645_v5, %v4713_v7  ;;  %v6669_v12 = vld [vmem:[#allocation5 + $0x1a4] sm:$0xf] }
  0x29   :  { %v4808_v11 = vor.u32 %v6671_v9, %v4807_v8  ;;  %v4809_v13 = vld [vmem:[#allocation5 + $0x1b0] sm:$0xf0]  ;;  %v4695_v14 = vld [vmem:[#allocation5 + $0xc0] sm:$0xf]  ;;  %511 = vmatpush.bf16.msra.mxu0 %v4712_v6  ;;  %v6643_v16 = vld [vmem:[#allocation5 + $0xcc] sm:$0xf0] }
  0x2a   :  { %v4812_v15 = vor.u32 %v6669_v12, %v4809_v13  ;;  %v6641_v17 = vld [vmem:[#allocation5 + $0xc4] sm:$0xf]  ;;  %v4697_v18 = vld [vmem:[#allocation5 + $0xd0] sm:$0xf0]  ;;  %539 = vmatpush.bf16.msra.mxu2 %v4716_v10  ;;  %v4696_v20 = vor.u32 %v6643_v16, %v4695_v14  ;;  %v4791_v22 = vld [vmem:[#allocation5 + $0x180] sm:$0xf] }
  0x2b   :  { %v500_v19 = vand.u32 %v4808_v11, %v7460_v2  ;;  %v4700_v21 = vor.u32 %v6641_v17, %v4697_v18  ;;  %v6667_v23 = vld [vmem:[#allocation5 + $0x18c] sm:$0xf0]  ;;  %v6665_v24 = vld [vmem:[#allocation5 + $0x184] sm:$0xf]  ;;  %v4793_v26 = vld [vmem:[#allocation5 + $0x190] sm:$0xf0] }
  0x2c   :  { %v503_v25 = vand.u32 %v4812_v15, %v7460_v2  ;;  %v4679_v27 = vld [vmem:[#allocation5 + $0xa0] sm:$0xf]  ;;  %v6639_v28 = vld [vmem:[#allocation5 + $0xac] sm:$0xf0]  ;;  %v4792_v29 = vor.u32 %v6667_v23, %v4791_v22  ;;  %v6637_v30 = vld [vmem:[#allocation5 + $0xa4] sm:$0xf]  ;;  %v4796_v32 = vor.u32 %v6665_v24, %v4793_v26 }
  0x2d   :  { %527 = vmatpush.bf16.msra.mxu1 %v500_v19  ;;  %v4681_v31 = vld [vmem:[#allocation5 + $0xb0] sm:$0xf0]  ;;  %512 = vmatpush.bf16.msra.mxu0 %v4696_v20  ;;  %v4680_v33 = vor.u32 %v6639_v28, %v4679_v27  ;;  %v4775_v34 = vld [vmem:[#allocation5 + $0x160] sm:$0xf]  ;;  %v6663_v35 = vld [vmem:[#allocation5 + $0x16c] sm:$0xf0] }
  0x2e   :  { %555 = vmatpush.bf16.msra.mxu3 %v503_v25  ;;  %v6661_v36 = vld [vmem:[#allocation5 + $0x164] sm:$0xf]  ;;  %540 = vmatpush.bf16.msra.mxu2 %v4700_v21  ;;  %v4684_v37 = vor.u32 %v6637_v30, %v4681_v31  ;;  %v4777_v38 = vld [vmem:[#allocation5 + $0x170] sm:$0xf0]  ;;  %v4663_v39 = vld [vmem:[#allocation5 + $0x80] sm:$0xf]  ;;  %v4776_v43 = vor.u32 %v6663_v35, %v4775_v34 }
  0x2f   :  { %v6635_v40 = vld [vmem:[#allocation5 + $0x8c] sm:$0xf0]  ;;  %v6633_v41 = vld [vmem:[#allocation5 + $0x84] sm:$0xf]  ;;  %v4665_v42 = vld [vmem:[#allocation5 + $0x90] sm:$0xf0]  ;;  %v4780_v44 = vor.u32 %v6661_v36, %v4777_v38 }
  0x30   :  { %v4664_v45 = vor.u32 %v6635_v40, %v4663_v39  ;;  %v4759_v46 = vld [vmem:[#allocation5 + $0x140] sm:$0xf]  ;;  %v6659_v47 = vld [vmem:[#allocation5 + $0x14c] sm:$0xf0]  ;;  %v6657_v48 = vld [vmem:[#allocation5 + $0x144] sm:$0xf]  ;;  %v4668_v49 = vor.u32 %v6633_v41, %v4665_v42 }
  0x31   :  { %528 = vmatpush.bf16.msra.mxu1 %v4792_v29  ;;  %513 = vmatpush.bf16.msra.mxu0 %v4680_v33  ;;  %v4761_v50 = vld [vmem:[#allocation5 + $0x150] sm:$0xf0]  ;;  %v4647_v51 = vld [vmem:[#allocation5 + $0x60] sm:$0xf]  ;;  %v6631_v52 = vld [vmem:[#allocation5 + $0x6c] sm:$0xf0]  ;;  %v4760_v55 = vor.u32 %v6659_v47, %v4759_v46 }
  0x32   :  { %556 = vmatpush.bf16.msra.mxu3 %v4796_v32  ;;  %541 = vmatpush.bf16.msra.mxu2 %v4684_v37  ;;  %v6629_v53 = vld [vmem:[#allocation5 + $0x64] sm:$0xf]  ;;  %v4649_v54 = vld [vmem:[#allocation5 + $0x70] sm:$0xf0]  ;;  %v4743_v56 = vld [vmem:[#allocation5 + $0x120] sm:$0xf]  ;;  %v4764_v57 = vor.u32 %v6657_v48, %v4761_v50  ;;  %v4648_v58 = vor.u32 %v6631_v52, %v4647_v51 }
  0x33   :  { %v6655_v59 = vld [vmem:[#allocation5 + $0x12c] sm:$0xf0]  ;;  %v6653_v60 = vld [vmem:[#allocation5 + $0x124] sm:$0xf]  ;;  %v4745_v61 = vld [vmem:[#allocation5 + $0x130] sm:$0xf0]  ;;  %v4652_v62 = vor.u32 %v6629_v53, %v4649_v54 }
  0x34   :  { %v4631_v63 = vld [vmem:[#allocation5 + $0x40] sm:$0xf]  ;;  %v6627_v0 = vld [vmem:[#allocation5 + $0x4c] sm:$0xf0]  ;;  %v6625_v1 = vld [vmem:[#allocation5 + $0x44] sm:$0xf]  ;;  %v4744_v6 = vor.u32 %v6655_v59, %v4743_v56  ;;  %v4748_v7 = vor.u32 %v6653_v60, %v4745_v61 }
  0x35   :  { %529 = vmatpush.bf16.msra.mxu1 %v4776_v43  ;;  %514 = vmatpush.bf16.msra.mxu0 %v4664_v45  ;;  %v4633_v3 = vld [vmem:[#allocation5 + $0x50] sm:$0xf0]  ;;  %v4815_v4 = vld [vmem:[#allocation5 + $0x1a8] sm:$0xf]  ;;  %v6672_v5 = vld [vmem:[#allocation5 + $0x1b4] sm:$0xf0]  ;;  %v4632_v8 = vor.u32 %v6627_v0, %v4631_v63 }
  0x36   :  { %557 = vmatpush.bf16.msra.mxu3 %v4780_v44  ;;  %542 = vmatpush.bf16.msra.mxu2 %v4668_v49  ;;  %v4727_v9 = vld [vmem:[#allocation5 + $0x100] sm:$0xf]  ;;  %v6651_v10 = vld [vmem:[#allocation5 + $0x10c] sm:$0xf0]  ;;  %v6649_v11 = vld [vmem:[#allocation5 + $0x104] sm:$0xf]  ;;  %v4636_v12 = vor.u32 %v6625_v1, %v4633_v3  ;;  %v4816_v16 = vor.u32 %v6672_v5, %v4815_v4 }
  0x37   :  { %v4729_v13 = vld [vmem:[#allocation5 + $0x110] sm:$0xf0]  ;;  %v4719_v14 = vld [vmem:[#allocation5 + $0xe8] sm:$0xf]  ;;  %v6648_v15 = vld [vmem:[#allocation5 + $0xf4] sm:$0xf0]  ;;  %v4728_v20 = vor.u32 %v6651_v10, %v4727_v9 }
  0x38   :  { %v4615_v17 = vld [vmem:[#allocation5 + $0x20] sm:$0xf]  ;;  %v6623_v18 = vld [vmem:[#allocation5 + $0x2c] sm:$0xf0]  ;;  %v6621_v19 = vld [vmem:[#allocation5 + $0x24] sm:$0xf]  ;;  %v4732_v24 = vor.u32 %v6649_v11, %v4729_v13  ;;  %v4720_v25 = vor.u32 %v6648_v15, %v4719_v14  ;;  %v506_v29 = vand.u32 %v4816_v16, %v7460_v2 }
  0x39   :  { %530 = vmatpush.bf16.msra.mxu1 %v4760_v55  ;;  %515 = vmatpush.bf16.msra.mxu0 %v4648_v58  ;;  %v4617_v21 = vld [vmem:[#allocation5 + $0x30] sm:$0xf0]  ;;  %v4703_v22 = vld [vmem:[#allocation5 + $0xc8] sm:$0xf]  ;;  %v6670_v23 = vld [vmem:[#allocation5 + $0x1ac] sm:$0xf]  ;;  %v4616_v30 = vor.u32 %v6623_v18, %v4615_v17 }
  0x3a   :  { %558 = vmatpush.bf16.msra.mxu3 %v4764_v57  ;;  %543 = vmatpush.bf16.msra.mxu2 %v4652_v62  ;;  %v4817_v26 = vld [vmem:[#allocation5 + $0x1b8] sm:$0xf0]  ;;  %v154_v27 = vld [vmem:[#allocation2 + $0x8] sm:$0xff]  ;;  %v6644_v31 = vld [vmem:[#allocation5 + $0xd4] sm:$0xf0]  ;;  %v4620_v34 = vor.u32 %v6621_v19, %v4617_v21  ;;  %s7385_s10 = smov 8  }
  0x3b   :  { %v156_v28 = vld [vmem:[#allocation2 + $0x18] sm:$0xff]  ;;  %v4799_v32 = vld [vmem:[#allocation5 + $0x188] sm:$0xf]  ;;  %v4599_v35 = vld [vmem:[#allocation5] sm:$0xf]  ;;  %v4820_v41 = vor.u32 %v6670_v23, %v4817_v26  ;;  %v4704_v43 = vor.u32 %v6644_v31, %v4703_v22 }
  0x3c   :  { %v6668_v33 = vld [vmem:[#allocation5 + $0x194] sm:$0xf0]  ;;  %v6619_v36 = vld [vmem:[#allocation5 + $0xc] sm:$0xf0]  ;;  %v6617_v37 = vld [vmem:[#allocation5 + $0x4] sm:$0xf]  ;;  %v7465_v42 = vpack.c.bf16 %v156_v28, %v154_v27 }
  0x3d   :  { %531 = vmatpush.bf16.msra.mxu1 %v4744_v6  ;;  %516 = vmatpush.bf16.msra.mxu0 %v4632_v8  ;;  %v4601_v38 = vld [vmem:[#allocation5 + $0x10] sm:$0xf0]  ;;  %v6646_v39 = vld [vmem:[#allocation5 + $0xec] sm:$0xf]  ;;  %v4721_v40 = vld [vmem:[#allocation5 + $0xf8] sm:$0xf0]  ;;  %v4800_v44 = vor.u32 %v6668_v33, %v4799_v32  ;;  %v4600_v45 = vor.u32 %v6619_v36, %v4599_v35  ;;  %v509_v54 = vand.u32 %v4820_v41, %v7460_v2 }
  0x3e   :  { %559 = vmatpush.bf16.msra.mxu3 %v4748_v7  ;;  %544 = vmatpush.bf16.msra.mxu2 %v4636_v12  ;;  %v153_v46 = vld [vmem:[#allocation2] sm:$0xff]  ;;  %v4687_v47 = vld [vmem:[#allocation5 + $0xa8] sm:$0xf]  ;;  %v6640_v48 = vld [vmem:[#allocation5 + $0xb4] sm:$0xf0]  ;;  %v4604_v49 = vor.u32 %v6617_v37, %v4601_v38  ;;  %v4724_v50 = vor.u32 %v6646_v39, %v4721_v40 }
  0x3f   :  { %v155_v51 = vld [vmem:[#allocation2 + $0x10] sm:$0xff]  ;;  %v4783_v52 = vld [vmem:[#allocation5 + $0x168] sm:$0xf]  ;;  %v6664_v53 = vld [vmem:[#allocation5 + $0x174] sm:$0xf0]  ;;  %v4688_v57 = vor.u32 %v6640_v48, %v4687_v47 }
  0x40   :  { %v6642_v55 = vld [vmem:[#allocation5 + $0xcc] sm:$0xf]  ;;  %v4705_v56 = vld [vmem:[#allocation5 + $0xd8] sm:$0xf0]  ;;  %v7472_v60 = vpack.c.bf16 %v155_v51, %v153_v46  ;;  %v4784_v61 = vor.u32 %v6664_v53, %v4783_v52  ;;  %v4671_v62 = vld [vmem:[#allocation5 + $0x88] sm:$0xf] }
  0x41   :  { %532 = vmatpush.bf16.msra.mxu1 %v4728_v20  ;;  %517 = vmatpush.bf16.msra.mxu0 %v4616_v30  ;;  %v6666_v58 = vld [vmem:[#allocation5 + $0x18c] sm:$0xf]  ;;  %v4801_v59 = vld [vmem:[#allocation5 + $0x198] sm:$0xf0]  ;;  %v6636_v63 = vld [vmem:[#allocation5 + $0x94] sm:$0xf0]  ;;  %v4708_v0 = vor.u32 %v6642_v55, %v4705_v56 }
  0x42   :  { %560 = vmatpush.bf16.msra.mxu3 %v4732_v24  ;;  %545 = vmatpush.bf16.msra.mxu2 %v4620_v34  ;;  %v4767_v2 = vld [vmem:[#allocation5 + $0x148] sm:$0xf]  ;;  %v6660_v1 = vld [vmem:[#allocation5 + $0x154] sm:$0xf0]  ;;  %v4804_v3 = vor.u32 %v6666_v58, %v4801_v59  ;;  %v6638_v4 = vld [vmem:[#allocation5 + $0xac] sm:$0xf]  ;;  %v4672_v6 = vor.u32 %v6636_v63, %v4671_v62 }
  0x43   :  { %v4689_v5 = vld [vmem:[#allocation5 + $0xb8] sm:$0xf0]  ;;  %v6662_v7 = vld [vmem:[#allocation5 + $0x16c] sm:$0xf]  ;;  %v4768_v9 = vor.u32 %v6660_v1, %v4767_v2  ;;  %v4655_v10 = vld [vmem:[#allocation5 + $0x68] sm:$0xf] }
  0x44   :  { %4821 = vmatmul.msk.bf16.vlgmr.msra.gmra.mxu1 %vm491_vm2, %v7465_v42  ;;  %v4785_v8 = vld [vmem:[#allocation5 + $0x178] sm:$0xf0]  ;;  %v6632_v11 = vld [vmem:[#allocation5 + $0x74] sm:$0xf0]  ;;  %v4692_v12 = vor.u32 %v6638_v4, %v4689_v5  ;;  %v4751_v13 = vld [vmem:[#allocation5 + $0x128] sm:$0xf] }
  0x45   :  { %567 = vmatpush.bf16.msrb.mxu1 %v4720_v25  ;;  %4822 = vmatmul.msk.bf16.vlgmr.msra.gmra.mxu3 %vm491_vm2, %v7465_v42  ;;  %v6656_v14 = vld [vmem:[#allocation5 + $0x134] sm:$0xf0]  ;;  %v4788_v15 = vor.u32 %v6662_v7, %v4785_v8  ;;  %v6634_v16 = vld [vmem:[#allocation5 + $0x8c] sm:$0xf]  ;;  %v4673_v17 = vld [vmem:[#allocation5 + $0x98] sm:$0xf0]  ;;  %v4656_v18 = vor.u32 %v6632_v11, %v4655_v10 }
  0x46   :  { %583 = vmatpush.bf16.msrb.mxu3 %v506_v29  ;;  %518 = vmatpush.bf16.msra.mxu0 %v4600_v45  ;;  %v6658_v19 = vld [vmem:[#allocation5 + $0x14c] sm:$0xf]  ;;  %v4769_v20 = vld [vmem:[#allocation5 + $0x158] sm:$0xf0]  ;;  %v4752_v21 = vor.u32 %v6656_v14, %v4751_v13  ;;  %v4639_v22 = vld [vmem:[#allocation5 + $0x48] sm:$0xf]  ;;  %v4676_v24 = vor.u32 %v6634_v16, %v4673_v17 }
  0x47   :  { %546 = vmatpush.bf16.msra.mxu2 %v4604_v49  ;;  %v6628_v23 = vld [vmem:[#allocation5 + $0x54] sm:$0xf0]  ;;  %v4735_v25 = vld [vmem:[#allocation5 + $0x108] sm:$0xf]  ;;  %v6630_v27 = vld [vmem:[#allocation5 + $0x6c] sm:$0xf]  ;;  %v4772_v28 = vor.u32 %v6658_v19, %v4769_v20 }
  0x48   :  { %v6652_v26 = vld [vmem:[#allocation5 + $0x114] sm:$0xf0]  ;;  %v4657_v29 = vld [vmem:[#allocation5 + $0x78] sm:$0xf0]  ;;  %v4939_v30 = vld [vmem:[#allocation8 + $0xe0] sm:$0xf]  ;;  %v4640_v32 = vor.u32 %v6628_v23, %v4639_v22 }
  0x49   :  { %568 = vmatpush.bf16.msrb.mxu1 %v4704_v43  ;;  %519 = vmatmul.bf16.vlgmr.msra.gmra.mxu0 %v7472_v60  ;;  %v6703_v31 = vld [vmem:[#allocation8 + $0xec] sm:$0xf0]  ;;  %v6654_v33 = vld [vmem:[#allocation5 + $0x12c] sm:$0xf]  ;;  %v4753_v34 = vld [vmem:[#allocation5 + $0x138] sm:$0xf0]  ;;  %v4736_v35 = vor.u32 %v6652_v26, %v4735_v25  ;;  %v4660_v38 = vor.u32 %v6630_v27, %v4657_v29 }
  0x4a   :  { %584 = vmatpush.bf16.msrb.mxu3 %v4800_v44  ;;  %595 = vmatpush.bf16.msrb.mxu0 %v4724_v50  ;;  %v4623_v36 = vld [vmem:[#allocation5 + $0x28] sm:$0xf]  ;;  %v6624_v37 = vld [vmem:[#allocation5 + $0x34] sm:$0xf0]  ;;  %v6626_v39 = vld [vmem:[#allocation5 + $0x4c] sm:$0xf]  ;;  %v4940_v40 = vor.u32 %v6703_v31, %v4939_v30  ;;  %v4756_v41 = vor.u32 %v6654_v33, %v4753_v34 }
  0x4b   :  { %611 = vmatpush.bf16.msrb.mxu2 %v509_v54  ;;  %v4641_v43 = vld [vmem:[#allocation5 + $0x58] sm:$0xf0]  ;;  %v4923_v44 = vld [vmem:[#allocation8 + $0xc0] sm:$0xf]  ;;  %v6699_v45 = vld [vmem:[#allocation8 + $0xcc] sm:$0xf0]  ;;  %v4624_v46 = vor.u32 %v6624_v37, %v4623_v36 }
  0x4c   :  { %547 = vmatmul.bf16.vlgmr.msra.gmra.mxu2 %v7472_v60  ;;  %v6650_v47 = vld [vmem:[#allocation5 + $0x10c] sm:$0xf]  ;;  %v4737_v48 = vld [vmem:[#allocation5 + $0x118] sm:$0xf0]  ;;  %v4607_v49 = vld [vmem:[#allocation5 + $0x8] sm:$0xf]  ;;  %v4644_v53 = vor.u32 %v6626_v39, %v4641_v43  ;;  %v4924_v56 = vor.u32 %v6699_v45, %v4923_v44 }
  0x4d   :  { %569 = vmatpush.bf16.msrb.mxu1 %v4688_v57  ;;  %v6620_v50 = vld [vmem:[#allocation5 + $0x14] sm:$0xf0]  ;;  %v5195_v51 = vld [vmem:[#allocation8 + $0x2e0] sm:$0xf]  ;;  %v6767_v52 = vld [vmem:[#allocation8 + $0x2ec] sm:$0xf0]  ;;  %v4740_v57 = vor.u32 %v6650_v47, %v4737_v48 }
  0x4e   :  { %585 = vmatpush.bf16.msrb.mxu3 %v4784_v61  ;;  %596 = vmatpush.bf16.msrb.mxu0 %v4708_v0  ;;  %v5067_v54 = vld [vmem:[#allocation8 + $0x1e0] sm:$0xf]  ;;  %v6735_v55 = vld [vmem:[#allocation8 + $0x1ec] sm:$0xf0]  ;;  %v6622_v58 = vld [vmem:[#allocation5 + $0x2c] sm:$0xf]  ;;  %v4608_v61 = vor.u32 %v6620_v50, %v4607_v49  ;;  %v5196_v0 = vor.u32 %v6767_v52, %v5195_v51 }
  0x4f   :  { %612 = vmatpush.bf16.msrb.mxu2 %v4804_v3  ;;  %v4625_v59 = vld [vmem:[#allocation5 + $0x38] sm:$0xf0]  ;;  %v4907_v62 = vld [vmem:[#allocation8 + $0xa0] sm:$0xf]  ;;  %v6695_v63 = vld [vmem:[#allocation8 + $0xac] sm:$0xf0]  ;;  %v5068_v2 = vor.u32 %v6735_v55, %v5067_v54 }
  0x50   :  { %v5179_v1 = vld [vmem:[#allocation8 + $0x2c0] sm:$0xf]  ;;  %v6763_v3 = vld [vmem:[#allocation8 + $0x2cc] sm:$0xf0]  ;;  %v4628_v4 = vor.u32 %v6622_v58, %v4625_v59  ;;  %v6618_v7 = vld [vmem:[#allocation5 + $0xc] sm:$0xf] }
  0x51   :  { %570 = vmatpush.bf16.msrb.mxu1 %v4672_v6  ;;  %v5051_v5 = vld [vmem:[#allocation8 + $0x1c0] sm:$0xf]  ;;  %v6731_v6 = vld [vmem:[#allocation8 + $0x1cc] sm:$0xf0]  ;;  %v4609_v8 = vld [vmem:[#allocation5 + $0x18] sm:$0xf0]  ;;  %v5180_v14 = vor.u32 %v6763_v3, %v5179_v1 }
  0x52   :  { %586 = vmatpush.bf16.msrb.mxu3 %v4768_v9  ;;  %597 = vmatpush.bf16.msrb.mxu0 %v4692_v12  ;;  %v4908_v9 = vor.u32 %v6695_v63, %v4907_v62  ;;  %v4891_v10 = vld [vmem:[#allocation8 + $0x80] sm:$0xf]  ;;  %v6691_v11 = vld [vmem:[#allocation8 + $0x8c] sm:$0xf0]  ;;  %v4612_v16 = vor.u32 %v6618_v7, %v4609_v8  ;;  %v4941_v45 = vld [vmem:[#allocation8 + $0xf0] sm:$0xf0] }
  0x53   :  { %613 = vmatpush.bf16.msrb.mxu2 %v4788_v15  ;;  %v5323_v12 = vld [vmem:[#allocation8 + $0x3e0] sm:$0xf]  ;;  %v6799_v13 = vld [vmem:[#allocation8 + $0x3ec] sm:$0xf0]  ;;  %v5052_v15 = vor.u32 %v6731_v6, %v5051_v5  ;;  %v4892_v19 = vor.u32 %v6691_v11, %v4891_v10  ;;  %v5069_v54 = vld [vmem:[#allocation8 + $0x1f0] sm:$0xf0] }
  0x54   :  { %v5035_v17 = vld [vmem:[#allocation8 + $0x1a0] sm:$0xf]  ;;  %v6687_v22 = vld [vmem:[#allocation8 + $0x6c] sm:$0xf0]  ;;  %v4925_v1 = vld [vmem:[#allocation8 + $0xd0] sm:$0xf0] }
  0x55   :  { %571 = vmatpush.bf16.msrb.mxu1 %v4656_v18  ;;  %v6727_v18 = vld [vmem:[#allocation8 + $0x1ac] sm:$0xf0]  ;;  %v4875_v20 = vld [vmem:[#allocation8 + $0x60] sm:$0xf]  ;;  %v6729_v3 = vld [vmem:[#allocation8 + $0x1c4] sm:$0xf] }
  0x56   :  { %587 = vmatpush.bf16.msrb.mxu3 %v4752_v21  ;;  %598 = vmatpush.bf16.msrb.mxu0 %v4676_v24  ;;  %v5324_v21 = vor.u32 %v6799_v13, %v5323_v12  ;;  %v5307_v23 = vld [vmem:[#allocation8 + $0x3c0] sm:$0xf]  ;;  %v6795_v24 = vld [vmem:[#allocation8 + $0x3cc] sm:$0xf0]  ;;  %v5036_v25 = vor.u32 %v6727_v18, %v5035_v17  ;;  %v5053_v5 = vld [vmem:[#allocation8 + $0x1d0] sm:$0xf0] }
  0x57   :  { %614 = vmatpush.bf16.msrb.mxu2 %v4772_v28  ;;  %v5019_v26 = vld [vmem:[#allocation8 + $0x180] sm:$0xf]  ;;  %v6723_v27 = vld [vmem:[#allocation8 + $0x18c] sm:$0xf0]  ;;  %v5308_v28 = vor.u32 %v6795_v24, %v5307_v23  ;;  %v5056_v6 = vor.u32 %v6729_v3, %v5053_v5  ;;  %v6693_v13 = vld [vmem:[#allocation8 + $0xa4] sm:$0xf] }
  0x58   :  { %v4859_v29 = vld [vmem:[#allocation8 + $0x40] sm:$0xf]  ;;  %v6683_v30 = vld [vmem:[#allocation8 + $0x4c] sm:$0xf0]  ;;  %v5020_v31 = vor.u32 %v6723_v27, %v5019_v26  ;;  %v5037_v17 = vld [vmem:[#allocation8 + $0x1b0] sm:$0xf0] }
  0x59   :  { %572 = vmatpush.bf16.msrb.mxu1 %v4640_v32  ;;  %v5003_v32 = vld [vmem:[#allocation8 + $0x160] sm:$0xf]  ;;  %v6719_v33 = vld [vmem:[#allocation8 + $0x16c] sm:$0xf0]  ;;  %v4860_v34 = vor.u32 %v6683_v30, %v4859_v29  ;;  %v4893_v26 = vld [vmem:[#allocation8 + $0x90] sm:$0xf0] }
  0x5a   :  { %588 = vmatpush.bf16.msrb.mxu3 %v4736_v35  ;;  %599 = vmatpush.bf16.msrb.mxu0 %v4660_v38  ;;  %v4843_v35 = vld [vmem:[#allocation8 + $0x20] sm:$0xf]  ;;  %v6679_v36 = vld [vmem:[#allocation8 + $0x2c] sm:$0xf0]  ;;  %v5004_v37 = vor.u32 %v6719_v33, %v5003_v32  ;;  %v6721_v27 = vld [vmem:[#allocation8 + $0x184] sm:$0xf] }
  0x5b   :  { %615 = vmatpush.bf16.msrb.mxu2 %v4756_v41  ;;  %v4987_v38 = vld [vmem:[#allocation8 + $0x140] sm:$0xf]  ;;  %v6715_v39 = vld [vmem:[#allocation8 + $0x14c] sm:$0xf0]  ;;  %v6709_v5 = vld [vmem:[#allocation8 + $0x124] sm:$0xf] }
  0x5c   :  { %v4827_v41 = vld [vmem:[#allocation8] sm:$0xf]  ;;  %v6675_v43 = vld [vmem:[#allocation8 + $0xc] sm:$0xf0]  ;;  %v4988_v44 = vor.u32 %v6715_v39, %v4987_v38  ;;  %v6717_v38 = vld [vmem:[#allocation8 + $0x164] sm:$0xf] }
  0x5d   :  { %4823 = vmatmul.msk.bf16.vlgmr.msrb.gmra.mxu3 %vm491_vm2, %v7465_v42  ;;  %573 = vmatpush.bf16.msrb.mxu1 %v4624_v46  ;;  %v4971_v46 = vld [vmem:[#allocation8 + $0x120] sm:$0xf]  ;;  %v6711_v47 = vld [vmem:[#allocation8 + $0x12c] sm:$0xf0]  ;;  %v4828_v48 = vor.u32 %v6675_v43, %v4827_v41 }
  0x5e   :  { %1478 = vmatpush.bf16.msra.mxu3 %v4940_v40  ;;  %600 = vmatpush.bf16.msrb.mxu0 %v4644_v53  ;;  %v4844_v40 = vor.u32 %v6679_v36, %v4843_v35  ;;  %v4972_v50 = vor.u32 %v6711_v47, %v4971_v46  ;;  %v4955_v51 = vld [vmem:[#allocation8 + $0x100] sm:$0xf]  ;;  %v6707_v52 = vld [vmem:[#allocation8 + $0x10c] sm:$0xf0]  ;;  %v6733_v53 = vld [vmem:[#allocation8 + $0x1e4] sm:$0xf] }
  0x5f   :  { %616 = vmatpush.bf16.msrb.mxu2 %v4740_v57  ;;  %v4956_v55 = vor.u32 %v6707_v52, %v4955_v51  ;;  %v627_v57 = vld [vmem:[#allocation7] sm:$0xf]  ;;  %v5163_v58 = vld [vmem:[#allocation8 + $0x2a0] sm:$0xf]  ;;  %v6759_v59 = vld [vmem:[#allocation8 + $0x2ac] sm:$0xf0] }
  0x60   :  { %629 = vst [vmem:[#allocation1] ss:$9 sm:$0xff] %v627_v57  ;;  %v5291_v62 = vld [vmem:[#allocation8 + $0x3a0] sm:$0xf]  ;;  %v6791_v63 = vld [vmem:[#allocation8 + $0x3ac] sm:$0xf0] }
  0x61   :  { %574 = vmatpush.bf16.msrb.mxu1 %v4608_v61  ;;  %v5164_v61 = vor.u32 %v6759_v59, %v5163_v58  ;;  %v5147_v7 = vld [vmem:[#allocation8 + $0x280] sm:$0xf]  ;;  %v6755_v8 = vld [vmem:[#allocation8 + $0x28c] sm:$0xf0]  ;;  %v6685_v36 = vld [vmem:[#allocation8 + $0x64] sm:$0xf] }
  0x62   :  { %1479 = vmatpush.bf16.msra.mxu3 %v4924_v56  ;;  %4824 = vmatmul.msk.bf16.vlgmr.msrb.gmra.mxu2 %vm491_vm2, %v7465_v42  ;;  %v4876_v42 = vor.u32 %v6687_v22, %v4875_v20  ;;  %v5072_v56 = vor.u32 %v6733_v53, %v5069_v54  ;;  %v5148_v10 = vor.u32 %v6755_v8, %v5147_v7  ;;  %v6787_v11 = vld [vmem:[#allocation8 + $0x38c] sm:$0xf0]  ;;  %v5115_v30 = vld [vmem:[#allocation8 + $0x240] sm:$0xf]  ;;  %v4989_v52 = vld [vmem:[#allocation8 + $0x150] sm:$0xf0] }
  0x63   :  { %1506 = vmatpush.bf16.msra.mxu2 %v5196_v0  ;;  %601 = vmatpush.bf16.msrb.mxu0 %v4628_v4  ;;  %v5292_v0 = vor.u32 %v6791_v63, %v5291_v62  ;;  %v6751_v20 = vld [vmem:[#allocation8 + $0x26c] sm:$0xf0]  ;;  %v5243_v32 = vld [vmem:[#allocation8 + $0x340] sm:$0xf]  ;;  %v6765_v59 = vld [vmem:[#allocation8 + $0x2e4] sm:$0xf] }
  0x64   :  { %575 = vmatmul.bf16.vlgmr.msrb.gmra.mxu1 %v7472_v60  ;;  %v6783_v22 = vld [vmem:[#allocation8 + $0x36c] sm:$0xf0]  ;;  %v5099_v43 = vld [vmem:[#allocation8 + $0x220] sm:$0xf] }
  0x65   :  { %1492 = vmatpush.bf16.msra.mxu1 %v5068_v2  ;;  %v6697_v2 = vld [vmem:[#allocation8 + $0xc4] sm:$0xf]  ;;  %v6775_v46 = vld [vmem:[#allocation8 + $0x32c] sm:$0xf0]  ;;  %v5083_v54 = vld [vmem:[#allocation8 + $0x200] sm:$0xf] }
  0x66   :  { %1480 = vmatpush.bf16.msra.mxu3 %v4908_v9  ;;  %v4928_v4 = vor.u32 %v6697_v2, %v4925_v1  ;;  %v5275_v9 = vld [vmem:[#allocation8 + $0x380] sm:$0xf]  ;;  %v6771_v58 = vld [vmem:[#allocation8 + $0x30c] sm:$0xf0]  ;;  %v5325_v2 = vld [vmem:[#allocation8 + $0x3f0] sm:$0xf0] }
  0x67   :  { %1507 = vmatpush.bf16.msra.mxu2 %v5180_v14  ;;  %602 = vmatpush.bf16.msrb.mxu0 %v4612_v16  ;;  %v5276_v12 = vor.u32 %v6787_v11, %v5275_v9  ;;  %v4909_v14 = vld [vmem:[#allocation8 + $0xb0] sm:$0xf0]  ;;  %v6677_v1 = vld [vmem:[#allocation8 + $0x24] sm:$0xf] }
  0x68   :  { %v4912_v16 = vor.u32 %v6693_v13, %v4909_v14  ;;  %v6761_v9 = vld [vmem:[#allocation8 + $0x2c4] sm:$0xf] }
  0x69   :  { %1493 = vmatpush.bf16.msra.mxu1 %v5052_v15  ;;  %v6725_v15 = vld [vmem:[#allocation8 + $0x1a4] sm:$0xf] }
  0x6a   :  { %1481 = vmatpush.bf16.msra.mxu3 %v4892_v19  ;;  %603 = vmatmul.bf16.vlgmr.msrb.gmra.mxu0 %v7472_v60  ;;  %v6701_v60 = vld [vmem:[#allocation8 + $0xe4] sm:$0xf]  ;;  %v5040_v18 = vor.u32 %v6725_v15, %v5037_v17  ;;  %v5131_v19 = vld [vmem:[#allocation8 + $0x260] sm:$0xf]  ;;  %v5309_v15 = vld [vmem:[#allocation8 + $0x3d0] sm:$0xf0] }
  0x6b   :  { %1520 = vmatpush.bf16.msra.mxu0 %v5324_v21  ;;  %v4944_v49 = vor.u32 %v6701_v60, %v4941_v45  ;;  %1508 = vmatpush.bf16.msra.mxu2 %v5164_v61  ;;  %v5259_v21 = vld [vmem:[#allocation8 + $0x360] sm:$0xf]  ;;  %v5132_v23 = vor.u32 %v6751_v20, %v5131_v19  ;;  %v5197_v61 = vld [vmem:[#allocation8 + $0x2f0] sm:$0xf0]  ;;  %v6793_v11 = vld [vmem:[#allocation8 + $0x3c4] sm:$0xf] }
  0x6c   :  { %v5260_v24 = vor.u32 %v6783_v22, %v5259_v21  ;;  %v5227_v60 = vld [vmem:[#allocation8 + $0x320] sm:$0xf]  ;;  %v5200_v63 = vor.u32 %v6765_v59, %v5197_v61  ;;  %v6673_v17 = vld [vmem:[#allocation8 + $0x4] sm:$0xf]  ;;  %v4957_v21 = vld [vmem:[#allocation8 + $0x110] sm:$0xf0] }
  0x6d   :  { %1494 = vmatpush.bf16.msra.mxu1 %v5036_v25  ;;  %v6689_v25 = vld [vmem:[#allocation8 + $0x84] sm:$0xf]  ;;  %v5228_v47 = vor.u32 %v6775_v46, %v5227_v60  ;;  %v7484_v60 = vld [vmem:[#allocation1 + $0x1b] sm:$0xff] }
  0x6e   :  { %1482 = vmatpush.bf16.msra.mxu3 %v4876_v42  ;;  %v4896_v42 = vor.u32 %v6689_v25, %v4893_v26  ;;  %v631_v13 = vld [vmem:[#allocation1 + $0x9] sm:$0xff] }
  0x6f   :  { %1521 = vmatpush.bf16.msra.mxu0 %v5308_v28  ;;  %1509 = vmatpush.bf16.msra.mxu2 %v5148_v10  ;;  %v5021_v28 = vld [vmem:[#allocation8 + $0x190] sm:$0xf0]  ;;  %v6705_v19 = vld [vmem:[#allocation8 + $0x104] sm:$0xf]  ;;  %v637_v25 = vpack.i.b16 %v631_v13, %v631_v13 }
  0x70   :  { %v5024_v29 = vor.u32 %v6721_v27, %v5021_v28  ;;  %v5181_v10 = vld [vmem:[#allocation8 + $0x2d0] sm:$0xf0]  ;;  %v4960_v26 = vor.u32 %v6705_v19, %v4957_v21  ;;  %v6757_v27 = vld [vmem:[#allocation8 + $0x2a4] sm:$0xf] }
  0x71   :  { %1495 = vmatpush.bf16.msra.mxu1 %v5020_v31  ;;  %v6747_v31 = vld [vmem:[#allocation8 + $0x24c] sm:$0xf0]  ;;  %v5184_v14 = vor.u32 %v6761_v9, %v5181_v10  ;;  %v6789_v28 = vld [vmem:[#allocation8 + $0x3a4] sm:$0xf] }
  0x72   :  { %1483 = vmatpush.bf16.msra.mxu3 %v4860_v34  ;;  %v5116_v33 = vor.u32 %v6747_v31, %v5115_v30  ;;  %v6779_v34 = vld [vmem:[#allocation8 + $0x34c] sm:$0xf0]  ;;  %v5293_v31 = vld [vmem:[#allocation8 + $0x3b0] sm:$0xf0]  ;;  %v6773_v13 = vld [vmem:[#allocation8 + $0x324] sm:$0xf] }
  0x73   :  { %1522 = vmatpush.bf16.msra.mxu0 %v5292_v0  ;;  %1510 = vmatpush.bf16.msra.mxu2 %v5132_v23  ;;  %v5244_v35 = vor.u32 %v6779_v34, %v5243_v32  ;;  %v6797_v0 = vld [vmem:[#allocation8 + $0x3e4] sm:$0xf]  ;;  %v5296_v32 = vor.u32 %v6789_v28, %v5293_v31  ;;  %v639_v34 = vperm.slane %v637_v25, 0  ;;  %v5213_v28 = vld [vmem:[#allocation8 + $0x310] sm:$0xf0] }
  0x74   :  { %v5328_v3 = vor.u32 %v6797_v0, %v5325_v2  ;;  %v6745_v2 = vld [vmem:[#allocation8 + $0x244] sm:$0xf] }
  0x75   :  { %1496 = vmatpush.bf16.msra.mxu1 %v5004_v37  ;;  %v4877_v37 = vld [vmem:[#allocation8 + $0x70] sm:$0xf0]  ;;  %v6769_v25 = vld [vmem:[#allocation8 + $0x304] sm:$0xf] }
  0x76   :  { %1484 = vmatpush.bf16.msra.mxu3 %v4844_v40  ;;  %v4880_v39 = vor.u32 %v6685_v36, %v4877_v37  ;;  %v5005_v40 = vld [vmem:[#allocation8 + $0x170] sm:$0xf0]  ;;  %v6753_v36 = vld [vmem:[#allocation8 + $0x284] sm:$0xf] }
  0x77   :  { %1523 = vmatpush.bf16.msra.mxu0 %v5276_v12  ;;  %1511 = vmatpush.bf16.msra.mxu2 %v5116_v33  ;;  %v5008_v41 = vor.u32 %v6717_v38, %v5005_v40  ;;  %v630_v12 = vld [vmem:[#allocation1] sm:$0xff]  ;;  %v6785_v38 = vld [vmem:[#allocation8 + $0x384] sm:$0xf] }
  0x78   :  { %v5149_v37 = vld [vmem:[#allocation8 + $0x290] sm:$0xf0] }
  0x79   :  { %1497 = vmatpush.bf16.msra.mxu1 %v4988_v44  ;;  %v6743_v44 = vld [vmem:[#allocation8 + $0x22c] sm:$0xf0]  ;;  %v5152_v40 = vor.u32 %v6753_v36, %v5149_v37 }
  0x7a   :  { %1485 = vmatpush.bf16.msra.mxu3 %v4828_v48  ;;  %v5100_v45 = vor.u32 %v6743_v44, %v5099_v43  ;;  %v6681_v48 = vld [vmem:[#allocation8 + $0x44] sm:$0xf] }
  0x7b   :  { %1524 = vmatpush.bf16.msra.mxu0 %v5260_v24  ;;  %v634_v24 = vpack.i.b16 %v630_v12, %v630_v12  ;;  %v7482_v44 = vld [vmem:[#allocation1 + $0x12] sm:$0xff]  ;;  %v5101_v12 = vld [vmem:[#allocation8 + $0x230] sm:$0xf0] }
  0x7c   :  { %1512 = vmatpush.bf16.msra.mxu2 %v5100_v45  ;;  %v1706_v45 = vld [vmem:[#allocation10] sm:$0xf] }
  0x7d   :  { %1498 = vmatpush.bf16.msra.mxu1 %v4972_v50  ;;  %v6713_v50 = vld [vmem:[#allocation8 + $0x144] sm:$0xf]  ;;  %v636_v33 = vperm.slane %v634_v24, 0  ;;  %1708 = vst [vmem:[#allocation1] ss:$9 sm:$0xff] %v1706_v45 }
  0x7e   :  { %1534 = vmatpush.bf16.msrb.mxu3 %v4944_v49  ;;  %v4861_v49 = vld [vmem:[#allocation8 + $0x50] sm:$0xf0]  ;;  %v4992_v53 = vor.u32 %v6713_v50, %v4989_v52  ;;  %v6749_v50 = vld [vmem:[#allocation8 + $0x264] sm:$0xf]  ;;  %v5075_v45 = vld [vmem:[#allocation8 + $0x1e8] sm:$0xf] }
  0x7f   :  { %1525 = vmatpush.bf16.msra.mxu0 %v5244_v35  ;;  %v4864_v51 = vor.u32 %v6681_v48, %v4861_v49  ;;  %v654_v48 = vunpack.c.l.bf16 %v636_v33  ;;  %v655_v49 = vunpack.c.l.bf16 %v639_v34  ;;  %v6781_v52 = vld [vmem:[#allocation8 + $0x364] sm:$0xf]  ;;  %v5085_v24 = vld [vmem:[#allocation8 + $0x210] sm:$0xf0] }
  0x81   :  { %1499 = vmatpush.bf16.msra.mxu1 %v4956_v55  ;;  %v6739_v55 = vld [vmem:[#allocation8 + $0x20c] sm:$0xf0] }
  0x82   :  { %1535 = vmatpush.bf16.msrb.mxu3 %v4928_v4  ;;  %v5084_v57 = vor.u32 %v6739_v55, %v5083_v54  ;;  %v4845_v4 = vld [vmem:[#allocation8 + $0x30] sm:$0xf0] }
  0x83   :  { %1526 = vmatpush.bf16.msra.mxu0 %v5228_v47  ;;  %v4848_v7 = vor.u32 %v6677_v1, %v4845_v4  ;;  %v5117_v1 = vld [vmem:[#allocation8 + $0x250] sm:$0xf0] }
  0x84   :  { %1513 = vmatpush.bf16.msra.mxu2 %v5084_v57 }
  0x85   :  { %1548 = vmatpush.bf16.msrb.mxu1 %v5072_v56  ;;  %v5211_v56 = vld [vmem:[#allocation8 + $0x300] sm:$0xf] }
  0x86   :  { %1536 = vmatpush.bf16.msrb.mxu3 %v4912_v16  ;;  %v5212_v62 = vor.u32 %v6771_v58, %v5211_v56  ;;  %v5312_v16 = vor.u32 %v6793_v11, %v5309_v15  ;;  %v5261_v56 = vld [vmem:[#allocation8 + $0x370] sm:$0xf0]  ;;  %v6741_v11 = vld [vmem:[#allocation8 + $0x224] sm:$0xf] }
  0x87   :  { %v5264_v59 = vor.u32 %v6781_v52, %v5261_v56  ;;  %v5229_v15 = vld [vmem:[#allocation8 + $0x330] sm:$0xf0]  ;;  %v4931_v56 = vld [vmem:[#allocation8 + $0xc8] sm:$0xf] }
  0x88   :  { %1527 = vmatpush.bf16.msra.mxu0 %v5212_v62  ;;  %1562 = vmatpush.bf16.msrb.mxu2 %v5200_v63  ;;  %v5232_v19 = vor.u32 %v6773_v13, %v5229_v15 }
  0x89   :  { %1549 = vmatpush.bf16.msrb.mxu1 %v5056_v6  ;;  %v4973_v6 = vld [vmem:[#allocation8 + $0x130] sm:$0xf0] }
  0x8a   :  { %1537 = vmatpush.bf16.msrb.mxu3 %v4896_v42  ;;  %v4976_v8 = vor.u32 %v6709_v5, %v4973_v6  ;;  %v5165_v42 = vld [vmem:[#allocation8 + $0x2b0] sm:$0xf0]  ;;  %v5120_v5 = vor.u32 %v6745_v2, %v5117_v1 }
  0x8b   :  { %v5168_v30 = vor.u32 %v6757_v27, %v5165_v42  ;;  %v5245_v6 = vld [vmem:[#allocation8 + $0x350] sm:$0xf0]  ;;  %v643_v27 = vpack.i.b16 %v7484_v60, %v7484_v60 }
  0x8c   :  { %1576 = vmatpush.bf16.msrb.mxu0 %v5328_v3  ;;  %1563 = vmatpush.bf16.msrb.mxu2 %v5184_v14  ;;  %v6777_v3 = vld [vmem:[#allocation8 + $0x344] sm:$0xf]  ;;  %v5104_v14 = vor.u32 %v6741_v11, %v5101_v12  ;;  %v5043_v11 = vld [vmem:[#allocation8 + $0x1a8] sm:$0xf]  ;;  %v6728_v12 = vld [vmem:[#allocation8 + $0x1b4] sm:$0xf0] }
  0x8d   :  { %1550 = vmatpush.bf16.msrb.mxu1 %v5040_v18  ;;  %v4829_v18 = vld [vmem:[#allocation8 + $0x10] sm:$0xf0] }
  0x8e   :  { %1538 = vmatpush.bf16.msrb.mxu3 %v4880_v39  ;;  %v4832_v20 = vor.u32 %v6673_v17, %v4829_v18 }
  0x90   :  { %1577 = vmatpush.bf16.msrb.mxu0 %v5312_v16  ;;  %1564 = vmatpush.bf16.msrb.mxu2 %v5168_v30  ;;  %v5216_v30 = vor.u32 %v6769_v25, %v5213_v28  ;;  %v4883_v28 = vld [vmem:[#allocation8 + $0x68] sm:$0xf] }
  0x91   :  { %1551 = vmatpush.bf16.msrb.mxu1 %v5024_v29 }
  0x92   :  { %1539 = vmatpush.bf16.msrb.mxu3 %v4864_v51  ;;  %v5133_v51 = vld [vmem:[#allocation8 + $0x270] sm:$0xf0] }
  0x93   :  { %v5136_v55 = vor.u32 %v6749_v50, %v5133_v51 }
  0x94   :  { %1578 = vmatpush.bf16.msrb.mxu0 %v5296_v32  ;;  %1565 = vmatpush.bf16.msrb.mxu2 %v5152_v40  ;;  %v6704_v40 = vld [vmem:[#allocation8 + $0xf4] sm:$0xf0] }
  0x95   :  { %1552 = vmatpush.bf16.msrb.mxu1 %v5008_v41  ;;  %v5277_v41 = vld [vmem:[#allocation8 + $0x390] sm:$0xf0] }
  0x96   :  { %1540 = vmatpush.bf16.msrb.mxu3 %v4848_v7  ;;  %v5280_v46 = vor.u32 %v6785_v38, %v5277_v41  ;;  %v7492_v38 = vperm.slane %v643_v27, 0 }
  0x98   :  { %1579 = vmatpush.bf16.msrb.mxu0 %v5280_v46  ;;  %1566 = vmatpush.bf16.msrb.mxu2 %v5136_v55  ;;  %v6736_v46 = vld [vmem:[#allocation8 + $0x1f4] sm:$0xf0] }
  0x99   :  { %1553 = vmatpush.bf16.msrb.mxu1 %v4992_v53  ;;  %v5076_v55 = vor.u32 %v6736_v46, %v5075_v45 }
  0x9a   :  { %1541 = vmatpush.bf16.msrb.mxu3 %v4832_v20 }
  0x9c   :  { %1580 = vmatpush.bf16.msrb.mxu0 %v5264_v59  ;;  %1567 = vmatpush.bf16.msrb.mxu2 %v5120_v5 }
  0x9d   :  { %1554 = vmatpush.bf16.msrb.mxu1 %v4976_v8  ;;  %v5248_v8 = vor.u32 %v6777_v3, %v5245_v6  ;;  %v4915_v6 = vld [vmem:[#allocation8 + $0xa8] sm:$0xf] }
  0xa0   :  { %1581 = vmatpush.bf16.msrb.mxu0 %v5248_v8  ;;  %1568 = vmatpush.bf16.msrb.mxu2 %v5104_v14 }
  0xa1   :  { %1555 = vmatpush.bf16.msrb.mxu1 %v4960_v26  ;;  %v640_v26 = vpack.i.b16 %v7482_v44, %v7482_v44 }
  0xa3   :  { %v7490_v37 = vperm.slane %v640_v26, 0 }
  0xa4   :  { %1582 = vmatpush.bf16.msrb.mxu0 %v5232_v19  ;;  %v4899_v19 = vld [vmem:[#allocation8 + $0x88] sm:$0xf] }
  0xa8   :  { %1583 = vmatpush.bf16.msrb.mxu0 %v5216_v30 }
  0xc1   :  { %v534_v23 = vpop.f32.mrf.mxu1 }
  0xc6   :  { %v520_v22 = vpop.f32.mrf.mxu0 }
  0xc7   :  { %v535_v35 = vadd.f32 %v534_v23, %v520_v22  ;;  %v6737_v23 = vld [vmem:[#allocation8 + $0x204] sm:$0xf] }
  0xc8   :  { %v562_v29 = vpop.f32.mrf.mxu3  ;;  %v5088_v42 = vor.u32 %v6737_v23, %v5085_v24  ;;  %v5027_v23 = vld [vmem:[#allocation8 + $0x188] sm:$0xf]  ;;  %v6724_v24 = vld [vmem:[#allocation8 + $0x194] sm:$0xf0] }
  0xc9   :  { %v536_v54 = vpop.f32.mrf.mxu1 }
  0xca   :  { %1569 = vmatpush.bf16.msrb.mxu2 %v5088_v42  ;;  %v5028_v42 = vor.u32 %v6724_v24, %v5027_v23  ;;  %v6760_v23 = vld [vmem:[#allocation8 + $0x2b4] sm:$0xf0]  ;;  %v5299_v24 = vld [vmem:[#allocation8 + $0x3a8] sm:$0xf] }
  0xce   :  { %v522_v53 = vpop.f32.mrf.mxu0 }
  0xcf   :  { %v548_v39 = vpop.f32.mrf.mxu2  ;;  %v537_v0 = vadd.f32 %v536_v54, %v522_v53  ;;  %v656_v53 = vunpack.c.l.bf16 %v7490_v37 }
  0xd0   :  { %v563_v43 = vadd.f32 %v562_v29, %v548_v39  ;;  %v564_v61 = vpop.f32.mrf.mxu3  ;;  %v4947_v39 = vld [vmem:[#allocation8 + $0xe8] sm:$0xf] }
  0xd1   :  { %v4948_v54 = vor.u32 %v6704_v40, %v4947_v39  ;;  %v4867_v39 = vld [vmem:[#allocation8 + $0x48] sm:$0xf]  ;;  %v6684_v40 = vld [vmem:[#allocation8 + $0x54] sm:$0xf0] }
  0xd2   :  { %v623_v47 = vpack.c.bf16 %v563_v43, %v535_v35 }
  0xd4   :  { %v646_v57 = vunpack.c.l.bf16 %v623_v47  ;;  %v647_v58 = vunpack.c.h.bf16 %v623_v47 }
  0xd6   :  { %v658_v62 = vadd.f32 %v654_v48, %v646_v57  ;;  %v659_v63 = vadd.f32 %v655_v49, %v647_v58  ;;  %v657_v58 = vunpack.c.l.bf16 %v7492_v38 }
  0xd7   :  { %v550_v4 = vpop.f32.mrf.mxu2 }
  0xd8   :  { %v565_v7 = vadd.f32 %v564_v61, %v550_v4  ;;  %v666_v9 = vpack.c.bf16 %v659_v63, %v658_v62  ;;  %v6700_v62 = vld [vmem:[#allocation8 + $0xd4] sm:$0xf0]  ;;  %v5059_v63 = vld [vmem:[#allocation8 + $0x1c8] sm:$0xf] }
  0xd9   :  { %v4932_v4 = vor.u32 %v6700_v62, %v4931_v56 }
  0xda   :  { %v625_v10 = vpack.c.bf16 %v565_v7, %v537_v0  ;;  %v670_v18 = vunpack.c.l.bf16 %v666_v9  ;;  %v671_v20 = vunpack.c.h.bf16 %v666_v9  ;;  %v6732_v0 = vld [vmem:[#allocation8 + $0x1d4] sm:$0xf0] }
  0xdb   :  { %v5060_v5 = vor.u32 %v6732_v0, %v5059_v63  ;;  %v6680_v63 = vld [vmem:[#allocation8 + $0x34] sm:$0xf0]  ;;  %v4979_v0 = vld [vmem:[#allocation8 + $0x128] sm:$0xf] }
  0xdc   :  { %v650_v16 = vunpack.c.l.bf16 %v625_v10  ;;  %v651_v17 = vunpack.c.h.bf16 %v625_v10  ;;  %v678_v32 = vmul.f32 0.010009766, %v670_v18  ;;  %v679_v36 = vmul.f32 0.010009766, %v671_v20  ;;  %v6696_v10 = vld [vmem:[#allocation8 + $0xb4] sm:$0xf0] }
  0xde   :  { %v662_v21 = vadd.f32 %v654_v48, %v650_v16  ;;  %v663_v22 = vadd.f32 %v655_v49, %v651_v17  ;;  %v698_v48 = vmax.f32 %v670_v18, %v678_v32  ;;  %v699_v51 = vmax.f32 %v671_v20, %v679_v36 }
  0xdf   :  { %v4916_v17 = vor.u32 %v6696_v10, %v4915_v6  ;;  %v5044_v18 = vor.u32 %v6728_v12, %v5043_v11  ;;  %v4835_v12 = vld [vmem:[#allocation8 + $0x8] sm:$0xf] }
  0xe0   :  { %v668_v29 = vpack.c.bf16 %v663_v22, %v662_v21  ;;  %v590_v33 = vpop.f32.mrf.mxu3  ;;  %v6692_v22 = vld [vmem:[#allocation8 + $0x94] sm:$0xf0] }
  0xe1   :  { %v576_v31 = vpop.f32.mrf.mxu1  ;;  %v4900_v27 = vor.u32 %v6692_v22, %v4899_v19  ;;  %v5171_v22 = vld [vmem:[#allocation8 + $0x2a8] sm:$0xf] }
  0xe2   :  { %v674_v34 = vunpack.c.l.bf16 %v668_v29  ;;  %v675_v35 = vunpack.c.h.bf16 %v668_v29  ;;  %v591_v41 = vadd.f32 %v590_v33, %v576_v31  ;;  %v6688_v33 = vld [vmem:[#allocation8 + $0x74] sm:$0xf0] }
  0xe3   :  { %v4884_v37 = vor.u32 %v6688_v33, %v4883_v28  ;;  %v6730_v33 = vld [vmem:[#allocation8 + $0x1cc] sm:$0xf] }
  0xe4   :  { %v682_v44 = vmul.f32 0.010009766, %v674_v34  ;;  %v683_v60 = vmul.f32 0.010009766, %v675_v35 }
  0xe5   :  { %v618_v43 = vpop.f32.mrf.mxu2 }
  0xe6   :  { %v702_v50 = vmax.f32 %v674_v34, %v682_v44  ;;  %v703_v52 = vmax.f32 %v675_v35, %v683_v60  ;;  %v5011_v34 = vld [vmem:[#allocation8 + $0x168] sm:$0xf]  ;;  %v6720_v35 = vld [vmem:[#allocation8 + $0x174] sm:$0xf0] }
  0xe7   :  { %v604_v47 = vpop.f32.mrf.mxu0  ;;  %v5012_v38 = vor.u32 %v6720_v35, %v5011_v34  ;;  %v5061_v34 = vld [vmem:[#allocation8 + $0x1d8] sm:$0xf0]  ;;  %v5155_v35 = vld [vmem:[#allocation8 + $0x288] sm:$0xf] }
  0xe8   :  { %v619_v49 = vadd.f32 %v618_v43, %v604_v47  ;;  %v7496_v59 = vpack.c.bf16 %v702_v50, %v698_v48  ;;  %v7498_v61 = vpack.c.bf16 %v703_v52, %v699_v51  ;;  %v592_v7 = vpop.f32.mrf.mxu3  ;;  %v6716_v43 = vld [vmem:[#allocation8 + $0x154] sm:$0xf0]  ;;  %v5203_v47 = vld [vmem:[#allocation8 + $0x2e8] sm:$0xf] }
  0xe9   :  { %v578_v3 = vpop.f32.mrf.mxu1  ;;  %v6768_v48 = vld [vmem:[#allocation8 + $0x2f4] sm:$0xf0]  ;;  %v5331_v51 = vld [vmem:[#allocation8 + $0x3e8] sm:$0xf] }
  0xea   :  { %v624_v57 = vpack.c.bf16 %v619_v49, %v591_v41  ;;  %1486 = vmatmul.bf16.vlgmr.msra.gmra.mxu3 %v7496_v59  ;;  %1500 = vmatmul.bf16.vlgmr.msra.gmra.mxu1 %v7498_v61  ;;  %v593_v15 = vadd.f32 %v592_v7, %v578_v3  ;;  %v4995_v41 = vld [vmem:[#allocation8 + $0x148] sm:$0xf]  ;;  %v6800_v52 = vld [vmem:[#allocation8 + $0x3f4] sm:$0xf0] }
  0xeb   :  { %1590 = vmatpush.bf16.msra.mxu3 %v4948_v54  ;;  %1604 = vmatpush.bf16.msra.mxu1 %v5076_v55  ;;  %v4996_v54 = vor.u32 %v6716_v43, %v4995_v41  ;;  %v4851_v55 = vld [vmem:[#allocation8 + $0x28] sm:$0xf]  ;;  %v5332_v3 = vor.u32 %v6800_v52, %v5331_v51  ;;  %v6764_v7 = vld [vmem:[#allocation8 + $0x2d4] sm:$0xf0]  ;;  %v6694_v41 = vld [vmem:[#allocation8 + $0xac] sm:$0xf] }
  0xec   :  { %v648_v2 = vunpack.c.l.bf16 %v624_v57  ;;  %v649_v1 = vunpack.c.h.bf16 %v624_v57  ;;  %v4852_v10 = vor.u32 %v6680_v63, %v4851_v55  ;;  %v6722_v55 = vld [vmem:[#allocation8 + $0x18c] sm:$0xf]  ;;  %v6748_v63 = vld [vmem:[#allocation8 + $0x254] sm:$0xf0] }
  0xed   :  { %v620_v13 = vpop.f32.mrf.mxu2 }
  0xee   :  { %v660_v8 = vadd.f32 %v656_v53, %v648_v2  ;;  %v661_v9 = vadd.f32 %v657_v58, %v649_v1  ;;  %v6712_v2 = vld [vmem:[#allocation8 + $0x134] sm:$0xf0]  ;;  %v5204_v1 = vor.u32 %v6768_v48, %v5203_v47  ;;  %v5139_v47 = vld [vmem:[#allocation8 + $0x268] sm:$0xf] }
  0xef   :  { %v606_v14 = vpop.f32.mrf.mxu0  ;;  %1591 = vmatpush.bf16.msra.mxu3 %v4932_v4  ;;  %1605 = vmatpush.bf16.msra.mxu1 %v5060_v5  ;;  %v5187_v4 = vld [vmem:[#allocation8 + $0x2c8] sm:$0xf]  ;;  %v4980_v11 = vor.u32 %v6712_v2, %v4979_v0  ;;  %v6752_v48 = vld [vmem:[#allocation8 + $0x274] sm:$0xf0] }
  0xf0   :  { %v621_v16 = vadd.f32 %v620_v13, %v606_v14  ;;  %v667_v20 = vpack.c.bf16 %v661_v9, %v660_v8  ;;  %v5315_v8 = vld [vmem:[#allocation8 + $0x3c8] sm:$0xf]  ;;  %v6796_v9 = vld [vmem:[#allocation8 + $0x3d4] sm:$0xf0] }
  0xf1   :  { %v6676_v13 = vld [vmem:[#allocation8 + $0x14] sm:$0xf0]  ;;  %v4963_v14 = vld [vmem:[#allocation8 + $0x108] sm:$0xf]  ;;  %v5316_v19 = vor.u32 %v6796_v9, %v5315_v8  ;;  %v6718_v8 = vld [vmem:[#allocation8 + $0x16c] sm:$0xf] }
  0xf2   :  { %v626_v21 = vpack.c.bf16 %v621_v16, %v593_v15  ;;  %v672_v29 = vunpack.c.l.bf16 %v667_v20  ;;  %v673_v30 = vunpack.c.h.bf16 %v667_v20  ;;  %v6708_v15 = vld [vmem:[#allocation8 + $0x114] sm:$0xf0]  ;;  %v6702_v16 = vld [vmem:[#allocation8 + $0xec] sm:$0xf]  ;;  %v5251_v0 = vld [vmem:[#allocation8 + $0x348] sm:$0xf] }
  0xf3   :  { %1592 = vmatpush.bf16.msra.mxu3 %v4916_v17  ;;  %1606 = vmatpush.bf16.msra.mxu1 %v5044_v18  ;;  %v4949_v17 = vld [vmem:[#allocation8 + $0xf8] sm:$0xf0]  ;;  %v5188_v18 = vor.u32 %v6764_v7, %v5187_v4  ;;  %v6734_v20 = vld [vmem:[#allocation8 + $0x1ec] sm:$0xf]  ;;  %v6780_v2 = vld [vmem:[#allocation8 + $0x354] sm:$0xf0] }
  0xf4   :  { %v652_v25 = vunpack.c.l.bf16 %v626_v21  ;;  %v653_v26 = vunpack.c.h.bf16 %v626_v21  ;;  %v680_v60 = vmul.f32 0.010009766, %v672_v29  ;;  %v681_v46 = vmul.f32 0.010009766, %v673_v30  ;;  %v5077_v21 = vld [vmem:[#allocation8 + $0x1f8] sm:$0xf0]  ;;  %v6686_v4 = vld [vmem:[#allocation8 + $0x6c] sm:$0xf] }
  0xf5   :  { %v5080_v28 = vor.u32 %v6734_v20, %v5077_v21  ;;  %v4885_v7 = vld [vmem:[#allocation8 + $0x78] sm:$0xf0]  ;;  %v6714_v20 = vld [vmem:[#allocation8 + $0x14c] sm:$0xf] }
  0xf6   :  { %v664_v31 = vadd.f32 %v656_v53, %v652_v25  ;;  %v665_v32 = vadd.f32 %v657_v58, %v653_v26  ;;  %v4868_v53 = vor.u32 %v6684_v40, %v4867_v39  ;;  %v700_v56 = vmax.f32 %v672_v29, %v680_v60  ;;  %v6792_v25 = vld [vmem:[#allocation8 + $0x3b4] sm:$0xf0]  ;;  %v6698_v29 = vld [vmem:[#allocation8 + $0xcc] sm:$0xf]  ;;  %v4917_v60 = vld [vmem:[#allocation8 + $0xb8] sm:$0xf0] }
  0xf7   :  { %1593 = vmatpush.bf16.msra.mxu3 %v4900_v27  ;;  %1607 = vmatpush.bf16.msra.mxu1 %v5028_v42  ;;  %v701_v58 = vmax.f32 %v673_v30, %v681_v46  ;;  %v4836_v26 = vor.u32 %v6676_v13, %v4835_v12  ;;  %v4964_v27 = vor.u32 %v6708_v15, %v4963_v14  ;;  %v4933_v30 = vld [vmem:[#allocation8 + $0xd8] sm:$0xf0]  ;;  %v5107_v12 = vld [vmem:[#allocation8 + $0x228] sm:$0xf]  ;;  %v6744_v13 = vld [vmem:[#allocation8 + $0x234] sm:$0xf0] }
  0xf8   :  { %v669_v36 = vpack.c.bf16 %v665_v32, %v664_v31  ;;  %v4952_v42 = vor.u32 %v6702_v16, %v4949_v17  ;;  %v5172_v31 = vor.u32 %v6760_v23, %v5171_v22  ;;  %v5300_v32 = vor.u32 %v6792_v25, %v5299_v24  ;;  %v5045_v46 = vld [vmem:[#allocation8 + $0x1b8] sm:$0xf0]  ;;  %v5235_v14 = vld [vmem:[#allocation8 + $0x328] sm:$0xf]  ;;  %v6776_v15 = vld [vmem:[#allocation8 + $0x334] sm:$0xf0] }
  0xf9   :  { %v4936_v39 = vor.u32 %v6698_v29, %v4933_v30  ;;  %v5064_v40 = vor.u32 %v6730_v33, %v5061_v34  ;;  %v4920_v51 = vor.u32 %v6694_v41, %v4917_v60  ;;  %v5013_v9 = vld [vmem:[#allocation8 + $0x178] sm:$0xf0]  ;;  %v4888_v16 = vor.u32 %v6686_v4, %v4885_v7  ;;  %v5091_v24 = vld [vmem:[#allocation8 + $0x208] sm:$0xf]  ;;  %v6740_v25 = vld [vmem:[#allocation8 + $0x214] sm:$0xf0] }
  0xfa   :  { %v676_v44 = vunpack.c.l.bf16 %v669_v36  ;;  %v677_v45 = vunpack.c.h.bf16 %v669_v36  ;;  %1542 = vmatmul.bf16.vlgmr.msrb.gmra.mxu3 %v7496_v59  ;;  %1556 = vmatmul.bf16.vlgmr.msrb.gmra.mxu1 %v7498_v61  ;;  %v6756_v36 = vld [vmem:[#allocation8 + $0x294] sm:$0xf0]  ;;  %v5016_v17 = vor.u32 %v6718_v8, %v5013_v9  ;;  %v4997_v21 = vld [vmem:[#allocation8 + $0x158] sm:$0xf0]  ;;  %v5108_v22 = vor.u32 %v6744_v13, %v5107_v12  ;;  %v6678_v33 = vld [vmem:[#allocation8 + $0x2c] sm:$0xf] }
  0xfb   :  { %1594 = vmatpush.bf16.msra.mxu3 %v4884_v37  ;;  %1608 = vmatpush.bf16.msra.mxu1 %v5012_v38  ;;  %v5283_v37 = vld [vmem:[#allocation8 + $0x388] sm:$0xf]  ;;  %v6788_v38 = vld [vmem:[#allocation8 + $0x394] sm:$0xf0]  ;;  %v5156_v43 = vor.u32 %v6756_v36, %v5155_v35  ;;  %v5236_v23 = vor.u32 %v6776_v15, %v5235_v14  ;;  %v5000_v30 = vor.u32 %v6714_v20, %v4997_v21  ;;  %v4853_v34 = vld [vmem:[#allocation8 + $0x38] sm:$0xf0] }
  0xfc   :  { %v684_v49 = vmul.f32 0.010009766, %v676_v44  ;;  %v685_v50 = vmul.f32 0.010009766, %v677_v45  ;;  %v6710_v35 = vld [vmem:[#allocation8 + $0x12c] sm:$0xf]  ;;  %v4981_v36 = vld [vmem:[#allocation8 + $0x138] sm:$0xf0] }
  0xfd   :  { %v6762_v41 = vld [vmem:[#allocation8 + $0x2cc] sm:$0xf]  ;;  %v4984_v60 = vor.u32 %v6710_v35, %v4981_v36  ;;  %v5141_v9 = vld [vmem:[#allocation8 + $0x278] sm:$0xf0]  ;;  %v6853_v35 = vld [vmem:[#allocation11 + $0x19c] sm:$0xf0] }
  0xfe   :  { %v704_v57 = vmax.f32 %v676_v44, %v684_v49  ;;  %v705_v62 = vmax.f32 %v677_v45, %v685_v50  ;;  %v5284_v44 = vor.u32 %v6788_v38, %v5283_v37  ;;  %v6726_v45 = vld [vmem:[#allocation8 + $0x1ac] sm:$0xf]  ;;  %v5267_v49 = vld [vmem:[#allocation8 + $0x368] sm:$0xf]  ;;  %v6784_v50 = vld [vmem:[#allocation8 + $0x374] sm:$0xf0]  ;;  %v5092_v37 = vor.u32 %v6740_v25, %v5091_v24 }
  0xff   :  { %1595 = vmatpush.bf16.msra.mxu3 %v4868_v53  ;;  %1609 = vmatpush.bf16.msra.mxu1 %v4996_v54  ;;  %v5048_v52 = vor.u32 %v6726_v45, %v5045_v46  ;;  %v6690_v53 = vld [vmem:[#allocation8 + $0x8c] sm:$0xf]  ;;  %v4901_v54 = vld [vmem:[#allocation8 + $0x98] sm:$0xf0] }
 0x100   :  { %v7504_v5 = vpack.c.bf16 %v704_v57, %v700_v56  ;;  %v7506_v6 = vpack.c.bf16 %v705_v62, %v701_v58  ;;  %v5029_v56 = vld [vmem:[#allocation8 + $0x198] sm:$0xf0]  ;;  %v5140_v57 = vor.u32 %v6752_v48, %v5139_v47  ;;  %v5268_v58 = vor.u32 %v6784_v50, %v5267_v49  ;;  %v5123_v62 = vld [vmem:[#allocation8 + $0x248] sm:$0xf]  ;;  %v6794_v45 = vld [vmem:[#allocation8 + $0x3cc] sm:$0xf] }
 0x101   :  { %v5317_v46 = vld [vmem:[#allocation8 + $0x3d8] sm:$0xf0]  ;;  %v6674_v47 = vld [vmem:[#allocation8 + $0xc] sm:$0xf] }
 0x102   :  { %1514 = vmatmul.bf16.vlgmr.msra.gmra.mxu2 %v7504_v5  ;;  %1528 = vmatmul.bf16.vlgmr.msra.gmra.mxu0 %v7506_v6  ;;  %v4837_v48 = vld [vmem:[#allocation8 + $0x18] sm:$0xf0]  ;;  %v6706_v49 = vld [vmem:[#allocation8 + $0x10c] sm:$0xf] }
 0x103   :  { %1618 = vmatpush.bf16.msra.mxu2 %v5204_v1  ;;  %1632 = vmatpush.bf16.msra.mxu0 %v5332_v3  ;;  %v4904_v1 = vor.u32 %v6690_v53, %v4901_v54  ;;  %v5032_v3 = vor.u32 %v6722_v55, %v5029_v56  ;;  %v4965_v50 = vld [vmem:[#allocation8 + $0x118] sm:$0xf0]  ;;  %v4840_v53 = vor.u32 %v6674_v47, %v4837_v48  ;;  %v6758_v55 = vld [vmem:[#allocation8 + $0x2ac] sm:$0xf]  ;;  %v5723_v47 = vld [vmem:[#allocation11 + $0x300] sm:$0xf] }
 0x104   :  { %1596 = vmatpush.bf16.msra.mxu3 %v4852_v10  ;;  %1610 = vmatpush.bf16.msra.mxu1 %v4980_v11  ;;  %v5124_v10 = vor.u32 %v6748_v63, %v5123_v62  ;;  %v5252_v11 = vor.u32 %v6780_v2, %v5251_v0  ;;  %v4968_v54 = vor.u32 %v6706_v49, %v4965_v50  ;;  %v5173_v56 = vld [vmem:[#allocation8 + $0x2b8] sm:$0xf0]  ;;  %v6754_v0 = vld [vmem:[#allocation8 + $0x28c] sm:$0xf]  ;;  %v6901_v48 = vld [vmem:[#allocation11 + $0x31c] sm:$0xf0] }
 0x105   :  { %v5176_v62 = vor.u32 %v6758_v55, %v5173_v56  ;;  %v5157_v2 = vld [vmem:[#allocation8 + $0x298] sm:$0xf0]  ;;  %v6750_v8 = vld [vmem:[#allocation8 + $0x26c] sm:$0xf]  ;;  %v5724_v50 = vor.u32 %v6901_v48, %v5723_v47  ;;  %v6893_v55 = vld [vmem:[#allocation11 + $0x2dc] sm:$0xf0] }
 0x106   :  { %v5160_v4 = vor.u32 %v6754_v0, %v5157_v2  ;;  %v5144_v12 = vor.u32 %v6750_v8, %v5141_v9  ;;  %v6746_v14 = vld [vmem:[#allocation8 + $0x24c] sm:$0xf]  ;;  %v5125_v15 = vld [vmem:[#allocation8 + $0x258] sm:$0xf0]  ;;  %v5403_v56 = vld [vmem:[#allocation11 + $0x80] sm:$0xf] }
 0x107   :  { %1619 = vmatpush.bf16.msra.mxu2 %v5188_v18  ;;  %1633 = vmatpush.bf16.msra.mxu0 %v5316_v19  ;;  %v6682_v18 = vld [vmem:[#allocation8 + $0x4c] sm:$0xf]  ;;  %v4869_v19 = vld [vmem:[#allocation8 + $0x58] sm:$0xf0]  ;;  %v6877_v8 = vld [vmem:[#allocation11 + $0x25c] sm:$0xf0] }
 0x108   :  { %1597 = vmatpush.bf16.msra.mxu3 %v4836_v26  ;;  %1611 = vmatpush.bf16.msra.mxu1 %v4964_v27  ;;  %v5219_v26 = vld [vmem:[#allocation8 + $0x308] sm:$0xf]  ;;  %v6772_v27 = vld [vmem:[#allocation8 + $0x314] sm:$0xf0]  ;;  %v4872_v29 = vor.u32 %v6682_v18, %v4869_v19  ;;  %v6742_v18 = vld [vmem:[#allocation8 + $0x22c] sm:$0xf] }
 0x109   :  { %v5220_v38 = vor.u32 %v6772_v27, %v5219_v26  ;;  %v5109_v19 = vld [vmem:[#allocation8 + $0x238] sm:$0xf0]  ;;  %v6774_v20 = vld [vmem:[#allocation8 + $0x32c] sm:$0xf]  ;;  %v5339_v9 = vld [vmem:[#allocation11] sm:$0xf] }
 0x10a   :  { %v5237_v21 = vld [vmem:[#allocation8 + $0x338] sm:$0xf0]  ;;  %v6738_v24 = vld [vmem:[#allocation8 + $0x20c] sm:$0xf] }
 0x10b   :  { %1620 = vmatpush.bf16.msra.mxu2 %v5172_v31  ;;  %1634 = vmatpush.bf16.msra.mxu0 %v5300_v32  ;;  %v6798_v31 = vld [vmem:[#allocation8 + $0x3ec] sm:$0xf]  ;;  %v5333_v32 = vld [vmem:[#allocation8 + $0x3f8] sm:$0xf0] }
 0x10c   :  { %1646 = vmatpush.bf16.msrb.mxu3 %v4952_v42  ;;  %1660 = vmatpush.bf16.msrb.mxu1 %v5080_v28  ;;  %v6766_v42 = vld [vmem:[#allocation8 + $0x2ec] sm:$0xf]  ;;  %v5205_v28 = vld [vmem:[#allocation8 + $0x2f8] sm:$0xf0] }
 0x10d   :  { %1598 = vmatmul.bf16.vlgmr.msra.gmra.mxu3 %v7496_v59  ;;  %1612 = vmatmul.bf16.vlgmr.msra.gmra.mxu1 %v7498_v61  ;;  %v5093_v25 = vld [vmem:[#allocation8 + $0x218] sm:$0xf0]  ;;  %v6770_v26 = vld [vmem:[#allocation8 + $0x30c] sm:$0xf] }
 0x10e   :  { %v5221_v27 = vld [vmem:[#allocation8 + $0x318] sm:$0xf0] }
 0x10f   :  { %1621 = vmatpush.bf16.msra.mxu2 %v5156_v43  ;;  %1635 = vmatpush.bf16.msra.mxu0 %v5284_v44  ;;  %v5189_v43 = vld [vmem:[#allocation8 + $0x2d8] sm:$0xf0]  ;;  %v4856_v44 = vor.u32 %v6678_v33, %v4853_v34  ;;  %v6925_v33 = vld [vmem:[#allocation11 + $0x3dc] sm:$0xf0] }
 0x110   :  { %1647 = vmatpush.bf16.msrb.mxu3 %v4936_v39  ;;  %1661 = vmatpush.bf16.msrb.mxu1 %v5064_v40  ;;  %v5208_v39 = vor.u32 %v6766_v42, %v5205_v28  ;;  %v5336_v40 = vor.u32 %v6798_v31, %v5333_v32  ;;  %v5096_v42 = vor.u32 %v6738_v24, %v5093_v25  ;;  %v5819_v31 = vld [vmem:[#allocation11 + $0x3c0] sm:$0xf]  ;;  %v5789_v24 = vld [vmem:[#allocation11 + $0x3a0] sm:$0xf0] }
 0x111   :  { %v5224_v28 = vor.u32 %v6770_v26, %v5221_v27  ;;  %v5531_v34 = vld [vmem:[#allocation11 + $0x180] sm:$0xf]  ;;  %v5820_v36 = vor.u32 %v6925_v33, %v5819_v31  ;;  %v5757_v31 = vld [vmem:[#allocation11 + $0x360] sm:$0xf0] }
 0x112   :  { %1570 = vmatmul.bf16.vlgmr.msrb.gmra.mxu2 %v7504_v5  ;;  %1584 = vmatmul.bf16.vlgmr.msrb.gmra.mxu0 %v7506_v6  ;;  %v6833_v33 = vld [vmem:[#allocation11 + $0x104] sm:$0xf] }
 0x113   :  { %1622 = vmatpush.bf16.msra.mxu2 %v5140_v57  ;;  %1636 = vmatpush.bf16.msra.mxu0 %v5268_v58  ;;  %v6790_v57 = vld [vmem:[#allocation8 + $0x3ac] sm:$0xf]  ;;  %v5301_v58 = vld [vmem:[#allocation8 + $0x3b8] sm:$0xf0] }
 0x114   :  { %1648 = vmatpush.bf16.msrb.mxu3 %v4920_v51  ;;  %1662 = vmatpush.bf16.msrb.mxu1 %v5048_v52  ;;  %v5192_v51 = vor.u32 %v6762_v41, %v5189_v43  ;;  %v5320_v52 = vor.u32 %v6794_v45, %v5317_v46  ;;  %v5304_v63 = vor.u32 %v6790_v57, %v5301_v58  ;;  %v5499_v41 = vld [vmem:[#allocation11 + $0x140] sm:$0xf] }
 0x115   :  { %v5755_v43 = vld [vmem:[#allocation11 + $0x340] sm:$0xf] }
 0x116   :  { %v6837_v45 = vld [vmem:[#allocation11 + $0x11c] sm:$0xf0] }
 0x117   :  { %1623 = vmatpush.bf16.msra.mxu2 %v5124_v10  ;;  %1637 = vmatpush.bf16.msra.mxu0 %v5252_v11  ;;  %v6782_v10 = vld [vmem:[#allocation8 + $0x36c] sm:$0xf]  ;;  %v5269_v11 = vld [vmem:[#allocation8 + $0x378] sm:$0xf0]  ;;  %v6821_v57 = vld [vmem:[#allocation11 + $0x9c] sm:$0xf0] }
 0x118   :  { %1649 = vmatpush.bf16.msrb.mxu3 %v4904_v1  ;;  %1663 = vmatpush.bf16.msrb.mxu1 %v5032_v3  ;;  %v6786_v1 = vld [vmem:[#allocation8 + $0x38c] sm:$0xf]  ;;  %v5285_v3 = vld [vmem:[#allocation8 + $0x398] sm:$0xf0]  ;;  %v5272_v13 = vor.u32 %v6782_v10, %v5269_v11  ;;  %v5404_v0 = vor.u32 %v6821_v57, %v5403_v56  ;;  %v6805_v10 = vld [vmem:[#allocation11 + $0x1c] sm:$0xf0] }
 0x119   :  { %v5288_v7 = vor.u32 %v6786_v1, %v5285_v3  ;;  %v5371_v1 = vld [vmem:[#allocation11 + $0x40] sm:$0xf] }
 0x11a   :  { %v6813_v3 = vld [vmem:[#allocation11 + $0x5c] sm:$0xf0] }
 0x11b   :  { %1624 = vmatpush.bf16.msra.mxu2 %v5108_v22  ;;  %1638 = vmatpush.bf16.msra.mxu0 %v5236_v23  ;;  %v5112_v22 = vor.u32 %v6742_v18, %v5109_v19  ;;  %v5240_v23 = vor.u32 %v6774_v20, %v5237_v21  ;;  %v5821_v18 = vld [vmem:[#allocation11 + $0x3e0] sm:$0xf0]  ;;  %v7045_v57 = vld [vmem:[#allocation11 + $0x79c] sm:$0xf0] }
 0x11c   :  { %1650 = vmatpush.bf16.msrb.mxu3 %v4888_v16  ;;  %1664 = vmatpush.bf16.msrb.mxu1 %v5016_v17  ;;  %v6778_v16 = vld [vmem:[#allocation8 + $0x34c] sm:$0xf]  ;;  %v5253_v17 = vld [vmem:[#allocation8 + $0x358] sm:$0xf0]  ;;  %v6849_v20 = vld [vmem:[#allocation11 + $0x184] sm:$0xf] }
 0x11d   :  { %v5533_v21 = vld [vmem:[#allocation11 + $0x1a0] sm:$0xf0] }
 0x11f   :  { %1625 = vmatpush.bf16.msra.mxu2 %v5092_v37  ;;  %1639 = vmatpush.bf16.msra.mxu0 %v5220_v38  ;;  %v5787_v37 = vld [vmem:[#allocation11 + $0x380] sm:$0xf] }
 0x120   :  { %1651 = vmatpush.bf16.msrb.mxu3 %v4872_v29  ;;  %1665 = vmatpush.bf16.msrb.mxu1 %v5000_v30  ;;  %v5563_v29 = vld [vmem:[#allocation11 + $0x1c0] sm:$0xf] }
 0x121   :  { %v6861_v30 = vld [vmem:[#allocation11 + $0x1dc] sm:$0xf0] }
 0x122   :  { %1626 = vmatmul.bf16.vlgmr.msra.gmra.mxu2 %v7504_v5  ;;  %1640 = vmatmul.bf16.vlgmr.msra.gmra.mxu0 %v7506_v6  ;;  %v5564_v32 = vor.u32 %v6861_v30, %v5563_v29  ;;  %v6917_v38 = vld [vmem:[#allocation11 + $0x39c] sm:$0xf0]  ;;  %v6905_v30 = vld [vmem:[#allocation11 + $0x344] sm:$0xf] }
 0x123   :  { %1674 = vmatpush.bf16.msrb.mxu2 %v5208_v39  ;;  %1688 = vmatpush.bf16.msrb.mxu0 %v5336_v40  ;;  %v5532_v39 = vor.u32 %v6853_v35, %v5531_v34  ;;  %v5788_v40 = vor.u32 %v6917_v38, %v5787_v37  ;;  %v5469_v34 = vld [vmem:[#allocation11 + $0x120] sm:$0xf0] }
 0x124   :  { %1652 = vmatpush.bf16.msrb.mxu3 %v4856_v44  ;;  %1666 = vmatpush.bf16.msrb.mxu1 %v4984_v60  ;;  %v6909_v44 = vld [vmem:[#allocation11 + $0x35c] sm:$0xf0]  ;;  %v6897_v35 = vld [vmem:[#allocation11 + $0x304] sm:$0xf]  ;;  %v5472_v37 = vor.u32 %v6833_v33, %v5469_v34 }
 0x125   :  { %v5467_v60 = vld [vmem:[#allocation11 + $0x100] sm:$0xf]  ;;  %v5756_v46 = vor.u32 %v6909_v44, %v5755_v43  ;;  %v5725_v38 = vld [vmem:[#allocation11 + $0x320] sm:$0xf0] }
 0x126   :  { %v5468_v49 = vor.u32 %v6837_v45, %v5467_v60  ;;  %v7053_v60 = vld [vmem:[#allocation11 + $0x7dc] sm:$0xf0]  ;;  %v6825_v45 = vld [vmem:[#allocation11 + $0xc4] sm:$0xf] }
 0x127   :  { %1675 = vmatpush.bf16.msrb.mxu2 %v5192_v51  ;;  %1689 = vmatpush.bf16.msrb.mxu0 %v5320_v52  ;;  %v5435_v51 = vld [vmem:[#allocation11 + $0xc0] sm:$0xf]  ;;  %v5597_v33 = vld [vmem:[#allocation11 + $0x220] sm:$0xf0] }
 0x128   :  { %1653 = vmatpush.bf16.msrb.mxu3 %v4840_v53  ;;  %1667 = vmatpush.bf16.msrb.mxu1 %v4968_v54  ;;  %v6829_v52 = vld [vmem:[#allocation11 + $0xdc] sm:$0xf0] }
 0x129   :  { %v5691_v53 = vld [vmem:[#allocation11 + $0x2c0] sm:$0xf]  ;;  %v5436_v54 = vor.u32 %v6829_v52, %v5435_v51 }
 0x12a   :  { %v5692_v58 = vor.u32 %v6893_v55, %v5691_v53  ;;  %v6043_v53 = vld [vmem:[#allocation11 + $0x580] sm:$0xf] }
 0x12b   :  { %1654 = vmatmul.bf16.vlgmr.msrb.gmra.mxu3 %v7496_v59  ;;  %1668 = vmatmul.bf16.vlgmr.msrb.gmra.mxu1 %v7498_v61  ;;  %v5128_v59 = vor.u32 %v6746_v14, %v5125_v15  ;;  %v5256_v61 = vor.u32 %v6778_v16, %v5253_v17  ;;  %v5340_v14 = vor.u32 %v6805_v10, %v5339_v9  ;;  %v6857_v16 = vld [vmem:[#allocation11 + $0x1c4] sm:$0xf]  ;;  %v6299_v55 = vld [vmem:[#allocation11 + $0x780] sm:$0xf] }
 0x12c   :  { %1676 = vmatpush.bf16.msrb.mxu2 %v5176_v62  ;;  %1690 = vmatpush.bf16.msrb.mxu0 %v5304_v63  ;;  %v5659_v62 = vld [vmem:[#allocation11 + $0x280] sm:$0xf]  ;;  %v5565_v17 = vld [vmem:[#allocation11 + $0x1e0] sm:$0xf0] }
 0x12d   :  { %3325 = vmatpush.bf16.msra.mxu3 %v5564_v32  ;;  %3339 = vmatpush.bf16.msra.mxu1 %v5820_v36  ;;  %v6885_v63 = vld [vmem:[#allocation11 + $0x29c] sm:$0xf0]  ;;  %v5760_v32 = vor.u32 %v6905_v30, %v5757_v31 }
 0x12e   :  { %v5660_v2 = vor.u32 %v6885_v63, %v5659_v62  ;;  %v5405_v62 = vld [vmem:[#allocation11 + $0xa0] sm:$0xf0]  ;;  %v6300_v63 = vor.u32 %v7045_v57, %v6299_v55  ;;  %v6267_v9 = vld [vmem:[#allocation11 + $0x740] sm:$0xf] }
 0x12f   :  { %v7013_v57 = vld [vmem:[#allocation11 + $0x69c] sm:$0xf0] }
 0x130   :  { %1677 = vmatpush.bf16.msrb.mxu2 %v5160_v4  ;;  %1691 = vmatpush.bf16.msrb.mxu0 %v5288_v7  ;;  %v5627_v4 = vld [vmem:[#allocation11 + $0x240] sm:$0xf]  ;;  %v5372_v7 = vor.u32 %v6813_v3, %v5371_v1  ;;  %v5661_v1 = vld [vmem:[#allocation11 + $0x2a0] sm:$0xf0] }
 0x131   :  { %3326 = vmatpush.bf16.msra.mxu3 %v5532_v39  ;;  %3340 = vmatpush.bf16.msra.mxu1 %v5788_v40  ;;  %v5628_v11 = vor.u32 %v6877_v8, %v5627_v4  ;;  %v5728_v39 = vor.u32 %v6897_v35, %v5725_v38  ;;  %v6075_v40 = vld [vmem:[#allocation11 + $0x5c0] sm:$0xf] }
 0x132   :  { %v6973_v8 = vld [vmem:[#allocation11 + $0x55c] sm:$0xf0] }
 0x134   :  { %1678 = vmatpush.bf16.msrb.mxu2 %v5144_v12  ;;  %1692 = vmatpush.bf16.msrb.mxu0 %v5272_v13  ;;  %v5595_v12 = vld [vmem:[#allocation11 + $0x200] sm:$0xf] }
 0x135   :  { %3341 = vmatpush.bf16.msra.mxu1 %v5756_v46  ;;  %v6869_v13 = vld [vmem:[#allocation11 + $0x21c] sm:$0xf0]  ;;  %v5437_v46 = vld [vmem:[#allocation11 + $0xe0] sm:$0xf0] }
 0x136   :  { %v5596_v15 = vor.u32 %v6869_v13, %v5595_v12  ;;  %v5440_v48 = vor.u32 %v6825_v45, %v5437_v46  ;;  %v7037_v12 = vld [vmem:[#allocation11 + $0x75c] sm:$0xf0]  ;;  %v6809_v13 = vld [vmem:[#allocation11 + $0x44] sm:$0xf] }
 0x137   :  { %v7021_v45 = vld [vmem:[#allocation11 + $0x6dc] sm:$0xf0] }
 0x138   :  { %1679 = vmatpush.bf16.msrb.mxu2 %v5128_v59  ;;  %1693 = vmatpush.bf16.msrb.mxu0 %v5256_v61  ;;  %v6921_v59 = vld [vmem:[#allocation11 + $0x3c4] sm:$0xf]  ;;  %v5568_v61 = vor.u32 %v6857_v16, %v5565_v17 }
 0x139   :  { %3342 = vmatpush.bf16.msra.mxu1 %v5724_v50  ;;  %v5824_v19 = vor.u32 %v6921_v59, %v5821_v18  ;;  %v5693_v50 = vld [vmem:[#allocation11 + $0x2e0] sm:$0xf0]  ;;  %v1709_v18 = vld [vmem:[#allocation1] sm:$0xff] }
 0x13a   :  { %v6873_v17 = vld [vmem:[#allocation11 + $0x244] sm:$0xf]  ;;  %v1713_v35 = vpack.i.b16 %v1709_v18, %v1709_v18  ;;  %v6933_v18 = vld [vmem:[#allocation11 + $0x41c] sm:$0xf0] }
 0x13b   :  { %v5629_v59 = vld [vmem:[#allocation11 + $0x260] sm:$0xf0] }
 0x13c   :  { %1680 = vmatpush.bf16.msrb.mxu2 %v5112_v22  ;;  %1694 = vmatpush.bf16.msrb.mxu0 %v5240_v23  ;;  %v6913_v22 = vld [vmem:[#allocation11 + $0x384] sm:$0xf]  ;;  %v5536_v23 = vor.u32 %v6849_v20, %v5533_v21  ;;  %v5632_v20 = vor.u32 %v6873_v17, %v5629_v59  ;;  %v5979_v21 = vld [vmem:[#allocation11 + $0x500] sm:$0xf] }
 0x13d   :  { %3343 = vmatpush.bf16.msra.mxu1 %v5692_v58  ;;  %v5792_v26 = vor.u32 %v6913_v22, %v5789_v24  ;;  %v6817_v58 = vld [vmem:[#allocation11 + $0x84] sm:$0xf]  ;;  %v6965_v22 = vld [vmem:[#allocation11 + $0x51c] sm:$0xf0] }
 0x140   :  { %1681 = vmatpush.bf16.msrb.mxu2 %v5096_v42  ;;  %1695 = vmatpush.bf16.msrb.mxu0 %v5224_v28  ;;  %v6841_v42 = vld [vmem:[#allocation11 + $0x144] sm:$0xf] }
 0x141   :  { %3344 = vmatpush.bf16.msra.mxu1 %v5660_v2  ;;  %v5501_v28 = vld [vmem:[#allocation11 + $0x160] sm:$0xf0] }
 0x142   :  { %v5504_v29 = vor.u32 %v6841_v42, %v5501_v28  ;;  %v6881_v2 = vld [vmem:[#allocation11 + $0x284] sm:$0xf]  ;;  %v7029_v42 = vld [vmem:[#allocation11 + $0x71c] sm:$0xf0] }
 0x143   :  { %1682 = vmatmul.bf16.vlgmr.msrb.gmra.mxu2 %v7504_v5  ;;  %1696 = vmatmul.bf16.vlgmr.msrb.gmra.mxu0 %v7506_v6  ;;  %v6845_v5 = vld [vmem:[#allocation11 + $0x15c] sm:$0xf0]  ;;  %v5664_v3 = vor.u32 %v6881_v2, %v5661_v1  ;;  %v6801_v28 = vld [vmem:[#allocation11 + $0x4] sm:$0xf] }
 0x144   :  { %v5500_v6 = vor.u32 %v6845_v5, %v5499_v41  ;;  %v6989_v41 = vld [vmem:[#allocation11 + $0x5dc] sm:$0xf0] }
 0x145   :  { %3345 = vmatpush.bf16.msra.mxu1 %v5628_v11  ;;  %v6331_v5 = vld [vmem:[#allocation11 + $0x7c0] sm:$0xf]  ;;  %v6076_v44 = vor.u32 %v6989_v41, %v6075_v40 }
 0x146   :  { %3327 = vmatpush.bf16.msra.mxu3 %v5500_v6  ;;  %v6332_v47 = vor.u32 %v7053_v60, %v6331_v5  ;;  %v6957_v40 = vld [vmem:[#allocation11 + $0x4dc] sm:$0xf0] }
 0x147   :  { %3353 = vmatpush.bf16.msra.mxu2 %v6076_v44  ;;  %v6203_v41 = vld [vmem:[#allocation11 + $0x6c0] sm:$0xf] }
 0x148   :  { %3367 = vmatpush.bf16.msra.mxu0 %v6332_v47 }
 0x149   :  { %3346 = vmatpush.bf16.msra.mxu1 %v5596_v15  ;;  %v6268_v15 = vor.u32 %v7037_v12, %v6267_v9 }
 0x14a   :  { %3328 = vmatpush.bf16.msra.mxu3 %v5468_v49  ;;  %v6889_v49 = vld [vmem:[#allocation11 + $0x2c4] sm:$0xf] }
 0x14b   :  { %v5696_v52 = vor.u32 %v6889_v49, %v5693_v50  ;;  %v5915_v50 = vld [vmem:[#allocation11 + $0x480] sm:$0xf] }
 0x14c   :  { %3368 = vmatpush.bf16.msra.mxu0 %v6300_v63 }
 0x14d   :  { %3395 = vmatpush.bf16.msrb.mxu1 %v5824_v19  ;;  %v1710_v19 = vld [vmem:[#allocation1 + $0x9] sm:$0xff] }
 0x14e   :  { %3329 = vmatpush.bf16.msra.mxu3 %v5436_v54  ;;  %v6981_v54 = vld [vmem:[#allocation11 + $0x59c] sm:$0xf0] }
 0x14f   :  { %v6044_v56 = vor.u32 %v6981_v54, %v6043_v53  ;;  %v6171_v53 = vld [vmem:[#allocation11 + $0x680] sm:$0xf] }
 0x150   :  { %3369 = vmatpush.bf16.msra.mxu0 %v6268_v15 }
 0x151   :  { %3396 = vmatpush.bf16.msrb.mxu1 %v5792_v26  ;;  %3354 = vmatpush.bf16.msra.mxu2 %v6044_v56  ;;  %v5980_v26 = vor.u32 %v6965_v22, %v5979_v21 }
 0x152   :  { %3330 = vmatpush.bf16.msra.mxu3 %v5404_v0  ;;  %v5408_v0 = vor.u32 %v6817_v58, %v5405_v62  ;;  %v6172_v58 = vor.u32 %v7013_v57, %v6171_v53  ;;  %v5827_v57 = vld [vmem:[#allocation11 + $0x3c8] sm:$0xf] }
 0x155   :  { %3397 = vmatpush.bf16.msrb.mxu1 %v5760_v32  ;;  %v6865_v32 = vld [vmem:[#allocation11 + $0x204] sm:$0xf] }
 0x156   :  { %3331 = vmatpush.bf16.msra.mxu3 %v5372_v7  ;;  %v6011_v7 = vld [vmem:[#allocation11 + $0x540] sm:$0xf]  ;;  %v5600_v38 = vor.u32 %v6865_v32, %v5597_v33 }
 0x157   :  { %v6012_v11 = vor.u32 %v6973_v8, %v6011_v7  ;;  %v5883_v7 = vld [vmem:[#allocation11 + $0x440] sm:$0xf] }
 0x158   :  { %v6941_v8 = vld [vmem:[#allocation11 + $0x45c] sm:$0xf0] }
 0x159   :  { %3398 = vmatpush.bf16.msrb.mxu1 %v5728_v39  ;;  %3355 = vmatpush.bf16.msra.mxu2 %v6012_v11  ;;  %v5947_v39 = vld [vmem:[#allocation11 + $0x4c0] sm:$0xf] }
 0x15a   :  { %3332 = vmatpush.bf16.msra.mxu3 %v5340_v14  ;;  %v5373_v14 = vld [vmem:[#allocation11 + $0x60] sm:$0xf0]  ;;  %v5948_v60 = vor.u32 %v6957_v40, %v5947_v39 }
 0x15b   :  { %v5376_v16 = vor.u32 %v6809_v13, %v5373_v14  ;;  %v5884_v13 = vor.u32 %v6941_v8, %v5883_v7  ;;  %v7005_v14 = vld [vmem:[#allocation11 + $0x65c] sm:$0xf0]  ;;  %v7041_v39 = vld [vmem:[#allocation11 + $0x784] sm:$0xf] }
 0x15c   :  { %v7025_v8 = vld [vmem:[#allocation11 + $0x704] sm:$0xf] }
 0x15d   :  { %3399 = vmatpush.bf16.msrb.mxu1 %v5696_v52  ;;  %3356 = vmatpush.bf16.msra.mxu2 %v5980_v26  ;;  %v6949_v52 = vld [vmem:[#allocation11 + $0x49c] sm:$0xf0] }
 0x15e   :  { %3381 = vmatpush.bf16.msrb.mxu3 %v5568_v61  ;;  %v5916_v56 = vor.u32 %v6949_v52, %v5915_v50 }
 0x161   :  { %3400 = vmatpush.bf16.msrb.mxu1 %v5664_v3  ;;  %3357 = vmatpush.bf16.msra.mxu2 %v5948_v60 }
 0x162   :  { %3382 = vmatpush.bf16.msrb.mxu3 %v5536_v23  ;;  %v6235_v23 = vld [vmem:[#allocation11 + $0x700] sm:$0xf] }
 0x163   :  { %v6236_v30 = vor.u32 %v7029_v42, %v6235_v23  ;;  %v6985_v23 = vld [vmem:[#allocation11 + $0x5c4] sm:$0xf] }
 0x165   :  { %3401 = vmatpush.bf16.msrb.mxu1 %v5632_v20  ;;  %3370 = vmatpush.bf16.msra.mxu0 %v6236_v30  ;;  %v6333_v30 = vld [vmem:[#allocation11 + $0x7e0] sm:$0xf0] }
 0x166   :  { %3383 = vmatpush.bf16.msrb.mxu3 %v5504_v29  ;;  %v5341_v29 = vld [vmem:[#allocation11 + $0x20] sm:$0xf0]  ;;  %3358 = vmatpush.bf16.msra.mxu2 %v5916_v56  ;;  %v6862_v56 = vld [vmem:[#allocation11 + $0x1e4] sm:$0xf0] }
 0x167   :  { %v7522_v27 = vpop.f32.mrf.mxu1  ;;  %v5344_v31 = vor.u32 %v6801_v28, %v5341_v29  ;;  %v7049_v29 = vld [vmem:[#allocation11 + $0x7c4] sm:$0xf] }
 0x168   :  { %v6336_v32 = vor.u32 %v7049_v29, %v6333_v30 }
 0x169   :  { %3402 = vmatpush.bf16.msrb.mxu1 %v5600_v38 }
 0x16a   :  { %3384 = vmatpush.bf16.msrb.mxu3 %v5472_v37  ;;  %v1716_v37 = vpack.i.b16 %v1710_v19, %v1710_v19  ;;  %3359 = vmatpush.bf16.msra.mxu2 %v5884_v13  ;;  %v6107_v19 = vld [vmem:[#allocation11 + $0x600] sm:$0xf] }
 0x16d   :  { %v7520_v25 = vpop.f32.mrf.mxu3 }
 0x16e   :  { %3385 = vmatpush.bf16.msrb.mxu3 %v5440_v48  ;;  %v1502_v34 = vadd.f32 %v7522_v27, %v7520_v25  ;;  %v6204_v48 = vor.u32 %v7021_v45, %v6203_v41  ;;  %v7539_v25 = vperm.slane %v1713_v35, 0  ;;  %v7541_v27 = vperm.slane %v1716_v37, 0  ;;  %v6977_v35 = vld [vmem:[#allocation11 + $0x584] sm:$0xf] }
 0x16f   :  { %v7530_v51 = vpop.f32.mrf.mxu1 }
 0x170   :  { %3371 = vmatpush.bf16.msra.mxu0 %v6204_v48  ;;  %v1733_v2 = vunpack.c.l.bf16 %v7539_v25  ;;  %v1734_v1 = vunpack.c.l.bf16 %v7541_v27  ;;  %v7033_v48 = vld [vmem:[#allocation11 + $0x744] sm:$0xf] }
 0x171   :  { %v6269_v27 = vld [vmem:[#allocation11 + $0x760] sm:$0xf0] }
 0x172   :  { %3386 = vmatpush.bf16.msrb.mxu3 %v5408_v0 }
 0x174   :  { %3372 = vmatpush.bf16.msra.mxu0 %v6172_v58  ;;  %v6926_v58 = vld [vmem:[#allocation11 + $0x3e4] sm:$0xf0] }
 0x175   :  { %v7526_v43 = vpop.f32.mrf.mxu3 }
 0x176   :  { %3387 = vmatpush.bf16.msrb.mxu3 %v5376_v16  ;;  %v1504_v62 = vadd.f32 %v7530_v51, %v7526_v43 }
 0x177   :  { %v1557_v24 = vpop.f32.mrf.mxu1 }
 0x17a   :  { %3388 = vmatpush.bf16.msrb.mxu3 %v5344_v31 }
 0x17d   :  { %v1543_v61 = vpop.f32.mrf.mxu3 }
 0x17e   :  { %v1558_v5 = vadd.f32 %v1557_v24, %v1543_v61  ;;  %v5851_v61 = vld [vmem:[#allocation11 + $0x400] sm:$0xf]  ;;  %v6077_v24 = vld [vmem:[#allocation11 + $0x5e0] sm:$0xf0] }
 0x17f   :  { %v7524_v36 = vpop.f32.mrf.mxu0  ;;  %v1559_v63 = vpop.f32.mrf.mxu1  ;;  %v5852_v22 = vor.u32 %v6933_v18, %v5851_v61  ;;  %v6080_v28 = vor.u32 %v6985_v23, %v6077_v24  ;;  %v6918_v61 = vld [vmem:[#allocation11 + $0x3a4] sm:$0xf0]  ;;  %v6953_v18 = vld [vmem:[#allocation11 + $0x4c4] sm:$0xf] }
 0x180   :  { %v6205_v23 = vld [vmem:[#allocation11 + $0x6e0] sm:$0xf0]  ;;  %v5507_v24 = vld [vmem:[#allocation11 + $0x148] sm:$0xf] }
 0x181   :  { %3360 = vmatpush.bf16.msra.mxu2 %v5852_v22 }
 0x185   :  { %v7528_v6 = vpop.f32.mrf.mxu2  ;;  %v1545_v55 = vpop.f32.mrf.mxu3  ;;  %3409 = vmatpush.bf16.msrb.mxu2 %v6080_v28 }
 0x186   :  { %v1516_v44 = vadd.f32 %v7528_v6, %v1502_v34  ;;  %v1560_v3 = vadd.f32 %v1559_v63, %v1545_v55  ;;  %v6272_v55 = vor.u32 %v7033_v48, %v6269_v27  ;;  %v6902_v48 = vld [vmem:[#allocation11 + $0x324] sm:$0xf0]  ;;  %v7001_v27 = vld [vmem:[#allocation11 + $0x644] sm:$0xf] }
 0x187   :  { %v7532_v4 = vpop.f32.mrf.mxu0 }
 0x188   :  { %v1530_v54 = vadd.f32 %v7524_v36, %v1516_v44  ;;  %v6139_v36 = vld [vmem:[#allocation11 + $0x640] sm:$0xf]  ;;  %v6301_v44 = vld [vmem:[#allocation11 + $0x7a0] sm:$0xf0] }
 0x189   :  { %v6140_v43 = vor.u32 %v7005_v14, %v6139_v36  ;;  %v6304_v60 = vor.u32 %v7041_v39, %v6301_v44  ;;  %v6237_v36 = vld [vmem:[#allocation11 + $0x720] sm:$0xf0] }
 0x18a   :  { %v6240_v13 = vor.u32 %v7025_v8, %v6237_v36  ;;  %v7009_v39 = vld [vmem:[#allocation11 + $0x684] sm:$0xf] }
 0x18b   :  { %3373 = vmatpush.bf16.msra.mxu0 %v6140_v43  ;;  %v5539_v43 = vld [vmem:[#allocation11 + $0x188] sm:$0xf] }
 0x18d   :  { %v7534_v10 = vpop.f32.mrf.mxu2 }
 0x18e   :  { %v1518_v9 = vadd.f32 %v7534_v10, %v1504_v62  ;;  %v6997_v10 = vld [vmem:[#allocation11 + $0x61c] sm:$0xf0] }
 0x18f   :  { %v1585_v46 = vpop.f32.mrf.mxu0  ;;  %v6108_v42 = vor.u32 %v6997_v10, %v6107_v19  ;;  %v5949_v19 = vld [vmem:[#allocation11 + $0x4e0] sm:$0xf0] }
 0x190   :  { %v1532_v20 = vadd.f32 %v7532_v4, %v1518_v9  ;;  %v6045_v4 = vld [vmem:[#allocation11 + $0x5a0] sm:$0xf0]  ;;  %v5952_v22 = vor.u32 %v6953_v18, %v5949_v19  ;;  %v5667_v18 = vld [vmem:[#allocation11 + $0x288] sm:$0xf] }
 0x191   :  { %3374 = vmatpush.bf16.msra.mxu0 %v6108_v42  ;;  %v6048_v38 = vor.u32 %v6977_v35, %v6045_v4  ;;  %v7017_v10 = vld [vmem:[#allocation11 + $0x6c4] sm:$0xf]  ;;  %v5763_v42 = vld [vmem:[#allocation11 + $0x348] sm:$0xf] }
 0x192   :  { %v6208_v28 = vor.u32 %v7017_v10, %v6205_v23  ;;  %v6945_v35 = vld [vmem:[#allocation11 + $0x484] sm:$0xf]  ;;  %v6886_v19 = vld [vmem:[#allocation11 + $0x2a4] sm:$0xf0] }
 0x193   :  { %3410 = vmatpush.bf16.msrb.mxu2 %v6048_v38  ;;  %v5917_v4 = vld [vmem:[#allocation11 + $0x4a0] sm:$0xf0] }
 0x194   :  { %v5920_v38 = vor.u32 %v6945_v35, %v5917_v4 }
 0x195   :  { %v1571_v47 = vpop.f32.mrf.mxu2  ;;  %3423 = vmatpush.bf16.msrb.mxu0 %v6336_v32  ;;  %v7564_v32 = vld [vmem:[#allocation1 + $0x12] sm:$0xff] }
 0x196   :  { %v1572_v49 = vadd.f32 %v1571_v47, %v1558_v5  ;;  %v6013_v47 = vld [vmem:[#allocation11 + $0x560] sm:$0xf0] }
 0x197   :  { %v1587_v59 = vpop.f32.mrf.mxu0 }
 0x198   :  { %v1586_v6 = vadd.f32 %v1585_v46, %v1572_v49  ;;  %v6969_v46 = vld [vmem:[#allocation11 + $0x544] sm:$0xf] }
 0x199   :  { %3424 = vmatpush.bf16.msrb.mxu0 %v6304_v60  ;;  %v6016_v25 = vor.u32 %v6969_v46, %v6013_v47  ;;  %v6838_v46 = vld [vmem:[#allocation11 + $0x124] sm:$0xf0] }
 0x19a   :  { %v1702_v0 = vpack.c.bf16 %v1586_v6, %v1530_v54  ;;  %v5571_v54 = vld [vmem:[#allocation11 + $0x1c8] sm:$0xf]  ;;  %v7550_v6 = vpop.f32.mrf.mxu3 }
 0x19b   :  { %3411 = vmatpush.bf16.msrb.mxu2 %v6016_v25  ;;  %v5572_v14 = vor.u32 %v6862_v56, %v5571_v54  ;;  %v5731_v47 = vld [vmem:[#allocation11 + $0x308] sm:$0xf]  ;;  %v5885_v25 = vld [vmem:[#allocation11 + $0x460] sm:$0xf0] }
 0x19c   :  { %v1725_v11 = vunpack.c.l.bf16 %v1702_v0  ;;  %v1726_v12 = vunpack.c.h.bf16 %v1702_v0  ;;  %v6961_v0 = vld [vmem:[#allocation11 + $0x504] sm:$0xf] }
 0x19d   :  { %v1573_v15 = vpop.f32.mrf.mxu2  ;;  %3425 = vmatpush.bf16.msrb.mxu0 %v6272_v55 }
 0x19e   :  { %v1737_v51 = vadd.f32 %v1733_v2, %v1725_v11  ;;  %v1738_v16 = vadd.f32 %v1734_v1, %v1726_v12  ;;  %v1574_v17 = vadd.f32 %v1573_v15, %v1560_v3  ;;  %v5828_v15 = vor.u32 %v6926_v58, %v5827_v57 }
 0x19f   :  { %v5732_v58 = vor.u32 %v6902_v48, %v5731_v47  ;;  %v6858_v47 = vld [vmem:[#allocation11 + $0x1cc] sm:$0xf] }
 0x1a0   :  { %v1588_v21 = vadd.f32 %v1587_v59, %v1574_v17  ;;  %v1745_v26 = vpack.c.bf16 %v1738_v16, %v1737_v51  ;;  %v6854_v51 = vld [vmem:[#allocation11 + $0x1a4] sm:$0xf0] }
 0x1a1   :  { %v5795_v16 = vld [vmem:[#allocation11 + $0x388] sm:$0xf]  ;;  %3426 = vmatpush.bf16.msrb.mxu0 %v6240_v13  ;;  %v5540_v29 = vor.u32 %v6854_v51, %v5539_v43 }
 0x1a2   :  { %v1704_v31 = vpack.c.bf16 %v1588_v21, %v1532_v20  ;;  %v1749_v37 = vunpack.c.l.bf16 %v1745_v26  ;;  %v1750_v40 = vunpack.c.h.bf16 %v1745_v26  ;;  %v7558_v20 = vpop.f32.mrf.mxu0  ;;  %v6846_v26 = vld [vmem:[#allocation11 + $0x164] sm:$0xf0]  ;;  %v5796_v30 = vor.u32 %v6918_v61, %v5795_v16 }
 0x1a3   :  { %v5508_v60 = vor.u32 %v6846_v26, %v5507_v24  ;;  %v5411_v51 = vld [vmem:[#allocation11 + $0x88] sm:$0xf] }
 0x1a4   :  { %v1729_v33 = vunpack.c.l.bf16 %v1704_v31  ;;  %v1730_v34 = vunpack.c.h.bf16 %v1704_v31  ;;  %v1757_v49 = vmul.f32 0.010009766, %v1749_v37  ;;  %v1758_v50 = vmul.f32 0.010009766, %v1750_v40  ;;  %v6910_v31 = vld [vmem:[#allocation11 + $0x364] sm:$0xf0] }
 0x1a5   :  { %v7560_v21 = vpop.f32.mrf.mxu2  ;;  %3427 = vmatpush.bf16.msrb.mxu0 %v6208_v28  ;;  %v6822_v61 = vld [vmem:[#allocation11 + $0xa4] sm:$0xf0] }
 0x1a6   :  { %v1741_v41 = vadd.f32 %v1733_v2, %v1729_v33  ;;  %v1742_v5 = vadd.f32 %v1734_v1, %v1730_v34  ;;  %v5981_v2 = vld [vmem:[#allocation11 + $0x520] sm:$0xf0]  ;;  %v7552_v1 = vpop.f32.mrf.mxu1  ;;  %v1777_v3 = vmax.f32 %v1749_v37, %v1757_v49  ;;  %v1778_v9 = vmax.f32 %v1750_v40, %v1758_v50  ;;  %v7566_v33 = vld [vmem:[#allocation1 + $0x1b] sm:$0xff]  ;;  %v7568_v37 = vpop.f32.mrf.mxu3 }
 0x1a7   :  { %v5984_v7 = vor.u32 %v6961_v0, %v5981_v2  ;;  %v3781_v34 = vld [vmem:[#allocation13] sm:$0xff]  ;;  %v6894_v0 = vld [vmem:[#allocation11 + $0x2e4] sm:$0xf0]  ;;  %v1614_v16 = vadd.f32 %v7552_v1, %v7550_v6  ;;  %v5412_v6 = vor.u32 %v6822_v61, %v5411_v51  ;;  %v5668_v1 = vor.u32 %v6886_v19, %v5667_v18  ;;  %v5765_v61 = vld [vmem:[#allocation11 + $0x368] sm:$0xf0] }
 0x1a8   :  { %v1747_v45 = vpack.c.bf16 %v1742_v5, %v1741_v41  ;;  %3783 = vst [vmem:[#allocation1] ss:$9 sm:$0xff] %v3781_v34  ;;  %v6173_v40 = vld [vmem:[#allocation11 + $0x6a0] sm:$0xf0]  ;;  %v5475_v41 = vld [vmem:[#allocation11 + $0x108] sm:$0xf] }
 0x1a9   :  { %3412 = vmatpush.bf16.msrb.mxu2 %v5984_v7  ;;  %v6176_v5 = vor.u32 %v7009_v39, %v6173_v40  ;;  %v6937_v49 = vld [vmem:[#allocation11 + $0x444] sm:$0xf]  ;;  %v5476_v57 = vor.u32 %v6838_v46, %v5475_v41  ;;  %v5379_v28 = vld [vmem:[#allocation11 + $0x48] sm:$0xf] }
 0x1aa   :  { %v1753_v52 = vunpack.c.l.bf16 %v1747_v45  ;;  %v1754_v53 = vunpack.c.h.bf16 %v1747_v45  ;;  %v5764_v45 = vor.u32 %v6910_v31, %v5763_v42  ;;  %v5888_v50 = vor.u32 %v6937_v49, %v5885_v25  ;;  %v7572_v55 = vpop.f32.mrf.mxu0  ;;  %v6929_v2 = vld [vmem:[#allocation11 + $0x404] sm:$0xf]  ;;  %v5635_v31 = vld [vmem:[#allocation11 + $0x248] sm:$0xf]  ;;  %v6922_v49 = vld [vmem:[#allocation11 + $0x3cc] sm:$0xf] }
 0x1ab   :  { %3428 = vmatpush.bf16.msrb.mxu0 %v6176_v5  ;;  %v6993_v7 = vld [vmem:[#allocation11 + $0x604] sm:$0xf]  ;;  %v6806_v39 = vld [vmem:[#allocation11 + $0x24] sm:$0xf0]  ;;  %v5829_v25 = vld [vmem:[#allocation11 + $0x3e8] sm:$0xf0] }
 0x1ac   :  { %v1761_v62 = vmul.f32 0.010009766, %v1753_v52  ;;  %v1762_v63 = vmul.f32 0.010009766, %v1754_v53  ;;  %v5603_v40 = vld [vmem:[#allocation11 + $0x208] sm:$0xf] }
 0x1ad   :  { %3413 = vmatpush.bf16.msrb.mxu2 %v5952_v22  ;;  %v7574_v56 = vpop.f32.mrf.mxu2  ;;  %v1628_v22 = vadd.f32 %v7560_v21, %v1614_v16  ;;  %v6878_v21 = vld [vmem:[#allocation11 + $0x264] sm:$0xf0] }
 0x1ae   :  { %v1781_v11 = vmax.f32 %v1753_v52, %v1761_v62  ;;  %v1782_v12 = vmax.f32 %v1754_v53, %v1762_v63  ;;  %v7570_v44 = vpop.f32.mrf.mxu1  ;;  %v6141_v52 = vld [vmem:[#allocation11 + $0x660] sm:$0xf0]  ;;  %v5443_v53 = vld [vmem:[#allocation11 + $0xc8] sm:$0xf]  ;;  %v1655_v8 = vpop.f32.mrf.mxu3  ;;  %v5636_v4 = vor.u32 %v6878_v21, %v5635_v31 }
 0x1af   :  { %v6144_v54 = vor.u32 %v7001_v27, %v6141_v52  ;;  %v6830_v62 = vld [vmem:[#allocation11 + $0xe4] sm:$0xf0]  ;;  %v1616_v41 = vadd.f32 %v7570_v44, %v7568_v37 }
 0x1b0   :  { %v7554_v17 = vpack.c.bf16 %v1781_v11, %v1777_v3  ;;  %v7556_v59 = vpack.c.bf16 %v1782_v12, %v1778_v9  ;;  %v5699_v63 = vld [vmem:[#allocation11 + $0x2c8] sm:$0xf]  ;;  %v5853_v3 = vld [vmem:[#allocation11 + $0x420] sm:$0xf0]  ;;  %v5444_v11 = vor.u32 %v6830_v62, %v5443_v53 }
 0x1b1   :  { %3414 = vmatpush.bf16.msrb.mxu2 %v5920_v38  ;;  %3429 = vmatpush.bf16.msrb.mxu0 %v6144_v54  ;;  %v5856_v36 = vor.u32 %v6929_v2, %v5853_v3  ;;  %v6109_v9 = vld [vmem:[#allocation11 + $0x620] sm:$0xf0]  ;;  %v5700_v43 = vor.u32 %v6894_v0, %v5699_v63  ;;  %v5347_v38 = vld [vmem:[#allocation11 + $0x8] sm:$0xf]  ;;  %v1630_v27 = vadd.f32 %v7574_v56, %v1616_v41  ;;  %v6850_v3 = vld [vmem:[#allocation11 + $0x18c] sm:$0xf] }
 0x1b2   :  { %3333 = vmatmul.bf16.vlgmr.msra.gmra.mxu3 %v7554_v17  ;;  %3347 = vmatmul.bf16.vlgmr.msra.gmra.mxu1 %v7556_v59  ;;  %v6112_v12 = vor.u32 %v6993_v7, %v6109_v9  ;;  %v6870_v46 = vld [vmem:[#allocation11 + $0x224] sm:$0xf0]  ;;  %v5348_v37 = vor.u32 %v6806_v39, %v5347_v38  ;;  %v5832_v0 = vor.u32 %v6922_v49, %v5829_v25  ;;  %v5541_v7 = vld [vmem:[#allocation11 + $0x1a8] sm:$0xf0] }
 0x1b3   :  { %3437 = vmatpush.bf16.msra.mxu3 %v5572_v14  ;;  %3451 = vmatpush.bf16.msra.mxu1 %v5828_v15  ;;  %v1719_v14 = vpack.i.b16 %v7564_v32, %v7564_v32  ;;  %v1722_v15 = vpack.i.b16 %v7566_v33, %v7566_v33  ;;  %v1642_v32 = vadd.f32 %v7558_v20, %v1628_v22  ;;  %v5573_v20 = vld [vmem:[#allocation11 + $0x1e8] sm:$0xf0] }
 0x1b4   :  { %v5604_v44 = vor.u32 %v6870_v46, %v5603_v40  ;;  %v6914_v56 = vld [vmem:[#allocation11 + $0x38c] sm:$0xf]  ;;  %v7054_v40 = vld [vmem:[#allocation11 + $0x7e4] sm:$0xf0] }
 0x1b5   :  { %3415 = vmatpush.bf16.msrb.mxu2 %v5888_v50  ;;  %3430 = vmatpush.bf16.msrb.mxu0 %v6112_v12  ;;  %v7585_v26 = vperm.slane %v1719_v14, 0  ;;  %v7587_v42 = vperm.slane %v1722_v15, 0  ;;  %v5797_v9 = vld [vmem:[#allocation11 + $0x3a8] sm:$0xf0] }
 0x1b6   :  { %v1669_v13 = vpop.f32.mrf.mxu1  ;;  %v1657_v34 = vpop.f32.mrf.mxu3  ;;  %v6842_v14 = vld [vmem:[#allocation11 + $0x14c] sm:$0xf] }
 0x1b7   :  { %3438 = vmatpush.bf16.msra.mxu3 %v5540_v29  ;;  %3452 = vmatpush.bf16.msra.mxu1 %v5796_v30  ;;  %v1670_v10 = vadd.f32 %v1669_v13, %v1655_v8  ;;  %v6814_v30 = vld [vmem:[#allocation11 + $0x64] sm:$0xf0]  ;;  %v1644_v8 = vadd.f32 %v7572_v55, %v1630_v27  ;;  %v5544_v13 = vor.u32 %v6850_v3, %v5541_v7  ;;  %v5509_v15 = vld [vmem:[#allocation11 + $0x168] sm:$0xf0] }
 0x1b8   :  { %v5380_v35 = vor.u32 %v6814_v30, %v5379_v28  ;;  %v6906_v55 = vld [vmem:[#allocation11 + $0x34c] sm:$0xf]  ;;  %v5512_v18 = vor.u32 %v6842_v14, %v5509_v15  ;;  %v6051_v27 = vld [vmem:[#allocation11 + $0x588] sm:$0xf] }
 0x1b9   :  { %3416 = vmatpush.bf16.msrb.mxu2 %v5856_v36  ;;  %v5733_v28 = vld [vmem:[#allocation11 + $0x328] sm:$0xf0]  ;;  %v6019_v7 = vld [vmem:[#allocation11 + $0x548] sm:$0xf] }
 0x1ba   :  { %v6826_v41 = vld [vmem:[#allocation11 + $0xcc] sm:$0xf] }
 0x1bb   :  { %3439 = vmatpush.bf16.msra.mxu3 %v5508_v60  ;;  %3453 = vmatpush.bf16.msra.mxu1 %v5764_v45  ;;  %v1735_v60 = vunpack.c.l.bf16 %v7585_v26  ;;  %v1736_v45 = vunpack.c.l.bf16 %v7587_v42  ;;  %v5477_v26 = vld [vmem:[#allocation11 + $0x128] sm:$0xf0]  ;;  %v5768_v42 = vor.u32 %v6906_v55, %v5765_v61  ;;  %v6966_v55 = vld [vmem:[#allocation11 + $0x524] sm:$0xf0] }
 0x1bc   :  { %v6874_v14 = vld [vmem:[#allocation11 + $0x24c] sm:$0xf]  ;;  %v6243_v61 = vld [vmem:[#allocation11 + $0x708] sm:$0xf] }
 0x1bd   :  { %v5637_v15 = vld [vmem:[#allocation11 + $0x268] sm:$0xf0] }
 0x1be   :  { %v1671_v48 = vpop.f32.mrf.mxu1 }
 0x1bf   :  { %3440 = vmatpush.bf16.msra.mxu3 %v5476_v57  ;;  %3454 = vmatpush.bf16.msra.mxu1 %v5732_v58  ;;  %v1672_v50 = vadd.f32 %v1671_v48, %v1657_v34  ;;  %v5576_v57 = vor.u32 %v6858_v47, %v5573_v20  ;;  %v6083_v34 = vld [vmem:[#allocation11 + $0x5c8] sm:$0xf] }
 0x1c0   :  { %v1697_v23 = vpop.f32.mrf.mxu0 }
 0x1c2   :  { %3389 = vmatmul.bf16.vlgmr.msrb.gmra.mxu3 %v7554_v17  ;;  %3403 = vmatmul.bf16.vlgmr.msrb.gmra.mxu1 %v7556_v59 }
 0x1c3   :  { %3441 = vmatpush.bf16.msra.mxu3 %v5444_v11  ;;  %3455 = vmatpush.bf16.msra.mxu1 %v5700_v43  ;;  %v5800_v43 = vor.u32 %v6914_v56, %v5797_v9  ;;  %v6275_v9 = vld [vmem:[#allocation11 + $0x748] sm:$0xf] }
 0x1c6   :  { %v1683_v24 = vpop.f32.mrf.mxu2 }
 0x1c7   :  { %v1684_v29 = vadd.f32 %v1683_v24, %v1670_v10  ;;  %3442 = vmatpush.bf16.msra.mxu3 %v5412_v6  ;;  %3456 = vmatpush.bf16.msra.mxu1 %v5668_v1  ;;  %v6834_v24 = vld [vmem:[#allocation11 + $0x10c] sm:$0xf] }
 0x1c8   :  { %v1699_v2 = vpop.f32.mrf.mxu0  ;;  %v6898_v1 = vld [vmem:[#allocation11 + $0x30c] sm:$0xf] }
 0x1c9   :  { %v1698_v33 = vadd.f32 %v1697_v23, %v1684_v29  ;;  %v5480_v29 = vor.u32 %v6834_v24, %v5477_v26  ;;  %v6866_v24 = vld [vmem:[#allocation11 + $0x20c] sm:$0xf] }
 0x1ca   :  { %v5605_v26 = vld [vmem:[#allocation11 + $0x228] sm:$0xf0] }
 0x1cb   :  { %v1703_v5 = vpack.c.bf16 %v1698_v33, %v1642_v32  ;;  %3443 = vmatpush.bf16.msra.mxu3 %v5380_v35  ;;  %3457 = vmatpush.bf16.msra.mxu1 %v5636_v4  ;;  %v5736_v33 = vor.u32 %v6898_v1, %v5733_v28  ;;  %v6990_v35 = vld [vmem:[#allocation11 + $0x5e4] sm:$0xf0]  ;;  %v5835_v1 = vld [vmem:[#allocation11 + $0x3d0] sm:$0xf] }
 0x1cc   :  { %v6339_v4 = vld [vmem:[#allocation11 + $0x7c8] sm:$0xf]  ;;  %v6084_v49 = vor.u32 %v6990_v35, %v6083_v34  ;;  %v6927_v28 = vld [vmem:[#allocation11 + $0x3ec] sm:$0xf0] }
 0x1cd   :  { %v1727_v52 = vunpack.c.l.bf16 %v1703_v5  ;;  %v1728_v53 = vunpack.c.h.bf16 %v1703_v5  ;;  %v5445_v5 = vld [vmem:[#allocation11 + $0xe8] sm:$0xf0]  ;;  %v6340_v25 = vor.u32 %v7054_v40, %v6339_v4  ;;  %v6211_v34 = vld [vmem:[#allocation11 + $0x6c8] sm:$0xf]  ;;  %v6855_v40 = vld [vmem:[#allocation11 + $0x1ac] sm:$0xf0] }
 0x1ce   :  { %v1685_v54 = vpop.f32.mrf.mxu2  ;;  %v7022_v35 = vld [vmem:[#allocation11 + $0x6e4] sm:$0xf0] }
 0x1cf   :  { %v1739_v58 = vadd.f32 %v1735_v60, %v1727_v52  ;;  %v1740_v62 = vadd.f32 %v1736_v45, %v1728_v53  ;;  %v1686_v63 = vadd.f32 %v1685_v54, %v1672_v50  ;;  %3444 = vmatpush.bf16.msra.mxu3 %v5348_v37  ;;  %3458 = vmatpush.bf16.msra.mxu1 %v5604_v44  ;;  %v6982_v50 = vld [vmem:[#allocation11 + $0x5a4] sm:$0xf0] }
 0x1d0   :  { %v5448_v54 = vor.u32 %v6826_v41, %v5445_v5  ;;  %v6307_v44 = vld [vmem:[#allocation11 + $0x788] sm:$0xf]  ;;  %v5803_v41 = vld [vmem:[#allocation11 + $0x390] sm:$0xf] }
 0x1d1   :  { %v1700_v36 = vadd.f32 %v1699_v2, %v1686_v63  ;;  %v1746_v11 = vpack.c.bf16 %v1740_v62, %v1739_v58  ;;  %v6818_v58 = vld [vmem:[#allocation11 + $0x8c] sm:$0xf]  ;;  %v6052_v2 = vor.u32 %v6982_v50, %v6051_v27  ;;  %v6919_v5 = vld [vmem:[#allocation11 + $0x3ac] sm:$0xf0] }
 0x1d2   :  { %3445 = vmatmul.bf16.vlgmr.msra.gmra.mxu3 %v7554_v17  ;;  %3459 = vmatmul.bf16.vlgmr.msra.gmra.mxu1 %v7556_v59  ;;  %v5413_v62 = vld [vmem:[#allocation11 + $0xa8] sm:$0xf0]  ;;  %v5515_v27 = vld [vmem:[#allocation11 + $0x150] sm:$0xf] }
 0x1d3   :  { %v1705_v12 = vpack.c.bf16 %v1700_v36, %v1644_v8  ;;  %3493 = vmatpush.bf16.msrb.mxu3 %v5576_v57  ;;  %3507 = vmatpush.bf16.msrb.mxu1 %v5832_v0  ;;  %v1751_v19 = vunpack.c.l.bf16 %v1746_v11  ;;  %v1752_v22 = vunpack.c.h.bf16 %v1746_v11  ;;  %v7046_v57 = vld [vmem:[#allocation11 + $0x7a4] sm:$0xf0]  ;;  %v6882_v63 = vld [vmem:[#allocation11 + $0x28c] sm:$0xf]  ;;  %v5416_v36 = vor.u32 %v6818_v58, %v5413_v62  ;;  %v6847_v50 = vld [vmem:[#allocation11 + $0x16c] sm:$0xf0] }
 0x1d4   :  { %v5669_v0 = vld [vmem:[#allocation11 + $0x2a8] sm:$0xf0]  ;;  %v6308_v3 = vor.u32 %v7046_v57, %v6307_v44  ;;  %v6974_v8 = vld [vmem:[#allocation11 + $0x564] sm:$0xf0] }
 0x1d5   :  { %v1731_v51 = vunpack.c.l.bf16 %v1705_v12  ;;  %v1732_v16 = vunpack.c.h.bf16 %v1705_v12  ;;  %v1759_v30 = vmul.f32 0.010009766, %v1751_v19  ;;  %v1760_v31 = vmul.f32 0.010009766, %v1752_v22  ;;  %v7038_v11 = vld [vmem:[#allocation11 + $0x764] sm:$0xf0]  ;;  %v6810_v12 = vld [vmem:[#allocation11 + $0x4c] sm:$0xf] }
 0x1d6   :  { %v5672_v56 = vor.u32 %v6882_v63, %v5669_v0  ;;  %v5891_v58 = vld [vmem:[#allocation11 + $0x448] sm:$0xf] }
 0x1d7   :  { %v1743_v10 = vadd.f32 %v1735_v60, %v1731_v51  ;;  %v1744_v23 = vadd.f32 %v1736_v45, %v1732_v16  ;;  %3494 = vmatpush.bf16.msrb.mxu3 %v5544_v13  ;;  %3508 = vmatpush.bf16.msrb.mxu1 %v5800_v43  ;;  %v6890_v60 = vld [vmem:[#allocation11 + $0x2cc] sm:$0xf]  ;;  %v1779_v46 = vmax.f32 %v1751_v19, %v1759_v30  ;;  %v5987_v16 = vld [vmem:[#allocation11 + $0x508] sm:$0xf] }
 0x1d8   :  { %v5701_v45 = vld [vmem:[#allocation11 + $0x2e8] sm:$0xf0]  ;;  %v1780_v47 = vmax.f32 %v1752_v22, %v1760_v31  ;;  %v6020_v43 = vor.u32 %v6974_v8, %v6019_v7  ;;  %v6276_v51 = vor.u32 %v7038_v11, %v6275_v9  ;;  %v5640_v19 = vor.u32 %v6874_v14, %v5637_v15  ;;  %v7030_v22 = vld [vmem:[#allocation11 + $0x724] sm:$0xf0]  ;;  %v5483_v7 = vld [vmem:[#allocation11 + $0x110] sm:$0xf] }
 0x1d9   :  { %v1748_v6 = vpack.c.bf16 %v1744_v23, %v1743_v10  ;;  %v5704_v37 = vor.u32 %v6890_v60, %v5701_v45  ;;  %v5381_v13 = vld [vmem:[#allocation11 + $0x68] sm:$0xf0]  ;;  %v6244_v30 = vor.u32 %v7030_v22, %v6243_v61  ;;  %v5955_v31 = vld [vmem:[#allocation11 + $0x4c8] sm:$0xf]  ;;  %v6212_v45 = vor.u32 %v7022_v35, %v6211_v34  ;;  %v6839_v8 = vld [vmem:[#allocation11 + $0x12c] sm:$0xf0] }
 0x1da   :  { %v6802_v10 = vld [vmem:[#allocation11 + $0xc] sm:$0xf]  ;;  %v6942_v62 = vld [vmem:[#allocation11 + $0x464] sm:$0xf0]  ;;  %v6831_v22 = vld [vmem:[#allocation11 + $0xec] sm:$0xf0] }
 0x1db   :  { %v1755_v21 = vunpack.c.l.bf16 %v1748_v6  ;;  %v1756_v32 = vunpack.c.h.bf16 %v1748_v6  ;;  %3495 = vmatpush.bf16.msrb.mxu3 %v5512_v18  ;;  %3509 = vmatpush.bf16.msrb.mxu1 %v5768_v42  ;;  %v5384_v18 = vor.u32 %v6810_v12, %v5381_v13  ;;  %v5349_v23 = vld [vmem:[#allocation11 + $0x28] sm:$0xf0]  ;;  %v5579_v42 = vld [vmem:[#allocation11 + $0x1d0] sm:$0xf]  ;;  %v6147_v63 = vld [vmem:[#allocation11 + $0x648] sm:$0xf]  ;;  %v5892_v9 = vor.u32 %v6942_v62, %v5891_v58 }
 0x1dc   :  { %v6863_v6 = vld [vmem:[#allocation11 + $0x1ec] sm:$0xf0]  ;;  %v7006_v0 = vld [vmem:[#allocation11 + $0x664] sm:$0xf0]  ;;  %v7050_v61 = vld [vmem:[#allocation11 + $0x7cc] sm:$0xf] }
 0x1dd   :  { %v1763_v38 = vmul.f32 0.010009766, %v1755_v21  ;;  %v1764_v39 = vmul.f32 0.010009766, %v1756_v32  ;;  %v5580_v4 = vor.u32 %v6863_v6, %v5579_v42  ;;  %v6148_v11 = vor.u32 %v7006_v0, %v6147_v63  ;;  %v5859_v12 = vld [vmem:[#allocation11 + $0x408] sm:$0xf]  ;;  %v5675_v34 = vld [vmem:[#allocation11 + $0x290] sm:$0xf] }
 0x1de   :  { %v6934_v13 = vld [vmem:[#allocation11 + $0x424] sm:$0xf0]  ;;  %v6887_v35 = vld [vmem:[#allocation11 + $0x2ac] sm:$0xf0] }
 0x1df   :  { %v1783_v20 = vmax.f32 %v1755_v21, %v1763_v38  ;;  %v1784_v48 = vmax.f32 %v1756_v32, %v1764_v39  ;;  %3496 = vmatpush.bf16.msrb.mxu3 %v5480_v29  ;;  %3510 = vmatpush.bf16.msrb.mxu1 %v5736_v33  ;;  %v5988_v29 = vor.u32 %v6966_v55, %v5987_v16  ;;  %v6958_v33 = vld [vmem:[#allocation11 + $0x4e4] sm:$0xf0]  ;;  %v5547_v39 = vld [vmem:[#allocation11 + $0x190] sm:$0xf] }
 0x1e0   :  { %v5352_v21 = vor.u32 %v6802_v10, %v5349_v23  ;;  %v5608_v32 = vor.u32 %v6866_v24, %v5605_v26  ;;  %v5836_v38 = vor.u32 %v6927_v28, %v5835_v1  ;;  %v5956_v60 = vor.u32 %v6958_v33, %v5955_v31  ;;  %v6115_v14 = vld [vmem:[#allocation11 + $0x608] sm:$0xf]  ;;  %v5707_v10 = vld [vmem:[#allocation11 + $0x2d0] sm:$0xf]  ;;  %v6978_v1 = vld [vmem:[#allocation11 + $0x58c] sm:$0xf] }
 0x1e1   :  { %v7598_v52 = vpack.c.bf16 %v1783_v20, %v1779_v46  ;;  %v7600_v53 = vpack.c.bf16 %v1784_v48, %v1780_v47  ;;  %v5923_v46 = vld [vmem:[#allocation11 + $0x488] sm:$0xf]  ;;  %v5484_v16 = vor.u32 %v6839_v8, %v5483_v7  ;;  %v6895_v23 = vld [vmem:[#allocation11 + $0x2ec] sm:$0xf0]  ;;  %v5860_v24 = vor.u32 %v6934_v13, %v5859_v12  ;;  %v6053_v28 = vld [vmem:[#allocation11 + $0x5a8] sm:$0xf0] }
 0x1e2   :  { %v6950_v47 = vld [vmem:[#allocation11 + $0x4a4] sm:$0xf0]  ;;  %v7042_v31 = vld [vmem:[#allocation11 + $0x78c] sm:$0xf]  ;;  %v6823_v33 = vld [vmem:[#allocation11 + $0xac] sm:$0xf0] }
 0x1e3   :  { %3361 = vmatmul.bf16.vlgmr.msra.gmra.mxu2 %v7598_v52  ;;  %3375 = vmatmul.bf16.vlgmr.msra.gmra.mxu0 %v7600_v53  ;;  %v6179_v20 = vld [vmem:[#allocation11 + $0x688] sm:$0xf]  ;;  %v5924_v44 = vor.u32 %v6950_v47, %v5923_v46  ;;  %v5387_v46 = vld [vmem:[#allocation11 + $0x50] sm:$0xf]  ;;  %v6923_v7 = vld [vmem:[#allocation11 + $0x3d4] sm:$0xf] }
 0x1e4   :  { %3465 = vmatpush.bf16.msra.mxu2 %v6084_v49  ;;  %3479 = vmatpush.bf16.msra.mxu0 %v6340_v25  ;;  %v7014_v48 = vld [vmem:[#allocation11 + $0x6a4] sm:$0xf0]  ;;  %v5548_v49 = vor.u32 %v6855_v40, %v5547_v39  ;;  %v5804_v25 = vor.u32 %v6919_v5, %v5803_v41  ;;  %v6970_v39 = vld [vmem:[#allocation11 + $0x54c] sm:$0xf]  ;;  %v5676_v5 = vor.u32 %v6887_v35, %v5675_v34  ;;  %v6815_v47 = vld [vmem:[#allocation11 + $0x6c] sm:$0xf0] }
 0x1e5   :  { %3497 = vmatpush.bf16.msrb.mxu3 %v5448_v54  ;;  %3511 = vmatpush.bf16.msrb.mxu1 %v5704_v37  ;;  %v5771_v54 = vld [vmem:[#allocation11 + $0x350] sm:$0xf]  ;;  %v6180_v57 = vor.u32 %v7014_v48, %v6179_v20  ;;  %v6998_v15 = vld [vmem:[#allocation11 + $0x624] sm:$0xf0]  ;;  %v6021_v40 = vld [vmem:[#allocation11 + $0x568] sm:$0xf0] }
 0x1e6   :  { %v6911_v37 = vld [vmem:[#allocation11 + $0x36c] sm:$0xf0]  ;;  %v6116_v26 = vor.u32 %v6998_v15, %v6115_v14  ;;  %v5837_v8 = vld [vmem:[#allocation11 + $0x3f0] sm:$0xf0]  ;;  %v5957_v13 = vld [vmem:[#allocation11 + $0x4e8] sm:$0xf0] }
 0x1e7   :  { %v5643_v20 = vld [vmem:[#allocation11 + $0x250] sm:$0xf]  ;;  %v7018_v14 = vld [vmem:[#allocation11 + $0x6cc] sm:$0xf] }
 0x1e8   :  { %3466 = vmatpush.bf16.msra.mxu2 %v6052_v2  ;;  %3480 = vmatpush.bf16.msra.mxu0 %v6308_v3  ;;  %v5516_v2 = vor.u32 %v6847_v50, %v5515_v27  ;;  %v5772_v3 = vor.u32 %v6911_v37, %v5771_v54  ;;  %v6879_v48 = vld [vmem:[#allocation11 + $0x26c] sm:$0xf0]  ;;  %v6962_v27 = vld [vmem:[#allocation11 + $0x50c] sm:$0xf]  ;;  %v5388_v37 = vor.u32 %v6815_v47, %v5387_v46 }
 0x1e9   :  { %3498 = vmatpush.bf16.msrb.mxu3 %v5416_v36  ;;  %3512 = vmatpush.bf16.msrb.mxu1 %v5672_v56  ;;  %v5739_v36 = vld [vmem:[#allocation11 + $0x310] sm:$0xf]  ;;  %v5989_v50 = vld [vmem:[#allocation11 + $0x528] sm:$0xf0] }
 0x1ea   :  { %v6903_v56 = vld [vmem:[#allocation11 + $0x32c] sm:$0xf0]  ;;  %v7026_v54 = vld [vmem:[#allocation11 + $0x70c] sm:$0xf] }
 0x1eb   :  { %v5740_v55 = vor.u32 %v6903_v56, %v5739_v36  ;;  %v5355_v58 = vld [vmem:[#allocation11 + $0x10] sm:$0xf]  ;;  %v5992_v36 = vor.u32 %v6962_v27, %v5989_v50  ;;  %v6213_v15 = vld [vmem:[#allocation11 + $0x6e8] sm:$0xf0] }
 0x1ec   :  { %3467 = vmatpush.bf16.msra.mxu2 %v6020_v43  ;;  %3481 = vmatpush.bf16.msra.mxu0 %v6276_v51  ;;  %v6986_v43 = vld [vmem:[#allocation11 + $0x5cc] sm:$0xf]  ;;  %v6807_v62 = vld [vmem:[#allocation11 + $0x2c] sm:$0xf0] }
 0x1ed   :  { %3499 = vmatpush.bf16.msrb.mxu3 %v5384_v18  ;;  %3513 = vmatpush.bf16.msrb.mxu1 %v5640_v19  ;;  %v6085_v51 = vld [vmem:[#allocation11 + $0x5e8] sm:$0xf0]  ;;  %v5451_v19 = vld [vmem:[#allocation11 + $0xd0] sm:$0xf] }
 0x1ee   :  { %v6341_v18 = vld [vmem:[#allocation11 + $0x7e8] sm:$0xf0]  ;;  %v6088_v42 = vor.u32 %v6986_v43, %v6085_v51  ;;  %v5611_v63 = vld [vmem:[#allocation11 + $0x210] sm:$0xf]  ;;  %v5840_v51 = vor.u32 %v6923_v7, %v5837_v8 }
 0x1ef   :  { %v6344_v6 = vor.u32 %v7050_v61, %v6341_v18  ;;  %v6871_v0 = vld [vmem:[#allocation11 + $0x22c] sm:$0xf0]  ;;  %v6915_v61 = vld [vmem:[#allocation11 + $0x394] sm:$0xf]  ;;  %v7002_v34 = vld [vmem:[#allocation11 + $0x64c] sm:$0xf] }
 0x1f0   :  { %3468 = vmatpush.bf16.msra.mxu2 %v5988_v29  ;;  %3482 = vmatpush.bf16.msra.mxu0 %v6244_v30  ;;  %v5452_v29 = vor.u32 %v6831_v22, %v5451_v19  ;;  %v5708_v30 = vor.u32 %v6895_v23, %v5707_v10  ;;  %v5612_v12 = vor.u32 %v6871_v0, %v5611_v63  ;;  %v5805_v18 = vld [vmem:[#allocation11 + $0x3b0] sm:$0xf0]  ;;  %v6946_v10 = vld [vmem:[#allocation11 + $0x48c] sm:$0xf]  ;;  %v6059_v7 = vld [vmem:[#allocation11 + $0x590] sm:$0xf] }
 0x1f1   :  { %3500 = vmatpush.bf16.msrb.mxu3 %v5352_v21  ;;  %3514 = vmatpush.bf16.msrb.mxu1 %v5608_v32  ;;  %v6309_v21 = vld [vmem:[#allocation11 + $0x7a8] sm:$0xf0]  ;;  %v5419_v32 = vld [vmem:[#allocation11 + $0x90] sm:$0xf]  ;;  %v6216_v22 = vor.u32 %v7018_v14, %v6213_v15  ;;  %v6883_v14 = vld [vmem:[#allocation11 + $0x294] sm:$0xf] }
 0x1f2   :  { %v5420_v41 = vor.u32 %v6823_v33, %v5419_v32  ;;  %v5925_v23 = vld [vmem:[#allocation11 + $0x4a8] sm:$0xf0]  ;;  %v6983_v8 = vld [vmem:[#allocation11 + $0x5ac] sm:$0xf0]  ;;  %v5677_v15 = vld [vmem:[#allocation11 + $0x2b0] sm:$0xf0] }
 0x1f3   :  { %3417 = vmatmul.bf16.vlgmr.msrb.gmra.mxu2 %v7598_v52  ;;  %3431 = vmatmul.bf16.vlgmr.msrb.gmra.mxu0 %v7600_v53  ;;  %v6938_v32 = vld [vmem:[#allocation11 + $0x44c] sm:$0xf] }
 0x1f4   :  { %3469 = vmatpush.bf16.msra.mxu2 %v5956_v60  ;;  %3483 = vmatpush.bf16.msra.mxu0 %v6212_v45  ;;  %v7034_v60 = vld [vmem:[#allocation11 + $0x74c] sm:$0xf] }
 0x1f5   :  { %3549 = vmatpush.bf16.msra.mxu3 %v5580_v4  ;;  %3563 = vmatpush.bf16.msra.mxu1 %v5836_v38  ;;  %v6056_v4 = vor.u32 %v6978_v1, %v6053_v28  ;;  %v6312_v38 = vor.u32 %v7042_v31, %v6309_v21  ;;  %v6277_v45 = vld [vmem:[#allocation11 + $0x768] sm:$0xf0]  ;;  %v6843_v1 = vld [vmem:[#allocation11 + $0x154] sm:$0xf]  ;;  %v5928_v31 = vor.u32 %v6946_v10, %v5925_v23 }
 0x1f6   :  { %3501 = vmatmul.bf16.vlgmr.msrb.gmra.mxu3 %v7554_v17  ;;  %3515 = vmatmul.bf16.vlgmr.msrb.gmra.mxu1 %v7556_v59  ;;  %v5517_v28 = vld [vmem:[#allocation11 + $0x170] sm:$0xf0]  ;;  %v5893_v33 = vld [vmem:[#allocation11 + $0x468] sm:$0xf0] }
 0x1f7   :  { %v6149_v35 = vld [vmem:[#allocation11 + $0x668] sm:$0xf0]  ;;  %v6811_v10 = vld [vmem:[#allocation11 + $0x54] sm:$0xf] }
 0x1f8   :  { %3470 = vmatpush.bf16.msra.mxu2 %v5924_v44  ;;  %3484 = vmatpush.bf16.msra.mxu0 %v6180_v57  ;;  %v5644_v44 = vor.u32 %v6879_v48, %v5643_v20  ;;  %v6245_v57 = vld [vmem:[#allocation11 + $0x728] sm:$0xf0]  ;;  %v5389_v23 = vld [vmem:[#allocation11 + $0x70] sm:$0xf0] }
 0x1f9   :  { %3550 = vmatpush.bf16.msra.mxu3 %v5548_v49  ;;  %3564 = vmatpush.bf16.msra.mxu1 %v5804_v25  ;;  %v6024_v49 = vor.u32 %v6970_v39, %v6021_v40  ;;  %v6280_v25 = vor.u32 %v7034_v60, %v6277_v45  ;;  %v6248_v56 = vor.u32 %v7026_v54, %v6245_v57  ;;  %v6835_v39 = vld [vmem:[#allocation11 + $0x114] sm:$0xf]  ;;  %v6930_v46 = vld [vmem:[#allocation11 + $0x40c] sm:$0xf]  ;;  %v6347_v54 = vld [vmem:[#allocation11 + $0x7d0] sm:$0xf] }
 0x1fa   :  { %v5485_v40 = vld [vmem:[#allocation11 + $0x130] sm:$0xf0]  ;;  %v5896_v60 = vor.u32 %v6938_v32, %v5893_v33  ;;  %v6152_v45 = vor.u32 %v7002_v34, %v6149_v35  ;;  %v5861_v47 = vld [vmem:[#allocation11 + $0x428] sm:$0xf0] }
 0x1fb   :  { %v6994_v20 = vld [vmem:[#allocation11 + $0x60c] sm:$0xf]  ;;  %v5488_v27 = vor.u32 %v6835_v39, %v5485_v40  ;;  %v5453_v57 = vld [vmem:[#allocation11 + $0xf0] sm:$0xf0]  ;;  %v5864_v63 = vor.u32 %v6930_v46, %v5861_v47  ;;  %v5843_v39 = vld [vmem:[#allocation11 + $0x3d8] sm:$0xf] }
 0x1fc   :  { %3471 = vmatpush.bf16.msra.mxu2 %v5892_v9  ;;  %3485 = vmatpush.bf16.msra.mxu0 %v6148_v11  ;;  %v6954_v9 = vld [vmem:[#allocation11 + $0x4cc] sm:$0xf]  ;;  %v5356_v11 = vor.u32 %v6807_v62, %v5355_v58  ;;  %v6891_v58 = vld [vmem:[#allocation11 + $0x2d4] sm:$0xf]  ;;  %v6928_v40 = vld [vmem:[#allocation11 + $0x3f4] sm:$0xf0] }
 0x1fd   :  { %3551 = vmatpush.bf16.msra.mxu3 %v5516_v2  ;;  %3565 = vmatpush.bf16.msra.mxu1 %v5772_v3  ;;  %v6859_v2 = vld [vmem:[#allocation11 + $0x1d4] sm:$0xf]  ;;  %v5960_v19 = vor.u32 %v6954_v9, %v5957_v13  ;;  %v6117_v48 = vld [vmem:[#allocation11 + $0x628] sm:$0xf0]  ;;  %v6315_v9 = vld [vmem:[#allocation11 + $0x790] sm:$0xf] }
 0x1fe   :  { %v5581_v3 = vld [vmem:[#allocation11 + $0x1f0] sm:$0xf0]  ;;  %v6120_v0 = vor.u32 %v6994_v20, %v6117_v48  ;;  %v6959_v47 = vld [vmem:[#allocation11 + $0x4ec] sm:$0xf0] }
 0x1ff   :  { %v5584_v43 = vor.u32 %v6859_v2, %v5581_v3  ;;  %v5709_v62 = vld [vmem:[#allocation11 + $0x2f0] sm:$0xf0]  ;;  %v6219_v20 = vld [vmem:[#allocation11 + $0x6d0] sm:$0xf] }
 0x200   :  { %3472 = vmatpush.bf16.msra.mxu2 %v5860_v24  ;;  %3486 = vmatpush.bf16.msra.mxu0 %v6116_v26  ;;  %v7010_v24 = vld [vmem:[#allocation11 + $0x68c] sm:$0xf]  ;;  %v5421_v13 = vld [vmem:[#allocation11 + $0xb0] sm:$0xf0]  ;;  %v7023_v48 = vld [vmem:[#allocation11 + $0x6ec] sm:$0xf0] }
 0x201   :  { %3552 = vmatpush.bf16.msra.mxu3 %v5484_v16  ;;  %3566 = vmatpush.bf16.msra.mxu1 %v5740_v55  ;;  %v6851_v16 = vld [vmem:[#allocation11 + $0x194] sm:$0xf]  ;;  %v6181_v26 = vld [vmem:[#allocation11 + $0x6a8] sm:$0xf0] }
 0x202   :  { %v5549_v55 = vld [vmem:[#allocation11 + $0x1b0] sm:$0xf0]  ;;  %v6184_v21 = vor.u32 %v7010_v24, %v6181_v26 }
 0x203   :  { %3473 = vmatmul.bf16.vlgmr.msra.gmra.mxu2 %v7598_v52  ;;  %3487 = vmatmul.bf16.vlgmr.msra.gmra.mxu0 %v7600_v53  ;;  %v6875_v24 = vld [vmem:[#allocation11 + $0x254] sm:$0xf] }
 0x204   :  { %3521 = vmatpush.bf16.msrb.mxu2 %v6088_v42  ;;  %3535 = vmatpush.bf16.msrb.mxu0 %v6344_v6  ;;  %v5552_v42 = vor.u32 %v6851_v16, %v5549_v55  ;;  %v5808_v6 = vor.u32 %v6915_v61, %v5805_v18  ;;  %v6027_v16 = vld [vmem:[#allocation11 + $0x550] sm:$0xf]  ;;  %v5680_v18 = vor.u32 %v6883_v14, %v5677_v15  ;;  %v5645_v26 = vld [vmem:[#allocation11 + $0x270] sm:$0xf0] }
 0x205   :  { %3553 = vmatpush.bf16.msra.mxu3 %v5452_v29  ;;  %3567 = vmatpush.bf16.msra.mxu1 %v5708_v30  ;;  %v6907_v29 = vld [vmem:[#allocation11 + $0x354] sm:$0xf]  ;;  %v6975_v55 = vld [vmem:[#allocation11 + $0x56c] sm:$0xf0] }
 0x206   :  { %v5773_v30 = vld [vmem:[#allocation11 + $0x370] sm:$0xf0]  ;;  %v6155_v14 = vld [vmem:[#allocation11 + $0x650] sm:$0xf] }
 0x207   :  { %v6803_v32 = vld [vmem:[#allocation11 + $0x14] sm:$0xf]  ;;  %v7007_v15 = vld [vmem:[#allocation11 + $0x66c] sm:$0xf0] }
 0x208   :  { %3522 = vmatpush.bf16.msrb.mxu2 %v6056_v4  ;;  %3536 = vmatpush.bf16.msrb.mxu0 %v6312_v38  ;;  %v5520_v4 = vor.u32 %v6843_v1, %v5517_v28  ;;  %v5776_v38 = vor.u32 %v6907_v29, %v5773_v30  ;;  %v5995_v1 = vld [vmem:[#allocation11 + $0x510] sm:$0xf]  ;;  %v5392_v30 = vor.u32 %v6811_v10, %v5389_v23  ;;  %v5357_v33 = vld [vmem:[#allocation11 + $0x30] sm:$0xf0] }
 0x209   :  { %3554 = vmatpush.bf16.msra.mxu3 %v5420_v41  ;;  %3568 = vmatpush.bf16.msra.mxu1 %v5676_v5  ;;  %v6899_v41 = vld [vmem:[#allocation11 + $0x314] sm:$0xf]  ;;  %v6967_v28 = vld [vmem:[#allocation11 + $0x52c] sm:$0xf0] }
 0x20a   :  { %v5741_v5 = vld [vmem:[#allocation11 + $0x330] sm:$0xf0]  ;;  %v6251_v29 = vld [vmem:[#allocation11 + $0x710] sm:$0xf] }
 0x20b   :  { %v5744_v50 = vor.u32 %v6899_v41, %v5741_v5  ;;  %v6867_v34 = vld [vmem:[#allocation11 + $0x214] sm:$0xf]  ;;  %v5996_v41 = vor.u32 %v6967_v28, %v5995_v1  ;;  %v5867_v10 = vld [vmem:[#allocation11 + $0x410] sm:$0xf] }
 0x20c   :  { %3523 = vmatpush.bf16.msrb.mxu2 %v6024_v49  ;;  %3537 = vmatpush.bf16.msrb.mxu0 %v6280_v25  ;;  %v6091_v49 = vld [vmem:[#allocation11 + $0x5d0] sm:$0xf]  ;;  %v5613_v35 = vld [vmem:[#allocation11 + $0x230] sm:$0xf0] }
 0x20d   :  { %3555 = vmatpush.bf16.msra.mxu3 %v5388_v37  ;;  %3569 = vmatpush.bf16.msra.mxu1 %v5644_v44  ;;  %v6991_v25 = vld [vmem:[#allocation11 + $0x5ec] sm:$0xf0]  ;;  %v6827_v44 = vld [vmem:[#allocation11 + $0xd4] sm:$0xf]  ;;  %v5616_v46 = vor.u32 %v6867_v34, %v5613_v35 }
 0x20e   :  { %v7055_v37 = vld [vmem:[#allocation11 + $0x7ec] sm:$0xf0]  ;;  %v6092_v2 = vor.u32 %v6991_v25, %v6091_v49  ;;  %v5844_v25 = vor.u32 %v6928_v40, %v5843_v39  ;;  %v6979_v39 = vld [vmem:[#allocation11 + $0x594] sm:$0xf] }
 0x20f   :  { %v6348_v3 = vor.u32 %v7055_v37, %v6347_v54  ;;  %v5811_v54 = vld [vmem:[#allocation11 + $0x398] sm:$0xf]  ;;  %v6935_v23 = vld [vmem:[#allocation11 + $0x42c] sm:$0xf0]  ;;  %v6061_v40 = vld [vmem:[#allocation11 + $0x5b0] sm:$0xf0] }
 0x210   :  { %3524 = vmatpush.bf16.msrb.mxu2 %v5992_v36  ;;  %3538 = vmatpush.bf16.msrb.mxu0 %v6248_v56  ;;  %v5456_v36 = vor.u32 %v6827_v44, %v5453_v57  ;;  %v5712_v56 = vor.u32 %v6891_v58, %v5709_v62  ;;  %v6920_v37 = vld [vmem:[#allocation11 + $0x3b4] sm:$0xf0]  ;;  %v6220_v57 = vor.u32 %v7023_v48, %v6219_v20  ;;  %v5931_v58 = vld [vmem:[#allocation11 + $0x490] sm:$0xf] }
 0x211   :  { %3556 = vmatpush.bf16.msra.mxu3 %v5356_v11  ;;  %3570 = vmatpush.bf16.msra.mxu1 %v5612_v12  ;;  %v7047_v11 = vld [vmem:[#allocation11 + $0x7ac] sm:$0xf0]  ;;  %v6819_v12 = vld [vmem:[#allocation11 + $0x94] sm:$0xf]  ;;  %v5868_v34 = vor.u32 %v6935_v23, %v5867_v10  ;;  %v5683_v20 = vld [vmem:[#allocation11 + $0x298] sm:$0xf] }
 0x212   :  { %v5424_v61 = vor.u32 %v6819_v12, %v5421_v13  ;;  %v6951_v62 = vld [vmem:[#allocation11 + $0x4ac] sm:$0xf0]  ;;  %v6888_v48 = vld [vmem:[#allocation11 + $0x2b4] sm:$0xf0]  ;;  %v5965_v23 = vld [vmem:[#allocation11 + $0x4f0] sm:$0xf0] }
 0x213   :  { %v5899_v12 = vld [vmem:[#allocation11 + $0x450] sm:$0xf] }
 0x214   :  { %3525 = vmatpush.bf16.msrb.mxu2 %v5960_v19  ;;  %3539 = vmatpush.bf16.msrb.mxu0 %v6216_v22  ;;  %v6283_v19 = vld [vmem:[#allocation11 + $0x750] sm:$0xf] }
 0x215   :  { %3605 = vmatpush.bf16.msrb.mxu3 %v5584_v43  ;;  %3619 = vmatpush.bf16.msrb.mxu1 %v5840_v51  ;;  %v6060_v43 = vor.u32 %v6983_v8, %v6059_v7  ;;  %v6316_v51 = vor.u32 %v7047_v11, %v6315_v9  ;;  %v7039_v22 = vld [vmem:[#allocation11 + $0x76c] sm:$0xf0]  ;;  %v5523_v7 = vld [vmem:[#allocation11 + $0x158] sm:$0xf]  ;;  %v5932_v9 = vor.u32 %v6951_v62, %v5931_v58 }
 0x216   :  { %3557 = vmatmul.bf16.vlgmr.msra.gmra.mxu3 %v7554_v17  ;;  %3571 = vmatmul.bf16.vlgmr.msra.gmra.mxu1 %v7556_v59  ;;  %v6848_v8 = vld [vmem:[#allocation11 + $0x174] sm:$0xf0]  ;;  %v6943_v13 = vld [vmem:[#allocation11 + $0x46c] sm:$0xf0] }
 0x217   :  { %v5395_v58 = vld [vmem:[#allocation11 + $0x58] sm:$0xf] }
 0x218   :  { %3526 = vmatpush.bf16.msrb.mxu2 %v5928_v31  ;;  %3540 = vmatpush.bf16.msrb.mxu0 %v6184_v21  ;;  %v5648_v31 = vor.u32 %v6875_v24, %v5645_v26  ;;  %v7031_v21 = vld [vmem:[#allocation11 + $0x72c] sm:$0xf0]  ;;  %v6816_v62 = vld [vmem:[#allocation11 + $0x74] sm:$0xf0] }
 0x219   :  { %3606 = vmatpush.bf16.msrb.mxu3 %v5552_v42  ;;  %3620 = vmatpush.bf16.msrb.mxu1 %v5808_v6  ;;  %v6028_v42 = vor.u32 %v6975_v55, %v6027_v16  ;;  %v6284_v6 = vor.u32 %v7039_v22, %v6283_v19  ;;  %v6252_v5 = vor.u32 %v7031_v21, %v6251_v29  ;;  %v5491_v16 = vld [vmem:[#allocation11 + $0x118] sm:$0xf]  ;;  %v6123_v24 = vld [vmem:[#allocation11 + $0x610] sm:$0xf]  ;;  %v7051_v29 = vld [vmem:[#allocation11 + $0x7d4] sm:$0xf] }
 0x21a   :  { %v6840_v55 = vld [vmem:[#allocation11 + $0x134] sm:$0xf0]  ;;  %v5900_v19 = vor.u32 %v6943_v13, %v5899_v12  ;;  %v6156_v22 = vor.u32 %v7007_v15, %v6155_v14  ;;  %v6999_v26 = vld [vmem:[#allocation11 + $0x62c] sm:$0xf0] }
 0x21b   :  { %v5492_v1 = vor.u32 %v6840_v55, %v5491_v16  ;;  %v6832_v21 = vld [vmem:[#allocation11 + $0xf4] sm:$0xf0]  ;;  %v6124_v35 = vor.u32 %v6999_v26, %v6123_v24  ;;  %v6924_v16 = vld [vmem:[#allocation11 + $0x3dc] sm:$0xf]  ;;  %v7019_v24 = vld [vmem:[#allocation11 + $0x6d4] sm:$0xf] }
 0x21c   :  { %3527 = vmatpush.bf16.msrb.mxu2 %v5896_v60  ;;  %3541 = vmatpush.bf16.msrb.mxu0 %v6152_v45  ;;  %v5963_v60 = vld [vmem:[#allocation11 + $0x4d0] sm:$0xf]  ;;  %v5360_v45 = vor.u32 %v6803_v32, %v5357_v33  ;;  %v5715_v32 = vld [vmem:[#allocation11 + $0x2d8] sm:$0xf]  ;;  %v5845_v55 = vld [vmem:[#allocation11 + $0x3f8] sm:$0xf0] }
 0x21d   :  { %3607 = vmatpush.bf16.msrb.mxu3 %v5520_v4  ;;  %3621 = vmatpush.bf16.msrb.mxu1 %v5776_v38  ;;  %v5587_v4 = vld [vmem:[#allocation11 + $0x1d8] sm:$0xf]  ;;  %v5964_v44 = vor.u32 %v6959_v47, %v5963_v60  ;;  %v7043_v60 = vld [vmem:[#allocation11 + $0x794] sm:$0xf] }
 0x21e   :  { %v6864_v38 = vld [vmem:[#allocation11 + $0x1f4] sm:$0xf0]  ;;  %v6221_v26 = vld [vmem:[#allocation11 + $0x6f0] sm:$0xf0] }
 0x21f   :  { %v5588_v49 = vor.u32 %v6864_v38, %v5587_v4  ;;  %v6896_v33 = vld [vmem:[#allocation11 + $0x2f4] sm:$0xf0] }
 0x220   :  { %3528 = vmatpush.bf16.msrb.mxu2 %v5864_v63  ;;  %3542 = vmatpush.bf16.msrb.mxu0 %v6120_v0  ;;  %v6187_v63 = vld [vmem:[#allocation11 + $0x690] sm:$0xf]  ;;  %v6824_v47 = vld [vmem:[#allocation11 + $0xb4] sm:$0xf0] }
 0x221   :  { %3608 = vmatpush.bf16.msrb.mxu3 %v5488_v27  ;;  %3622 = vmatpush.bf16.msrb.mxu1 %v5744_v50  ;;  %v5555_v27 = vld [vmem:[#allocation11 + $0x198] sm:$0xf]  ;;  %v7015_v0 = vld [vmem:[#allocation11 + $0x6ac] sm:$0xf0] }
 0x222   :  { %v6856_v50 = vld [vmem:[#allocation11 + $0x1b4] sm:$0xf0]  ;;  %v6188_v11 = vor.u32 %v7015_v0, %v6187_v63 }
 0x223   :  { %3529 = vmatmul.bf16.vlgmr.msrb.gmra.mxu2 %v7598_v52  ;;  %3543 = vmatmul.bf16.vlgmr.msrb.gmra.mxu0 %v7600_v53  ;;  %v5651_v63 = vld [vmem:[#allocation11 + $0x258] sm:$0xf] }
 0x224   :  { %3577 = vmatpush.bf16.msra.mxu2 %v6092_v2  ;;  %3591 = vmatpush.bf16.msra.mxu0 %v6348_v3  ;;  %v5556_v2 = vor.u32 %v6856_v50, %v5555_v27  ;;  %v5812_v3 = vor.u32 %v6920_v37, %v5811_v54  ;;  %v6971_v27 = vld [vmem:[#allocation11 + $0x554] sm:$0xf]  ;;  %v5684_v37 = vor.u32 %v6888_v48, %v5683_v20  ;;  %v6880_v0 = vld [vmem:[#allocation11 + $0x274] sm:$0xf0] }
 0x225   :  { %3609 = vmatpush.bf16.msrb.mxu3 %v5456_v36  ;;  %3623 = vmatpush.bf16.msrb.mxu1 %v5712_v56  ;;  %v5779_v36 = vld [vmem:[#allocation11 + $0x358] sm:$0xf]  ;;  %v6029_v50 = vld [vmem:[#allocation11 + $0x570] sm:$0xf0] }
 0x226   :  { %v6912_v56 = vld [vmem:[#allocation11 + $0x374] sm:$0xf0]  ;;  %v7003_v20 = vld [vmem:[#allocation11 + $0x654] sm:$0xf] }
 0x227   :  { %v5363_v12 = vld [vmem:[#allocation11 + $0x18] sm:$0xf]  ;;  %v6157_v48 = vld [vmem:[#allocation11 + $0x670] sm:$0xf0] }
 0x228   :  { %3578 = vmatpush.bf16.msra.mxu2 %v6060_v43  ;;  %3592 = vmatpush.bf16.msra.mxu0 %v6316_v51  ;;  %v5524_v43 = vor.u32 %v6848_v8, %v5523_v7  ;;  %v5780_v51 = vor.u32 %v6912_v56, %v5779_v36  ;;  %v6963_v7 = vld [vmem:[#allocation11 + $0x514] sm:$0xf]  ;;  %v5396_v56 = vor.u32 %v6816_v62, %v5395_v58  ;;  %v6808_v13 = vld [vmem:[#allocation11 + $0x34] sm:$0xf0] }
 0x229   :  { %3610 = vmatpush.bf16.msrb.mxu3 %v5424_v61  ;;  %3624 = vmatpush.bf16.msrb.mxu1 %v5680_v18  ;;  %v5747_v61 = vld [vmem:[#allocation11 + $0x318] sm:$0xf]  ;;  %v5997_v8 = vld [vmem:[#allocation11 + $0x530] sm:$0xf0] }
 0x22a   :  { %v6904_v18 = vld [vmem:[#allocation11 + $0x334] sm:$0xf0]  ;;  %v7027_v36 = vld [vmem:[#allocation11 + $0x714] sm:$0xf] }
 0x22b   :  { %v5748_v28 = vor.u32 %v6904_v18, %v5747_v61  ;;  %v5619_v14 = vld [vmem:[#allocation11 + $0x218] sm:$0xf]  ;;  %v6000_v61 = vor.u32 %v6963_v7, %v5997_v8  ;;  %v6931_v58 = vld [vmem:[#allocation11 + $0x414] sm:$0xf] }
 0x22c   :  { %3579 = vmatpush.bf16.msra.mxu2 %v6028_v42  ;;  %3593 = vmatpush.bf16.msra.mxu0 %v6284_v6  ;;  %v6987_v42 = vld [vmem:[#allocation11 + $0x5d4] sm:$0xf]  ;;  %v6872_v15 = vld [vmem:[#allocation11 + $0x234] sm:$0xf0] }
 0x22d   :  { %3611 = vmatpush.bf16.msrb.mxu3 %v5392_v30  ;;  %3625 = vmatpush.bf16.msrb.mxu1 %v5648_v31  ;;  %v6093_v6 = vld [vmem:[#allocation11 + $0x5f0] sm:$0xf0]  ;;  %v5459_v31 = vld [vmem:[#allocation11 + $0xd8] sm:$0xf]  ;;  %v5620_v10 = vor.u32 %v6872_v15, %v5619_v14 }
 0x22e   :  { %v6349_v30 = vld [vmem:[#allocation11 + $0x7f0] sm:$0xf0]  ;;  %v6096_v4 = vor.u32 %v6987_v42, %v6093_v6  ;;  %v5848_v6 = vor.u32 %v6924_v16, %v5845_v55  ;;  %v6067_v16 = vld [vmem:[#allocation11 + $0x598] sm:$0xf] }
 0x22f   :  { %v6352_v38 = vor.u32 %v7051_v29, %v6349_v30  ;;  %v6916_v29 = vld [vmem:[#allocation11 + $0x39c] sm:$0xf]  ;;  %v5869_v62 = vld [vmem:[#allocation11 + $0x430] sm:$0xf0]  ;;  %v6984_v55 = vld [vmem:[#allocation11 + $0x5b4] sm:$0xf0] }
 0x230   :  { %3580 = vmatpush.bf16.msra.mxu2 %v5996_v41  ;;  %3594 = vmatpush.bf16.msra.mxu0 %v6252_v5  ;;  %v5460_v41 = vor.u32 %v6832_v21, %v5459_v31  ;;  %v5716_v5 = vor.u32 %v6896_v33, %v5715_v32  ;;  %v5813_v30 = vld [vmem:[#allocation11 + $0x3b8] sm:$0xf0]  ;;  %v6224_v21 = vor.u32 %v7019_v24, %v6221_v26  ;;  %v6947_v32 = vld [vmem:[#allocation11 + $0x494] sm:$0xf] }
 0x231   :  { %3612 = vmatpush.bf16.msrb.mxu3 %v5360_v45  ;;  %3626 = vmatpush.bf16.msrb.mxu1 %v5616_v46  ;;  %v6317_v45 = vld [vmem:[#allocation11 + $0x7b0] sm:$0xf0]  ;;  %v5427_v46 = vld [vmem:[#allocation11 + $0x98] sm:$0xf]  ;;  %v5872_v14 = vor.u32 %v6931_v58, %v5869_v62  ;;  %v6884_v24 = vld [vmem:[#allocation11 + $0x29c] sm:$0xf] }
 0x232   :  { %v5428_v54 = vor.u32 %v6824_v47, %v5427_v46  ;;  %v5933_v33 = vld [vmem:[#allocation11 + $0x4b0] sm:$0xf0]  ;;  %v5685_v26 = vld [vmem:[#allocation11 + $0x2b8] sm:$0xf0]  ;;  %v6227_v58 = vld [vmem:[#allocation11 + $0x6d8] sm:$0xf] }
 0x233   :  { %v6939_v46 = vld [vmem:[#allocation11 + $0x454] sm:$0xf]  ;;  %v7024_v62 = vld [vmem:[#allocation11 + $0x6f4] sm:$0xf0] }
 0x234   :  { %3581 = vmatpush.bf16.msra.mxu2 %v5964_v44  ;;  %3595 = vmatpush.bf16.msra.mxu0 %v6220_v57  ;;  %v7035_v44 = vld [vmem:[#allocation11 + $0x754] sm:$0xf] }
 0x235   :  { %3661 = vmatpush.bf16.msra.mxu3 %v5588_v49  ;;  %3675 = vmatpush.bf16.msra.mxu1 %v5844_v25  ;;  %v6064_v49 = vor.u32 %v6979_v39, %v6061_v40  ;;  %v6320_v25 = vor.u32 %v7043_v60, %v6317_v45  ;;  %v6285_v57 = vld [vmem:[#allocation11 + $0x770] sm:$0xf0]  ;;  %v6844_v39 = vld [vmem:[#allocation11 + $0x15c] sm:$0xf]  ;;  %v5936_v60 = vor.u32 %v6947_v32, %v5933_v33 }
 0x236   :  { %3613 = vmatmul.bf16.vlgmr.msrb.gmra.mxu3 %v7554_v17  ;;  %3627 = vmatmul.bf16.vlgmr.msrb.gmra.mxu1 %v7556_v59  ;;  %v5525_v40 = vld [vmem:[#allocation11 + $0x178] sm:$0xf0]  ;;  %v5901_v47 = vld [vmem:[#allocation11 + $0x470] sm:$0xf0] }
 0x237   :  { %v6812_v32 = vld [vmem:[#allocation11 + $0x5c] sm:$0xf] }
 0x238   :  { %3582 = vmatpush.bf16.msra.mxu2 %v5932_v9  ;;  %3596 = vmatpush.bf16.msra.mxu0 %v6188_v11  ;;  %v5652_v9 = vor.u32 %v6880_v0, %v5651_v63  ;;  %v6253_v11 = vld [vmem:[#allocation11 + $0x730] sm:$0xf0]  ;;  %v5397_v33 = vld [vmem:[#allocation11 + $0x78] sm:$0xf0] }
 0x239   :  { %3662 = vmatpush.bf16.msra.mxu3 %v5556_v2  ;;  %3676 = vmatpush.bf16.msra.mxu1 %v5812_v3  ;;  %v6032_v2 = vor.u32 %v6971_v27, %v6029_v50  ;;  %v6288_v3 = vor.u32 %v7035_v44, %v6285_v57  ;;  %v6256_v18 = vor.u32 %v7027_v36, %v6253_v11  ;;  %v6836_v27 = vld [vmem:[#allocation11 + $0x11c] sm:$0xf]  ;;  %v6995_v63 = vld [vmem:[#allocation11 + $0x614] sm:$0xf]  ;;  %v6355_v36 = vld [vmem:[#allocation11 + $0x7d8] sm:$0xf] }
 0x23a   :  { %v5493_v50 = vld [vmem:[#allocation11 + $0x138] sm:$0xf0]  ;;  %v5904_v44 = vor.u32 %v6939_v46, %v5901_v47  ;;  %v6160_v57 = vor.u32 %v7003_v20, %v6157_v48  ;;  %v6125_v0 = vld [vmem:[#allocation11 + $0x630] sm:$0xf0]  ;;  %v6259_v46 = vld [vmem:[#allocation11 + $0x718] sm:$0xf] }
 0x23b   :  { %v5496_v7 = vor.u32 %v6836_v27, %v5493_v50  ;;  %v5461_v11 = vld [vmem:[#allocation11 + $0xf8] sm:$0xf0]  ;;  %v6128_v15 = vor.u32 %v6995_v63, %v6125_v0  ;;  %v7032_v47 = vld [vmem:[#allocation11 + $0x734] sm:$0xf0]  ;;  %v7064_v0 = vld [vmem:[#allocation14 + $0x38] sm:$0xff] }
 0x23c   :  { %3583 = vmatpush.bf16.msra.mxu2 %v5900_v19  ;;  %3597 = vmatpush.bf16.msra.mxu0 %v6156_v22  ;;  %v6955_v19 = vld [vmem:[#allocation11 + $0x4d4] sm:$0xf]  ;;  %v5364_v22 = vor.u32 %v6808_v13, %v5363_v12  ;;  %v6892_v12 = vld [vmem:[#allocation11 + $0x2dc] sm:$0xf]  ;;  %v6260_v50 = vor.u32 %v7032_v47, %v6259_v46 }
 0x23d   :  { %3663 = vmatpush.bf16.msra.mxu3 %v5524_v43  ;;  %3677 = vmatpush.bf16.msra.mxu1 %v5780_v51  ;;  %v6860_v43 = vld [vmem:[#allocation11 + $0x1dc] sm:$0xf]  ;;  %v5968_v31 = vor.u32 %v6955_v19, %v5965_v23  ;;  %v6323_v19 = vld [vmem:[#allocation11 + $0x798] sm:$0xf] }
 0x23e   :  { %v5589_v51 = vld [vmem:[#allocation11 + $0x1f8] sm:$0xf0] }
 0x23f   :  { %v5592_v42 = vor.u32 %v6860_v43, %v5589_v51  ;;  %v5717_v13 = vld [vmem:[#allocation11 + $0x2f8] sm:$0xf0] }
 0x240   :  { %3584 = vmatpush.bf16.msra.mxu2 %v5868_v34  ;;  %3598 = vmatpush.bf16.msra.mxu0 %v6124_v35  ;;  %v7011_v34 = vld [vmem:[#allocation11 + $0x694] sm:$0xf]  ;;  %v5429_v23 = vld [vmem:[#allocation11 + $0xb8] sm:$0xf0] }
 0x241   :  { %3664 = vmatpush.bf16.msra.mxu3 %v5492_v1  ;;  %3678 = vmatpush.bf16.msra.mxu1 %v5748_v28  ;;  %v6852_v1 = vld [vmem:[#allocation11 + $0x19c] sm:$0xf]  ;;  %v6189_v35 = vld [vmem:[#allocation11 + $0x6b0] sm:$0xf0] }
 0x242   :  { %v5557_v28 = vld [vmem:[#allocation11 + $0x1b8] sm:$0xf0]  ;;  %v6192_v45 = vor.u32 %v7011_v34, %v6189_v35 }
 0x243   :  { %3585 = vmatmul.bf16.vlgmr.msra.gmra.mxu2 %v7598_v52  ;;  %3599 = vmatmul.bf16.vlgmr.msra.gmra.mxu0 %v7600_v53  ;;  %v6876_v34 = vld [vmem:[#allocation11 + $0x25c] sm:$0xf] }
 0x244   :  { %3633 = vmatpush.bf16.msrb.mxu2 %v6096_v4  ;;  %3647 = vmatpush.bf16.msrb.mxu0 %v6352_v38  ;;  %v5560_v4 = vor.u32 %v6852_v1, %v5557_v28  ;;  %v5816_v38 = vor.u32 %v6916_v29, %v5813_v30  ;;  %v6035_v1 = vld [vmem:[#allocation11 + $0x558] sm:$0xf]  ;;  %v5688_v30 = vor.u32 %v6884_v24, %v5685_v26  ;;  %v5653_v35 = vld [vmem:[#allocation11 + $0x278] sm:$0xf0] }
 0x245   :  { %3665 = vmatpush.bf16.msra.mxu3 %v5460_v41  ;;  %3679 = vmatpush.bf16.msra.mxu1 %v5716_v5  ;;  %v6908_v41 = vld [vmem:[#allocation11 + $0x35c] sm:$0xf]  ;;  %v6976_v28 = vld [vmem:[#allocation11 + $0x574] sm:$0xf0] }
 0x246   :  { %v5781_v5 = vld [vmem:[#allocation11 + $0x378] sm:$0xf0] }
 0x247   :  { %v6804_v20 = vld [vmem:[#allocation11 + $0x1c] sm:$0xf] }
 0x248   :  { %3634 = vmatpush.bf16.msrb.mxu2 %v6064_v49  ;;  %3648 = vmatpush.bf16.msrb.mxu0 %v6320_v25  ;;  %v5528_v49 = vor.u32 %v6844_v39, %v5525_v40  ;;  %v5784_v25 = vor.u32 %v6908_v41, %v5781_v5  ;;  %v6003_v40 = vld [vmem:[#allocation11 + $0x518] sm:$0xf]  ;;  %v7624_v5 = vpop.f32.mrf.mxu1  ;;  %v5365_v48 = vld [vmem:[#allocation11 + $0x38] sm:$0xf0] }
 0x249   :  { %3666 = vmatpush.bf16.msra.mxu3 %v5428_v54  ;;  %3680 = vmatpush.bf16.msra.mxu1 %v5684_v37  ;;  %v6900_v54 = vld [vmem:[#allocation11 + $0x31c] sm:$0xf]  ;;  %v6968_v41 = vld [vmem:[#allocation11 + $0x534] sm:$0xf0] }
 0x24a   :  { %v5749_v37 = vld [vmem:[#allocation11 + $0x338] sm:$0xf0]  ;;  %v6004_v27 = vor.u32 %v6968_v41, %v6003_v40 }
 0x24b   :  { %v5752_v8 = vor.u32 %v6900_v54, %v5749_v37  ;;  %v5971_v54 = vld [vmem:[#allocation11 + $0x4d8] sm:$0xf]  ;;  %v5368_v37 = vor.u32 %v6804_v20, %v5365_v48  ;;  %v7044_v46 = vld [vmem:[#allocation11 + $0x79c] sm:$0xf]  ;;  %v7060_v20 = vld [vmem:[#allocation14 + $0x18] sm:$0xff] }
 0x24c   :  { %3635 = vmatpush.bf16.msrb.mxu2 %v6032_v2  ;;  %3649 = vmatpush.bf16.msrb.mxu0 %v6288_v3  ;;  %v6099_v2 = vld [vmem:[#allocation11 + $0x5d8] sm:$0xf]  ;;  %v6325_v47 = vld [vmem:[#allocation11 + $0x7b8] sm:$0xf0]  ;;  %v7068_v48 = vld [vmem:[#allocation14 + $0x58] sm:$0xff] }
 0x24d   :  { %3667 = vmatpush.bf16.msra.mxu3 %v5396_v56  ;;  %3681 = vmatpush.bf16.msra.mxu1 %v5652_v9  ;;  %v6992_v3 = vld [vmem:[#allocation11 + $0x5f4] sm:$0xf0]  ;;  %v6828_v9 = vld [vmem:[#allocation11 + $0xdc] sm:$0xf] }
 0x24e   :  { %v7056_v56 = vld [vmem:[#allocation11 + $0x7f4] sm:$0xf0]  ;;  %v6100_v43 = vor.u32 %v6992_v3, %v6099_v2  ;;  %v7072_v2 = vld [vmem:[#allocation14 + $0x78] sm:$0xff] }
 0x24f   :  { %v6356_v51 = vor.u32 %v7056_v56, %v6355_v36  ;;  %v6952_v56 = vld [vmem:[#allocation11 + $0x4b4] sm:$0xf0] }
 0x250   :  { %3636 = vmatpush.bf16.msrb.mxu2 %v6000_v61  ;;  %3650 = vmatpush.bf16.msrb.mxu0 %v6256_v18  ;;  %v5464_v61 = vor.u32 %v6828_v9, %v5461_v11  ;;  %v5720_v18 = vor.u32 %v6892_v12, %v5717_v13  ;;  %v6195_v9 = vld [vmem:[#allocation11 + $0x698] sm:$0xf] }
 0x251   :  { %3668 = vmatpush.bf16.msra.mxu3 %v5364_v22  ;;  %3682 = vmatpush.bf16.msra.mxu1 %v5620_v10  ;;  %v7048_v22 = vld [vmem:[#allocation11 + $0x7b4] sm:$0xf0]  ;;  %v6820_v10 = vld [vmem:[#allocation11 + $0x9c] sm:$0xf] }
 0x252   :  { %v5432_v29 = vor.u32 %v6820_v10, %v5429_v23  ;;  %v7016_v11 = vld [vmem:[#allocation11 + $0x6b4] sm:$0xf0] }
 0x253   :  { %v7063_v13 = vld [vmem:[#allocation14 + $0x30] sm:$0xff] }
 0x254   :  { %3637 = vmatpush.bf16.msrb.mxu2 %v5968_v31  ;;  %3651 = vmatpush.bf16.msrb.mxu0 %v6224_v21  ;;  %v6291_v31 = vld [vmem:[#allocation11 + $0x758] sm:$0xf] }
 0x255   :  { %3717 = vmatpush.bf16.msrb.mxu3 %v5592_v42  ;;  %3731 = vmatpush.bf16.msrb.mxu1 %v5848_v6  ;;  %v6068_v42 = vor.u32 %v6984_v55, %v6067_v16  ;;  %v6324_v6 = vor.u32 %v7048_v22, %v6323_v19  ;;  %v7040_v21 = vld [vmem:[#allocation11 + $0x774] sm:$0xf0]  ;;  %v7062_v19 = vld [vmem:[#allocation14 + $0x28] sm:$0xff] }
 0x256   :  { %3669 = vmatmul.bf16.vlgmr.msra.gmra.mxu3 %v7554_v17  ;;  %3683 = vmatmul.bf16.vlgmr.msra.gmra.mxu1 %v7556_v59  ;;  %v6292_v39 = vor.u32 %v7040_v21, %v6291_v31  ;;  %v5907_v16 = vld [vmem:[#allocation11 + $0x458] sm:$0xf]  ;;  %v7070_v22 = vld [vmem:[#allocation14 + $0x68] sm:$0xff]  ;;  %v7061_v31 = vld [vmem:[#allocation14 + $0x20] sm:$0xff] }
 0x257   :  { %v6944_v55 = vld [vmem:[#allocation11 + $0x474] sm:$0xf0]  ;;  %v7069_v21 = vld [vmem:[#allocation14 + $0x60] sm:$0xff] }
 0x258   :  { %3638 = vmatpush.bf16.msrb.mxu2 %v5936_v60  ;;  %3652 = vmatpush.bf16.msrb.mxu0 %v6192_v45  ;;  %v5400_v60 = vor.u32 %v6812_v32, %v5397_v33  ;;  %v5656_v45 = vor.u32 %v6876_v34, %v5653_v35  ;;  %v5875_v10 = vld [vmem:[#allocation11 + $0x418] sm:$0xf]  ;;  %v5908_v24 = vor.u32 %v6944_v55, %v5907_v16  ;;  %v3784_v35 = vld [vmem:[#allocation1] sm:$0xff]  ;;  %v7028_v16 = vld [vmem:[#allocation11 + $0x71c] sm:$0xf] }
 0x259   :  { %3718 = vmatpush.bf16.msrb.mxu3 %v5560_v4  ;;  %3732 = vmatpush.bf16.msrb.mxu1 %v5816_v38  ;;  %v7622_v4 = vpop.f32.mrf.mxu3  ;;  %v6036_v38 = vor.u32 %v6976_v28, %v6035_v1  ;;  %v7000_v1 = vld [vmem:[#allocation11 + $0x634] sm:$0xf0]  ;;  %v6101_v28 = vld [vmem:[#allocation11 + $0x5f8] sm:$0xf0] }
 0x25a   :  { %v6261_v55 = vld [vmem:[#allocation11 + $0x738] sm:$0xf0] }
 0x25c   :  { %3639 = vmatpush.bf16.msrb.mxu2 %v5904_v44  ;;  %3653 = vmatpush.bf16.msrb.mxu0 %v6160_v57  ;;  %v6960_v57 = vld [vmem:[#allocation11 + $0x4f4] sm:$0xf0] }
 0x25d   :  { %3719 = vmatpush.bf16.msrb.mxu3 %v5528_v49  ;;  %3733 = vmatpush.bf16.msrb.mxu1 %v5784_v25  ;;  %v6868_v49 = vld [vmem:[#allocation11 + $0x21c] sm:$0xf]  ;;  %v5972_v3 = vor.u32 %v6960_v57, %v5971_v54 }
 0x25e   :  { %v5621_v25 = vld [vmem:[#allocation11 + $0x238] sm:$0xf0] }
 0x25f   :  { %v5624_v44 = vor.u32 %v6868_v49, %v5621_v25  ;;  %v3349_v49 = vadd.f32 %v7624_v5, %v7622_v4  ;;  %v3792_v25 = vpack.i.b16 %v3784_v35, %v3784_v35  ;;  %v6972_v57 = vld [vmem:[#allocation11 + $0x55c] sm:$0xf] }
 0x260   :  { %3640 = vmatpush.bf16.msrb.mxu2 %v5872_v14  ;;  %3654 = vmatpush.bf16.msrb.mxu0 %v6128_v15  ;;  %v7626_v63 = vpop.f32.mrf.mxu0  ;;  %v7071_v14 = vld [vmem:[#allocation14 + $0x70] sm:$0xff]  ;;  %v7630_v15 = vpop.f32.mrf.mxu1 }
 0x261   :  { %3720 = vmatpush.bf16.msrb.mxu3 %v5496_v7  ;;  %3734 = vmatpush.bf16.msrb.mxu1 %v5752_v8  ;;  %v6228_v7 = vor.u32 %v7024_v62, %v6227_v58  ;;  %v5939_v8 = vld [vmem:[#allocation11 + $0x498] sm:$0xf]  ;;  %v7628_v36 = vpop.f32.mrf.mxu3  ;;  %v6037_v58 = vld [vmem:[#allocation11 + $0x578] sm:$0xf0] }
 0x262   :  { %v7036_v62 = vld [vmem:[#allocation11 + $0x75c] sm:$0xf] }
 0x263   :  { %3641 = vmatmul.bf16.vlgmr.msrb.gmra.mxu2 %v7598_v52  ;;  %3655 = vmatmul.bf16.vlgmr.msrb.gmra.mxu0 %v7600_v53  ;;  %v7067_v4 = vld [vmem:[#allocation14 + $0x50] sm:$0xff] }
 0x264   :  { %3689 = vmatpush.bf16.msra.mxu2 %v6100_v43  ;;  %3703 = vmatpush.bf16.msra.mxu0 %v6356_v51  ;;  %v5940_v43 = vor.u32 %v6952_v56, %v5939_v8  ;;  %v6196_v51 = vor.u32 %v7016_v11, %v6195_v9  ;;  %v7640_v8 = vperm.slane %v3792_v25, 0  ;;  %v6040_v9 = vor.u32 %v6972_v57, %v6037_v58 }
 0x265   :  { %3721 = vmatpush.bf16.msrb.mxu3 %v5464_v61  ;;  %3735 = vmatpush.bf16.msrb.mxu1 %v5720_v18  ;;  %v6163_v61 = vld [vmem:[#allocation11 + $0x658] sm:$0xf] }
 0x266   :  { %v3362_v12 = vpop.f32.mrf.mxu2  ;;  %v7008_v18 = vld [vmem:[#allocation11 + $0x674] sm:$0xf0] }
 0x267   :  { %v6164_v26 = vor.u32 %v7008_v18, %v6163_v61  ;;  %v3363_v54 = vadd.f32 %v3362_v12, %v3349_v49  ;;  %v7058_v61 = vld [vmem:[#allocation14 + $0x8] sm:$0xff] }
 0x268   :  { %3690 = vmatpush.bf16.msra.mxu2 %v6068_v42  ;;  %3704 = vmatpush.bf16.msra.mxu0 %v6324_v6  ;;  %v7634_v23 = vpop.f32.mrf.mxu0  ;;  %v6936_v42 = vld [vmem:[#allocation11 + $0x434] sm:$0xf0]  ;;  %v7066_v18 = vld [vmem:[#allocation14 + $0x48] sm:$0xff] }
 0x269   :  { %3722 = vmatpush.bf16.msrb.mxu3 %v5432_v29  ;;  %3736 = vmatpush.bf16.msrb.mxu1 %v5688_v30  ;;  %v6131_v6 = vld [vmem:[#allocation11 + $0x618] sm:$0xf]  ;;  %v6357_v30 = vld [vmem:[#allocation11 + $0x7f8] sm:$0xf0]  ;;  %v3390_v32 = vpop.f32.mrf.mxu3  ;;  %v5876_v33 = vor.u32 %v6936_v42, %v5875_v10  ;;  %v3377_v12 = vadd.f32 %v7626_v63, %v3363_v54 }
 0x26a   :  { %v6132_v34 = vor.u32 %v7000_v1, %v6131_v6  ;;  %v6940_v54 = vld [vmem:[#allocation11 + $0x45c] sm:$0xf] }
 0x26c   :  { %3691 = vmatpush.bf16.msra.mxu2 %v6036_v38  ;;  %3705 = vmatpush.bf16.msra.mxu0 %v6292_v39  ;;  %v3785_v38 = vld [vmem:[#allocation1 + $0x9] sm:$0xff]  ;;  %v3404_v39 = vpop.f32.mrf.mxu1 }
 0x26d   :  { %3723 = vmatpush.bf16.msrb.mxu3 %v5400_v60  ;;  %3737 = vmatpush.bf16.msrb.mxu1 %v5656_v45  ;;  %v6980_v60 = vld [vmem:[#allocation11 + $0x59c] sm:$0xf] }
 0x26e   :  { %v7636_v29 = vpop.f32.mrf.mxu2  ;;  %v6069_v45 = vld [vmem:[#allocation11 + $0x5b8] sm:$0xf0] }
 0x270   :  { %3692 = vmatpush.bf16.msra.mxu2 %v6004_v27  ;;  %3706 = vmatpush.bf16.msra.mxu0 %v6260_v50  ;;  %v3795_v27 = vpack.i.b16 %v3785_v38, %v3785_v38  ;;  %v3405_v50 = vadd.f32 %v3404_v39, %v3390_v32  ;;  %v7065_v32 = vld [vmem:[#allocation14 + $0x40] sm:$0xff] }
 0x271   :  { %3724 = vmatpush.bf16.msrb.mxu3 %v5368_v37  ;;  %3738 = vmatpush.bf16.msrb.mxu1 %v5624_v44  ;;  %v6072_v37 = vor.u32 %v6980_v60, %v6069_v45  ;;  %v6328_v44 = vor.u32 %v7044_v46, %v6325_v47  ;;  %v3392_v11 = vpop.f32.mrf.mxu3  ;;  %v6948_v60 = vld [vmem:[#allocation11 + $0x49c] sm:$0xf] }
 0x272   :  { %v7642_v56 = vperm.slane %v3795_v27, 0  ;;  %v5941_v45 = vld [vmem:[#allocation11 + $0x4b8] sm:$0xf0] }
 0x273   :  { %v7012_v46 = vld [vmem:[#allocation11 + $0x69c] sm:$0xf]  ;;  %v5944_v27 = vor.u32 %v6948_v60, %v5941_v45 }
 0x274   :  { %3693 = vmatpush.bf16.msra.mxu2 %v5972_v3  ;;  %3707 = vmatpush.bf16.msra.mxu0 %v6228_v7  ;;  %v6293_v3 = vld [vmem:[#allocation11 + $0x778] sm:$0xf0]  ;;  %v3833_v63 = vunpack.c.l.bf16 %v7642_v56 }
 0x275   :  { %4460 = vmatpush.bf16.msra.mxu3 %v7064_v0  ;;  %4474 = vmatpush.bf16.msra.mxu1 %v7072_v2  ;;  %v3432_v0 = vpop.f32.mrf.mxu0  ;;  %v7059_v7 = vld [vmem:[#allocation14 + $0x10] sm:$0xff] }
 0x276   :  { %3725 = vmatmul.bf16.vlgmr.msrb.gmra.mxu3 %v7554_v17  ;;  %3739 = vmatmul.bf16.vlgmr.msrb.gmra.mxu1 %v7556_v59  ;;  %v6988_v17 = vld [vmem:[#allocation11 + $0x5dc] sm:$0xf]  ;;  %v3418_v2 = vpop.f32.mrf.mxu2 }
 0x277   :  { %v7052_v59 = vld [vmem:[#allocation11 + $0x7dc] sm:$0xf]  ;;  %v6104_v40 = vor.u32 %v6988_v17, %v6101_v28  ;;  %v3419_v5 = vadd.f32 %v3418_v2, %v3405_v50  ;;  %v6264_v28 = vor.u32 %v7028_v16, %v6261_v55 }
 0x278   :  { %3694 = vmatpush.bf16.msra.mxu2 %v5940_v43  ;;  %3708 = vmatpush.bf16.msra.mxu0 %v6196_v51  ;;  %v6360_v41 = vor.u32 %v7052_v59, %v6357_v30  ;;  %v6964_v43 = vld [vmem:[#allocation11 + $0x51c] sm:$0xf] }
 0x279   :  { %4461 = vmatpush.bf16.msra.mxu3 %v7063_v13  ;;  %4475 = vmatpush.bf16.msra.mxu1 %v7071_v14  ;;  %v3433_v13 = vadd.f32 %v3432_v0, %v3419_v5  ;;  %v6296_v14 = vor.u32 %v7036_v62, %v6293_v3  ;;  %v6005_v51 = vld [vmem:[#allocation11 + $0x538] sm:$0xf0] }
 0x27a   :  { %v6008_v42 = vor.u32 %v6964_v43, %v6005_v51  ;;  %v6956_v59 = vld [vmem:[#allocation11 + $0x4dc] sm:$0xf] }
 0x27b   :  { %v3773_v10 = vpack.c.bf16 %v3433_v13, %v3377_v12  ;;  %v5973_v30 = vld [vmem:[#allocation11 + $0x4f8] sm:$0xf0] }
 0x27c   :  { %3695 = vmatpush.bf16.msra.mxu2 %v5908_v24  ;;  %3709 = vmatpush.bf16.msra.mxu0 %v6164_v26  ;;  %v3832_v24 = vunpack.c.l.bf16 %v7640_v8  ;;  %v5976_v39 = vor.u32 %v6956_v59, %v5973_v30  ;;  %v6197_v47 = vld [vmem:[#allocation11 + $0x6b8] sm:$0xf0]  ;;  %v7078_v30 = vld [vmem:[#allocation14 + $0xa8] sm:$0xff] }
 0x27d   :  { %4462 = vmatpush.bf16.msra.mxu3 %v7062_v19  ;;  %4476 = vmatpush.bf16.msra.mxu1 %v7070_v22  ;;  %v3351_v19 = vadd.f32 %v7630_v15, %v7628_v36  ;;  %v3406_v22 = vpop.f32.mrf.mxu1  ;;  %v3816_v1 = vunpack.c.l.bf16 %v3773_v10  ;;  %v3817_v17 = vunpack.c.h.bf16 %v3773_v10  ;;  %v6229_v36 = vld [vmem:[#allocation11 + $0x6f8] sm:$0xf0]  ;;  %v7057_v15 = vld [vmem:[#allocation14] sm:$0xff]  ;;  %v3434_v38 = vpop.f32.mrf.mxu0  ;;  %v6200_v50 = vor.u32 %v7012_v46, %v6197_v47 }
 0x27e   :  { %v3407_v26 = vadd.f32 %v3406_v22, %v3392_v11  ;;  %v5877_v5 = vld [vmem:[#allocation11 + $0x438] sm:$0xf0] }
 0x27f   :  { %v3365_v6 = vadd.f32 %v7636_v29, %v3351_v19  ;;  %v6996_v8 = vld [vmem:[#allocation11 + $0x61c] sm:$0xf]  ;;  %v7088_v19 = vld [vmem:[#allocation14 + $0xf8] sm:$0xff] }
 0x280   :  { %3696 = vmatpush.bf16.msra.mxu2 %v5876_v33  ;;  %3710 = vmatpush.bf16.msra.mxu0 %v6132_v34  ;;  %v3840_v33 = vadd.f32 %v3832_v24, %v3816_v1  ;;  %v3841_v34 = vadd.f32 %v3833_v63, %v3817_v17  ;;  %v6133_v56 = vld [vmem:[#allocation11 + $0x638] sm:$0xf0] }
 0x281   :  { %4463 = vmatpush.bf16.msra.mxu3 %v7061_v31  ;;  %4477 = vmatpush.bf16.msra.mxu1 %v7069_v21  ;;  %v7020_v31 = vld [vmem:[#allocation11 + $0x6dc] sm:$0xf]  ;;  %v3420_v21 = vpop.f32.mrf.mxu2  ;;  %v3379_v29 = vadd.f32 %v7634_v23, %v3365_v6 }
 0x282   :  { %v3421_v35 = vadd.f32 %v3420_v21, %v3407_v26  ;;  %v5909_v23 = vld [vmem:[#allocation11 + $0x478] sm:$0xf0] }
 0x283   :  { %3697 = vmatmul.bf16.vlgmr.msra.gmra.mxu2 %v7598_v52  ;;  %3711 = vmatmul.bf16.vlgmr.msra.gmra.mxu0 %v7600_v53  ;;  %v5912_v3 = vor.u32 %v6940_v54, %v5909_v23  ;;  %v7079_v17 = vld [vmem:[#allocation14 + $0xb0] sm:$0xff]  ;;  %v7074_v23 = vld [vmem:[#allocation14 + $0x88] sm:$0xff] }
 0x284   :  { %3745 = vmatpush.bf16.msrb.mxu2 %v6104_v40  ;;  %3759 = vmatpush.bf16.msrb.mxu0 %v6360_v41  ;;  %v3435_v40 = vadd.f32 %v3434_v38, %v3421_v35  ;;  %v6232_v41 = vor.u32 %v7020_v31, %v6229_v36  ;;  %v7086_v31 = vld [vmem:[#allocation14 + $0xe8] sm:$0xff]  ;;  %v7077_v36 = vld [vmem:[#allocation14 + $0xa0] sm:$0xff]  ;;  %v7075_v46 = vld [vmem:[#allocation14 + $0x90] sm:$0xff] }
 0x285   :  { %4464 = vmatpush.bf16.msra.mxu3 %v7060_v20  ;;  %4478 = vmatpush.bf16.msra.mxu1 %v7068_v48  ;;  %v3856_v20 = vpack.c.bf16 %v3841_v34, %v3840_v33  ;;  %v3460_v43 = vpop.f32.mrf.mxu1  ;;  %v3488_v26 = vpop.f32.mrf.mxu0  ;;  %v3786_v35 = vld [vmem:[#allocation1 + $0x12] sm:$0xff]  ;;  %v3787_v38 = vld [vmem:[#allocation1 + $0x1b] sm:$0xff]  ;;  %v7083_v47 = vld [vmem:[#allocation14 + $0xd0] sm:$0xff] }
 0x286   :  { %v3777_v48 = vpack.c.bf16 %v3435_v40, %v3379_v29  ;;  %v3798_v40 = vpack.i.b16 %v3786_v35, %v3786_v35  ;;  %v7103_v35 = vld [vmem:[#allocation14 + $0x170] sm:$0xff] }
 0x287   :  { %v3864_v57 = vunpack.c.l.bf16 %v3856_v20  ;;  %v3865_v58 = vunpack.c.h.bf16 %v3856_v20 }
 0x288   :  { %3746 = vmatpush.bf16.msrb.mxu2 %v6072_v37  ;;  %3760 = vmatpush.bf16.msrb.mxu0 %v6328_v44  ;;  %v3824_v49 = vunpack.c.l.bf16 %v3777_v48  ;;  %v3825_v25 = vunpack.c.h.bf16 %v3777_v48  ;;  %v7004_v37 = vld [vmem:[#allocation11 + $0x65c] sm:$0xf] }
 0x289   :  { %4465 = vmatpush.bf16.msra.mxu3 %v7059_v7  ;;  %4479 = vmatpush.bf16.msra.mxu1 %v7067_v4  ;;  %v6165_v44 = vld [vmem:[#allocation11 + $0x678] sm:$0xf0]  ;;  %v3880_v11 = vmul.f32 0.010009766, %v3864_v57  ;;  %v3881_v12 = vmul.f32 0.010009766, %v3865_v58 }
 0x28a   :  { %v3848_v62 = vadd.f32 %v3832_v24, %v3824_v49  ;;  %v3849_v0 = vadd.f32 %v3833_v63, %v3825_v25  ;;  %v6168_v7 = vor.u32 %v7004_v37, %v6165_v44  ;;  %v6932_v4 = vld [vmem:[#allocation11 + $0x41c] sm:$0xf]  ;;  %v3800_v25 = vperm.slane %v3798_v40, 0  ;;  %v7082_v37 = vld [vmem:[#allocation14 + $0xc8] sm:$0xff] }
 0x28b   :  { %v5880_v55 = vor.u32 %v6932_v4, %v5877_v5  ;;  %v3920_v22 = vmax.f32 %v3864_v57, %v3880_v11  ;;  %v3921_v24 = vmax.f32 %v3865_v58, %v3881_v12 }
 0x28c   :  { %3747 = vmatpush.bf16.msrb.mxu2 %v6040_v9  ;;  %3761 = vmatpush.bf16.msrb.mxu0 %v6296_v14  ;;  %v3860_v2 = vpack.c.bf16 %v3849_v0, %v3848_v62  ;;  %v3446_v9 = vpop.f32.mrf.mxu3  ;;  %v3834_v62 = vunpack.c.l.bf16 %v3800_v25  ;;  %v7090_v25 = vld [vmem:[#allocation14 + $0x108] sm:$0xff] }
 0x28d   :  { %4466 = vmatpush.bf16.msra.mxu3 %v7058_v61  ;;  %4480 = vmatpush.bf16.msra.mxu1 %v7066_v18  ;;  %v6136_v61 = vor.u32 %v6996_v8, %v6133_v56  ;;  %v7080_v18 = vld [vmem:[#allocation14 + $0xb8] sm:$0xff]  ;;  %v3462_v21 = vpop.f32.mrf.mxu1  ;;  %v3461_v29 = vadd.f32 %v3460_v43, %v3446_v9  ;;  %v7073_v8 = vld [vmem:[#allocation14 + $0x80] sm:$0xff] }
 0x28e   :  { %v3872_v13 = vunpack.c.l.bf16 %v3860_v2  ;;  %v3873_v14 = vunpack.c.h.bf16 %v3860_v2  ;;  %v7081_v56 = vld [vmem:[#allocation14 + $0xc0] sm:$0xff] }
 0x290   :  { %3748 = vmatpush.bf16.msrb.mxu2 %v6008_v42  ;;  %3762 = vmatpush.bf16.msrb.mxu0 %v6264_v28  ;;  %v3888_v51 = vmul.f32 0.010009766, %v3872_v13  ;;  %v3889_v16 = vmul.f32 0.010009766, %v3873_v14  ;;  %v3474_v42 = vpop.f32.mrf.mxu2  ;;  %v7087_v28 = vld [vmem:[#allocation14 + $0xf0] sm:$0xff] }
 0x291   :  { %4467 = vmatpush.bf16.msra.mxu3 %v7057_v15  ;;  %4481 = vmatpush.bf16.msra.mxu1 %v7065_v32  ;;  %v7085_v15 = vld [vmem:[#allocation14 + $0xe0] sm:$0xff]  ;;  %v3490_v32 = vpop.f32.mrf.mxu0  ;;  %v3475_v45 = vadd.f32 %v3474_v42, %v3461_v29 }
 0x292   :  { %v3928_v10 = vmax.f32 %v3872_v13, %v3888_v51  ;;  %v3929_v63 = vmax.f32 %v3873_v14, %v3889_v16  ;;  %v7101_v29 = vld [vmem:[#allocation14 + $0x160] sm:$0xff] }
 0x294   :  { %3749 = vmatpush.bf16.msrb.mxu2 %v5976_v39  ;;  %3763 = vmatpush.bf16.msrb.mxu0 %v6232_v41  ;;  %v3936_v6 = vpack.c.bf16 %v3928_v10, %v3920_v22  ;;  %v3937_v1 = vpack.c.bf16 %v3929_v63, %v3921_v24  ;;  %v3448_v59 = vpop.f32.mrf.mxu3  ;;  %v7084_v39 = vld [vmem:[#allocation14 + $0xd8] sm:$0xff]  ;;  %v3801_v41 = vpack.i.b16 %v3787_v38, %v3787_v38  ;;  %v7094_v38 = vld [vmem:[#allocation14 + $0x128] sm:$0xff] }
 0x295   :  { %v3463_v57 = vadd.f32 %v3462_v21, %v3448_v59 }
 0x296   :  { %4468 = vmatmul.bf16.vlgmr.msra.gmra.mxu3 %v3936_v6  ;;  %4482 = vmatmul.bf16.vlgmr.msra.gmra.mxu1 %v3937_v1 }
 0x298   :  { %3750 = vmatpush.bf16.msrb.mxu2 %v5944_v27  ;;  %3764 = vmatpush.bf16.msrb.mxu0 %v6200_v50  ;;  %v3476_v33 = vpop.f32.mrf.mxu2  ;;  %v3803_v27 = vperm.slane %v3801_v41, 0  ;;  %v3489_v50 = vadd.f32 %v3488_v26, %v3475_v45  ;;  %v7092_v41 = vld [vmem:[#allocation14 + $0x118] sm:$0xff] }
 0x29a   :  { %v3835_v0 = vunpack.c.l.bf16 %v3803_v27  ;;  %v7098_v27 = vld [vmem:[#allocation14 + $0x148] sm:$0xff] }
 0x29c   :  { %3751 = vmatpush.bf16.msrb.mxu2 %v5912_v3  ;;  %3765 = vmatpush.bf16.msrb.mxu0 %v6168_v7  ;;  %v3502_v34 = vpop.f32.mrf.mxu3  ;;  %v3477_v7 = vadd.f32 %v3476_v33, %v3463_v57  ;;  %v3788_v57 = vld [vmem:[#allocation1 + $0x24] sm:$0xff] }
 0x29e   :  { %v3491_v43 = vadd.f32 %v3490_v32, %v3477_v7 }
 0x2a0   :  { %3752 = vmatpush.bf16.msrb.mxu2 %v5880_v55  ;;  %3766 = vmatpush.bf16.msrb.mxu0 %v6136_v61  ;;  %v3544_v20 = vpop.f32.mrf.mxu0 }
 0x2a3   :  { %3753 = vmatmul.bf16.vlgmr.msrb.gmra.mxu2 %v7598_v52  ;;  %3767 = vmatmul.bf16.vlgmr.msrb.gmra.mxu0 %v7600_v53  ;;  %v7076_v52 = vld [vmem:[#allocation14 + $0x98] sm:$0xff]  ;;  %v3516_v53 = vpop.f32.mrf.mxu1 }
 0x2a4   :  { %4488 = vmatpush.bf16.msra.mxu2 %v7080_v18  ;;  %4502 = vmatpush.bf16.msra.mxu0 %v7088_v19  ;;  %v3517_v60 = vadd.f32 %v3516_v53, %v3502_v34  ;;  %v3504_v44 = vpop.f32.mrf.mxu3  ;;  %v7095_v34 = vld [vmem:[#allocation14 + $0x130] sm:$0xff]  ;;  %v7093_v53 = vld [vmem:[#allocation14 + $0x120] sm:$0xff] }
 0x2a6   :  { %v3530_v48 = vpop.f32.mrf.mxu2 }
 0x2a7   :  { %v3531_v49 = vadd.f32 %v3530_v48, %v3517_v60  ;;  %v7100_v60 = vld [vmem:[#allocation14 + $0x158] sm:$0xff] }
 0x2a8   :  { %4489 = vmatpush.bf16.msra.mxu2 %v7079_v17  ;;  %4503 = vmatpush.bf16.msra.mxu0 %v7087_v28  ;;  %v3546_v14 = vpop.f32.mrf.mxu0  ;;  %v7096_v17 = vld [vmem:[#allocation14 + $0x138] sm:$0xff] }
 0x2a9   :  { %v3545_v54 = vadd.f32 %v3544_v20, %v3531_v49  ;;  %v7104_v28 = vld [vmem:[#allocation14 + $0x178] sm:$0xff]  ;;  %4516 = vmatpush.bf16.msrb.mxu3 %v7096_v17  ;;  %v7099_v20 = vld [vmem:[#allocation14 + $0x150] sm:$0xff] }
 0x2aa   :  { %4530 = vmatpush.bf16.msrb.mxu1 %v7104_v28 }
 0x2ab   :  { %v3774_v58 = vpack.c.bf16 %v3545_v54, %v3489_v50  ;;  %v3518_v2 = vpop.f32.mrf.mxu1 }
 0x2ac   :  { %4490 = vmatpush.bf16.msra.mxu2 %v7078_v30  ;;  %4504 = vmatpush.bf16.msra.mxu0 %v7086_v31  ;;  %v3519_v3 = vadd.f32 %v3518_v2, %v3504_v44  ;;  %v3804_v2 = vpack.i.b16 %v3788_v57, %v3788_v57  ;;  %v7116_v57 = vld [vmem:[#allocation14 + $0x1d8] sm:$0xff] }
 0x2ad   :  { %v3818_v4 = vunpack.c.l.bf16 %v3774_v58  ;;  %v3819_v5 = vunpack.c.h.bf16 %v3774_v58  ;;  %4517 = vmatpush.bf16.msrb.mxu3 %v7095_v34  ;;  %v3789_v58 = vld [vmem:[#allocation1 + $0x2d] sm:$0xff] }
 0x2ae   :  { %v3532_v9 = vpop.f32.mrf.mxu2  ;;  %4531 = vmatpush.bf16.msrb.mxu1 %v7103_v35  ;;  %v7112_v34 = vld [vmem:[#allocation14 + $0x1b8] sm:$0xff] }
 0x2af   :  { %v3842_v11 = vadd.f32 %v3834_v62, %v3818_v4  ;;  %v3843_v12 = vadd.f32 %v3835_v0, %v3819_v5  ;;  %v3533_v13 = vadd.f32 %v3532_v9, %v3519_v3  ;;  %v3807_v3 = vpack.i.b16 %v3789_v58, %v3789_v58  ;;  %v7120_v35 = vld [vmem:[#allocation14 + $0x1f8] sm:$0xff] }
 0x2b0   :  { %4491 = vmatpush.bf16.msra.mxu2 %v7077_v36  ;;  %4505 = vmatpush.bf16.msra.mxu0 %v7085_v15  ;;  %v3806_v9 = vperm.slane %v3804_v2, 0  ;;  %v7115_v2 = vld [vmem:[#allocation14 + $0x1d0] sm:$0xff] }
 0x2b1   :  { %v3547_v51 = vadd.f32 %v3546_v14, %v3533_v13  ;;  %v3857_v16 = vpack.c.bf16 %v3843_v12, %v3842_v11  ;;  %4518 = vmatpush.bf16.msrb.mxu3 %v7094_v38  ;;  %v3809_v11 = vperm.slane %v3807_v3, 0 }
 0x2b3   :  { %v3778_v55 = vpack.c.bf16 %v3547_v51, %v3491_v43  ;;  %v3866_v19 = vunpack.c.l.bf16 %v3857_v16  ;;  %v3867_v22 = vunpack.c.h.bf16 %v3857_v16  ;;  %v3572_v40 = vpop.f32.mrf.mxu1  ;;  %v3836_v16 = vunpack.c.l.bf16 %v3806_v9  ;;  %v7105_v9 = vld [vmem:[#allocation14 + $0x180] sm:$0xff] }
 0x2b4   :  { %4492 = vmatpush.bf16.msra.mxu2 %v7076_v52  ;;  %4506 = vmatpush.bf16.msra.mxu0 %v7084_v39  ;;  %v7102_v52 = vld [vmem:[#allocation14 + $0x168] sm:$0xff]  ;;  %v3558_v39 = vpop.f32.mrf.mxu3 }
 0x2b5   :  { %v3826_v61 = vunpack.c.l.bf16 %v3778_v55  ;;  %v3827_v18 = vunpack.c.h.bf16 %v3778_v55  ;;  %v3882_v26 = vmul.f32 0.010009766, %v3866_v19  ;;  %v3883_v42 = vmul.f32 0.010009766, %v3867_v22  ;;  %4532 = vmatpush.bf16.msrb.mxu1 %v7102_v52  ;;  %4519 = vmatpush.bf16.msrb.mxu3 %v7093_v53 }
 0x2b6   :  { %v3837_v55 = vunpack.c.l.bf16 %v3809_v11  ;;  %v7113_v11 = vld [vmem:[#allocation14 + $0x1c0] sm:$0xff] }
 0x2b7   :  { %v3850_v10 = vadd.f32 %v3834_v62, %v3826_v61  ;;  %v3851_v24 = vadd.f32 %v3835_v0, %v3827_v18  ;;  %v3922_v31 = vmax.f32 %v3866_v19, %v3882_v26  ;;  %v3923_v36 = vmax.f32 %v3867_v22, %v3883_v42 }
 0x2b8   :  { %4493 = vmatpush.bf16.msra.mxu2 %v7075_v46  ;;  %4507 = vmatpush.bf16.msra.mxu0 %v7083_v47  ;;  %v7091_v47 = vld [vmem:[#allocation14 + $0x110] sm:$0xff]  ;;  %v3573_v0 = vadd.f32 %v3572_v40, %v3558_v39 }
 0x2b9   :  { %v3861_v63 = vpack.c.bf16 %v3851_v24, %v3850_v10  ;;  %4533 = vmatpush.bf16.msrb.mxu1 %v7101_v29  ;;  %4520 = vmatpush.bf16.msrb.mxu3 %v7092_v41 }
 0x2bb   :  { %v3874_v6 = vunpack.c.l.bf16 %v3861_v63  ;;  %v3875_v1 = vunpack.c.h.bf16 %v3861_v63  ;;  %v3574_v49 = vpop.f32.mrf.mxu1 }
 0x2bc   :  { %4494 = vmatpush.bf16.msra.mxu2 %v7074_v23  ;;  %4508 = vmatpush.bf16.msra.mxu0 %v7082_v37  ;;  %v3560_v48 = vpop.f32.mrf.mxu3  ;;  %v7089_v23 = vld [vmem:[#allocation14 + $0x100] sm:$0xff] }
 0x2bd   :  { %v3890_v59 = vmul.f32 0.010009766, %v3874_v6  ;;  %v3891_v30 = vmul.f32 0.010009766, %v3875_v1  ;;  %4534 = vmatpush.bf16.msrb.mxu1 %v7100_v60  ;;  %4521 = vmatpush.bf16.msrb.mxu3 %v7091_v47  ;;  %v7097_v37 = vld [vmem:[#allocation14 + $0x140] sm:$0xff]  ;;  %v3575_v43 = vadd.f32 %v3574_v49, %v3560_v48  ;;  %v7111_v48 = vld [vmem:[#allocation14 + $0x1b0] sm:$0xff] }
 0x2be   :  { %v7119_v49 = vld [vmem:[#allocation14 + $0x1f0] sm:$0xff] }
 0x2bf   :  { %v3930_v21 = vmax.f32 %v3874_v6, %v3890_v59  ;;  %v3931_v15 = vmax.f32 %v3875_v1, %v3891_v30 }
 0x2c0   :  { %4495 = vmatpush.bf16.msra.mxu2 %v7073_v8  ;;  %4509 = vmatpush.bf16.msra.mxu0 %v7081_v56  ;;  %v3600_v45 = vpop.f32.mrf.mxu0 }
 0x2c1   :  { %v3938_v32 = vpack.c.bf16 %v3930_v21, %v3922_v31  ;;  %v3939_v33 = vpack.c.bf16 %v3931_v15, %v3923_v36  ;;  %4535 = vmatpush.bf16.msrb.mxu1 %v7099_v20  ;;  %4522 = vmatpush.bf16.msrb.mxu3 %v7090_v25  ;;  %v7110_v25 = vld [vmem:[#allocation14 + $0x1a8] sm:$0xff] }
 0x2c3   :  { %4496 = vmatmul.bf16.vlgmr.msra.gmra.mxu2 %v3938_v32  ;;  %4510 = vmatmul.bf16.vlgmr.msra.gmra.mxu0 %v3939_v33  ;;  %v3628_v62 = vpop.f32.mrf.mxu1 }
 0x2c4   :  { %v3614_v44 = vpop.f32.mrf.mxu3  ;;  %4544 = vmatpush.bf16.msrb.mxu2 %v7112_v34  ;;  %4558 = vmatpush.bf16.msrb.mxu0 %v7120_v35 }
 0x2c5   :  { %4536 = vmatpush.bf16.msrb.mxu1 %v7098_v27  ;;  %4523 = vmatpush.bf16.msrb.mxu3 %v7089_v23  ;;  %v3629_v7 = vadd.f32 %v3628_v62, %v3614_v44  ;;  %v7118_v27 = vld [vmem:[#allocation14 + $0x1e8] sm:$0xff]  ;;  %v7117_v23 = vld [vmem:[#allocation14 + $0x1e0] sm:$0xff]  ;;  %v7108_v44 = vld [vmem:[#allocation14 + $0x198] sm:$0xff] }
 0x2c6   :  { %v3586_v46 = vpop.f32.mrf.mxu2 }
 0x2c7   :  { %v3587_v4 = vadd.f32 %v3586_v46, %v3573_v0  ;;  %v7107_v0 = vld [vmem:[#allocation14 + $0x190] sm:$0xff] }
 0x2c8   :  { %v3602_v50 = vpop.f32.mrf.mxu0  ;;  %4545 = vmatpush.bf16.msrb.mxu2 %v7111_v48  ;;  %4559 = vmatpush.bf16.msrb.mxu0 %v7119_v49 }
 0x2c9   :  { %4537 = vmatpush.bf16.msrb.mxu1 %v7097_v37  ;;  %v3601_v12 = vadd.f32 %v3600_v45, %v3587_v4  ;;  %v7106_v4 = vld [vmem:[#allocation14 + $0x188] sm:$0xff] }
 0x2cb   :  { %v3630_v61 = vpop.f32.mrf.mxu1 }
 0x2cc   :  { %v3616_v14 = vpop.f32.mrf.mxu3  ;;  %4546 = vmatpush.bf16.msrb.mxu2 %v7110_v25  ;;  %4560 = vmatpush.bf16.msrb.mxu0 %v7118_v27 }
 0x2cd   :  { %v3631_v18 = vadd.f32 %v3630_v61, %v3616_v14  ;;  %v3791_v14 = vld [vmem:[#allocation1 + $0x3f] sm:$0xff] }
 0x2ce   :  { %v3588_v54 = vpop.f32.mrf.mxu2 }
 0x2cf   :  { %v3589_v19 = vadd.f32 %v3588_v54, %v3575_v43  ;;  %v7109_v54 = vld [vmem:[#allocation14 + $0x1a0] sm:$0xff] }
 0x2d0   :  { %4547 = vmatpush.bf16.msrb.mxu2 %v7109_v54  ;;  %4561 = vmatpush.bf16.msrb.mxu0 %v7117_v23 }
 0x2d1   :  { %v3603_v1 = vadd.f32 %v3602_v50, %v3589_v19 }
 0x2d3   :  { %v3684_v37 = vpop.f32.mrf.mxu1 }
 0x2d4   :  { %4548 = vmatpush.bf16.msrb.mxu2 %v7108_v44  ;;  %4562 = vmatpush.bf16.msrb.mxu0 %v7116_v57 }
 0x2d8   :  { %4549 = vmatpush.bf16.msrb.mxu2 %v7107_v0  ;;  %4563 = vmatpush.bf16.msrb.mxu0 %v7115_v2 }
 0x2d9   :  { %v3670_v50 = vpop.f32.mrf.mxu3 }
 0x2dc   :  { %4550 = vmatpush.bf16.msrb.mxu2 %v7106_v4 }
 0x2e0   :  { %v3656_v5 = vpop.f32.mrf.mxu0  ;;  %4551 = vmatpush.bf16.msrb.mxu2 %v7105_v9 }
 0x2e1   :  { %v3672_v3 = vpop.f32.mrf.mxu3 }
 0x2e6   :  { %v3642_v8 = vpop.f32.mrf.mxu2 }
 0x2e7   :  { %v3643_v56 = vadd.f32 %v3642_v8, %v3629_v7  ;;  %v3686_v7 = vpop.f32.mrf.mxu1 }
 0x2e8   :  { %v3658_v6 = vpop.f32.mrf.mxu0 }
 0x2e9   :  { %v3657_v13 = vadd.f32 %v3656_v5, %v3643_v56  ;;  %v7114_v5 = vld [vmem:[#allocation14 + $0x1c8] sm:$0xff] }
 0x2ea   :  { %4564 = vmatpush.bf16.msrb.mxu0 %v7114_v5 }
 0x2eb   :  { %v3775_v51 = vpack.c.bf16 %v3657_v13, %v3601_v12  ;;  %v3790_v13 = vld [vmem:[#allocation1 + $0x36] sm:$0xff] }
 0x2ed   :  { %v3820_v22 = vunpack.c.l.bf16 %v3775_v51  ;;  %v3821_v10 = vunpack.c.h.bf16 %v3775_v51  ;;  %v3685_v51 = vadd.f32 %v3684_v37, %v3670_v50 }
 0x2ee   :  { %v3644_v24 = vpop.f32.mrf.mxu2  ;;  %4565 = vmatpush.bf16.msrb.mxu0 %v7113_v11 }
 0x2ef   :  { %v3844_v63 = vadd.f32 %v3836_v16, %v3820_v22  ;;  %v3845_v26 = vadd.f32 %v3837_v55, %v3821_v10  ;;  %v3645_v42 = vadd.f32 %v3644_v24, %v3631_v18 }
 0x2f1   :  { %v3659_v17 = vadd.f32 %v3658_v6, %v3645_v42  ;;  %v3858_v28 = vpack.c.bf16 %v3845_v26, %v3844_v63 }
 0x2f3   :  { %v3779_v59 = vpack.c.bf16 %v3659_v17, %v3603_v1  ;;  %v3868_v21 = vunpack.c.l.bf16 %v3858_v28  ;;  %v3869_v36 = vunpack.c.h.bf16 %v3858_v28  ;;  %v3740_v43 = vpop.f32.mrf.mxu1  ;;  %v3687_v1 = vadd.f32 %v3686_v7, %v3672_v3  ;;  %v7139_v3 = vld [vmem:[%s7669_s8] ss:$0 sm:$0xff]  ;;  %s7383_s8 = smov [#allocation16]  }
 0x2f4   :  { %s4578_s3 = sshll.u32 %s7383_s8, 4  ;;  %s4579_s3 = int_to_ptr.vmem [resolvable:$true] %s4578_s3 }
 0x2f5   :  { %v3828_v30 = vunpack.c.l.bf16 %v3779_v59  ;;  %v3829_v31 = vunpack.c.h.bf16 %v3779_v59  ;;  %v3884_v38 = vmul.f32 0.010009766, %v3868_v21  ;;  %v3885_v52 = vmul.f32 0.010009766, %v3869_v36 }
 0x2f7   :  { %v3852_v15 = vadd.f32 %v3836_v16, %v3828_v30  ;;  %v3853_v32 = vadd.f32 %v3837_v55, %v3829_v31  ;;  %v3924_v41 = vmax.f32 %v3868_v21, %v3884_v38  ;;  %v3925_v45 = vmax.f32 %v3869_v36, %v3885_v52 }
 0x2f8   :  { %v3810_v16 = vpack.i.b16 %v3790_v13, %v3790_v13  ;;  %v3813_v55 = vpack.i.b16 %v3791_v14, %v3791_v14 }
 0x2f9   :  { %v3862_v33 = vpack.c.bf16 %v3853_v32, %v3852_v15  ;;  %v3726_v12 = vpop.f32.mrf.mxu3 }
 0x2fa   :  { %v3741_v61 = vadd.f32 %v3740_v43, %v3726_v12  ;;  %v3812_v24 = vperm.slane %v3810_v16, 0  ;;  %v3815_v63 = vperm.slane %v3813_v55, 0 }
 0x2fb   :  { %v3876_v39 = vunpack.c.l.bf16 %v3862_v33  ;;  %v3877_v53 = vunpack.c.h.bf16 %v3862_v33  ;;  %v3742_v30 = vpop.f32.mrf.mxu1 }
 0x2fc   :  { %v3838_v28 = vunpack.c.l.bf16 %v3812_v24  ;;  %v3839_v59 = vunpack.c.l.bf16 %v3815_v63 }
 0x2fd   :  { %v3892_v29 = vmul.f32 0.010009766, %v3876_v39  ;;  %v3893_v40 = vmul.f32 0.010009766, %v3877_v53 }
 0x2ff   :  { %v3932_v60 = vmax.f32 %v3876_v39, %v3892_v29  ;;  %v3933_v46 = vmax.f32 %v3877_v53, %v3893_v40 }
 0x300   :  { %v3712_v58 = vpop.f32.mrf.mxu0 }
 0x301   :  { %v3940_v47 = vpack.c.bf16 %v3932_v60, %v3924_v41  ;;  %v3941_v20 = vpack.c.bf16 %v3933_v46, %v3925_v45  ;;  %v3728_v6 = vpop.f32.mrf.mxu3 }
 0x302   :  { %v3743_v31 = vadd.f32 %v3742_v30, %v3728_v6 }
 0x303   :  { %4524 = vmatmul.bf16.vlgmr.msrb.gmra.mxu3 %v3940_v47  ;;  %4538 = vmatmul.bf16.vlgmr.msrb.gmra.mxu1 %v3941_v20 }
 0x306   :  { %v3698_v62 = vpop.f32.mrf.mxu2 }
 0x307   :  { %v3699_v18 = vadd.f32 %v3698_v62, %v3685_v51 }
 0x308   :  { %v3714_v8 = vpop.f32.mrf.mxu0 }
 0x309   :  { %v3713_v26 = vadd.f32 %v3712_v58, %v3699_v18 }
 0x30e   :  { %v3700_v56 = vpop.f32.mrf.mxu2 }
 0x30f   :  { %v3701_v21 = vadd.f32 %v3700_v56, %v3687_v1 }
 0x311   :  { %v3715_v52 = vadd.f32 %v3714_v8, %v3701_v21 }
 0x313   :  { %v4483_v2 = vpop.f32.mrf.mxu1 }
 0x319   :  { %v4469_v0 = vpop.f32.mrf.mxu3 }
 0x31a   :  { %v4470_v8 = vadd.f32 %v7139_v3, %v4469_v0 }
 0x31b   :  { %v4485_v9 = vpop.f32.mrf.mxu1 }
 0x31c   :  { %v4484_v56 = vadd.f32 %v4483_v2, %v4470_v8 }
 0x320   :  { %v3768_v19 = vpop.f32.mrf.mxu0 }
 0x321   :  { %v4471_v7 = vpop.f32.mrf.mxu3 }
 0x322   :  { %v4472_v13 = vadd.f32 %v7139_v3, %v4471_v7 }
 0x324   :  { %v4486_v16 = vadd.f32 %v4485_v9, %v4472_v13 }
 0x326   :  { %v3754_v22 = vpop.f32.mrf.mxu2 }
 0x327   :  { %v3755_v10 = vadd.f32 %v3754_v22, %v3741_v61 }
 0x328   :  { %v3770_v38 = vpop.f32.mrf.mxu0 }
 0x329   :  { %v3769_v42 = vadd.f32 %v3768_v19, %v3755_v10 }
 0x32b   :  { %v3776_v17 = vpack.c.bf16 %v3769_v42, %v3713_v26 }
 0x32d   :  { %v3822_v36 = vunpack.c.l.bf16 %v3776_v17  ;;  %v3823_v15 = vunpack.c.h.bf16 %v3776_v17 }
 0x32e   :  { %v3756_v32 = vpop.f32.mrf.mxu2 }
 0x32f   :  { %v3846_v33 = vadd.f32 %v3838_v28, %v3822_v36  ;;  %v3847_v34 = vadd.f32 %v3839_v59, %v3823_v15  ;;  %v3757_v35 = vadd.f32 %v3756_v32, %v3743_v31 }
 0x331   :  { %v3771_v39 = vadd.f32 %v3770_v38, %v3757_v35  ;;  %v3859_v53 = vpack.c.bf16 %v3847_v34, %v3846_v33 }
 0x333   :  { %v3780_v29 = vpack.c.bf16 %v3771_v39, %v3715_v52  ;;  %v3870_v60 = vunpack.c.l.bf16 %v3859_v53  ;;  %v3871_v45 = vunpack.c.h.bf16 %v3859_v53 }
 0x335   :  { %v3830_v40 = vunpack.c.l.bf16 %v3780_v29  ;;  %v3831_v41 = vunpack.c.h.bf16 %v3780_v29  ;;  %v3886_v48 = vmul.f32 0.010009766, %v3870_v60  ;;  %v3887_v49 = vmul.f32 0.010009766, %v3871_v45 }
 0x337   :  { %v3854_v46 = vadd.f32 %v3838_v28, %v3830_v40  ;;  %v3855_v47 = vadd.f32 %v3839_v59, %v3831_v41  ;;  %v3926_v23 = vmax.f32 %v3870_v60, %v3886_v48  ;;  %v3927_v44 = vmax.f32 %v3871_v45, %v3887_v49 }
 0x339   :  { %v3863_v20 = vpack.c.bf16 %v3855_v47, %v3854_v46 }
 0x33b   :  { %v3878_v25 = vunpack.c.l.bf16 %v3863_v20  ;;  %v3879_v27 = vunpack.c.h.bf16 %v3863_v20 }
 0x33d   :  { %v3894_v50 = vmul.f32 0.010009766, %v3878_v25  ;;  %v3895_v54 = vmul.f32 0.010009766, %v3879_v27 }
 0x33f   :  { %v3934_v37 = vmax.f32 %v3878_v25, %v3894_v50  ;;  %v3935_v57 = vmax.f32 %v3879_v27, %v3895_v54 }
 0x340   :  { %v4511_v4 = vpop.f32.mrf.mxu0 }
 0x341   :  { %v3942_v58 = vpack.c.bf16 %v3934_v37, %v3926_v23  ;;  %v3943_v62 = vpack.c.bf16 %v3935_v57, %v3927_v44 }
 0x343   :  { %4552 = vmatmul.bf16.vlgmr.msrb.gmra.mxu2 %v3942_v58  ;;  %4566 = vmatmul.bf16.vlgmr.msrb.gmra.mxu0 %v3943_v62 }
 0x346   :  { %v4497_v5 = vpop.f32.mrf.mxu2 }
 0x347   :  { %v4498_v11 = vadd.f32 %v4497_v5, %v4484_v56 }
 0x348   :  { %v4513_v14 = vpop.f32.mrf.mxu0 }
 0x349   :  { %v4512_v51 = vadd.f32 %v4511_v4, %v4498_v11 }
 0x34e   :  { %v4499_v43 = vpop.f32.mrf.mxu2 }
 0x34f   :  { %v4500_v18 = vadd.f32 %v4499_v43, %v4486_v16 }
 0x351   :  { %v4514_v63 = vadd.f32 %v4513_v14, %v4500_v18 }
 0x380   :  { %v4539_v61 = vpop.f32.mrf.mxu1 }
 0x386   :  { %v4525_v12 = vpop.f32.mrf.mxu3 }
 0x387   :  { %v4526_v55 = vadd.f32 %v4525_v12, %v4512_v51 }
 0x388   :  { %v4541_v1 = vpop.f32.mrf.mxu1 }
 0x389   :  { %v4540_v22 = vadd.f32 %v4539_v61, %v4526_v55 }
 0x38e   :  { %v4527_v19 = vpop.f32.mrf.mxu3 }
 0x38f   :  { %v4528_v42 = vadd.f32 %v4527_v19, %v4514_v63 }
 0x391   :  { %v4542_v17 = vadd.f32 %v4541_v1, %v4528_v42 }
 0x3c0   :  { %v4567_v10 = vpop.f32.mrf.mxu0 }
 0x3c6   :  { %v4553_v24 = vpop.f32.mrf.mxu2 }
 0x3c7   :  { %v4554_v26 = vadd.f32 %v4553_v24, %v4540_v22 }
 0x3c8   :  { %v4569_v30 = vpop.f32.mrf.mxu0 }
 0x3c9   :  { %v4568_v6 = vadd.f32 %v4567_v10, %v4554_v26 }
 0x3cb   :  { %4572 = vst [vmem:[#allocation16] sm:$0xff] %v4568_v6 }
 0x3ce   :  { %v4555_v28 = vpop.f32.mrf.mxu2 }
 0x3cf   :  { %v4556_v59 = vadd.f32 %v4555_v28, %v4542_v17 }
 0x3d1   :  { %v4570_v31 = vadd.f32 %v4569_v30, %v4556_v59 }
 0x3d3   :  { %4573 = vst [vmem:[#allocation16 + $0x8] sm:$0xff] %v4570_v31 }
 0x3d4   :  { %4586 = dma.vmem_to_hbm [thread:$0]  %s4579_s3, 256, %s4581_s29, [#allocation4], %s7384_s30, %s7384_s30, %s7385_s10  }
 0x3d5   :  { %7366 = dma.done.wait [#allocation4], 256  }
 0x3d6   :  { %7367 = vsyncadd [#allocation4], 4294967040 }
 0x3d7   :  { %4591 = vsyncpa [#allocation3], 1 }
 0x3d8   :  { %4592 = vsyncpa [#allocation6], 1 }
 0x3d9   :  { %4593 = vsyncpa [#allocation9], 1 }
 0x3da   :  { %4594 = vsyncpa [#allocation12], 1 }
 0x3db   :  { %4595 = vsyncpa [#allocation15], 1 }
 0x3dc   :  { %4596 = vsyncpa [#allocation4], 1 }

</bundles_post_ra>
